<compile_context>
chip_gen: v7x
topology: tpu7x:2x2x1
jax: 0.10.0
libtpu: 0.0.40
codegen_flags: <defaults>
</compile_context>

<pallas_src>
import functools

import jax
import jax.numpy as jnp
from jax.experimental import pallas as pl
from jax.experimental.pallas import tpu as pltpu


def _round_up(x, m):
    return (x + m - 1) // m * m


def _ca_residual_kernel(x_ref, w1_ref, b1_ref, w2_ref, b2_ref,
                        wca1_ref, bca1_ref, wca2_ref, bca2_ref,
                        o_ref, pad_ref, patch_ref, *, H, W, S):
    # x_ref   : (1, L, Cp) f32   flat SAME-padded image, row width Wp=W+2,
    #                            padded with >=2 extra zero rows (L >= Hp*Wp+2)
    # w1/w2   : (9*Cp, Cp) bf16  stacked 3x3 weights, row = (dy*3+dx)*Cp + cin
    # b1/b2   : (1, Cp)   f32
    # wca1    : (Cp, Cm)  f32 ;  bca1: (1, Cm) ; wca2: (Cm, Cp) ; bca2: (1, Cp)
    # o_ref   : (1, M, Cp) f32   extended-grid output (M = H*Wp, junk cols W..W+1)
    # pad_ref : (L2, Cp)  bf16   flat padded h1 scratch (interior at offset S)
    # patch_ref: (M, 9*Cp) bf16  im2col patch scratch (lane-aligned tap bands)
    Wp = W + 2
    M = H * Wp
    Cp = o_ref.shape[-1]
    L2 = pad_ref.shape[0]

    # Column-validity mask on the extended grid (False on the 2 junk columns).
    col = jax.lax.broadcasted_iota(jnp.int32, (M, 1), 0) % Wp
    valid = col < W

    # ---- conv1: 9 shifted views of the padded input -> lane-aligned patch,
    #      then ONE K = 9*Cp bf16 matmul with f32 accumulation. ---------------
    for dy in range(3):
        for dx in range(3):
            t = dy * 3 + dx
            off = dy * Wp + dx
            patch_ref[:, t * Cp:(t + 1) * Cp] = (
                x_ref[0, off:off + M, :].astype(jnp.bfloat16))
    h1 = jnp.dot(patch_ref[...], w1_ref[...],
                 preferred_element_type=jnp.float32) + b1_ref[...]
    # ReLU + zero the junk columns (needed so the re-pad below stays exact).
    h1 = jnp.where(valid, jnp.maximum(h1, 0.0), 0.0)

    # ---- re-pad h1: zero small head/tail, one sublane-ALIGNED interior store.
    pad_ref[0:S, :] = jnp.zeros((S, Cp), jnp.bfloat16)
    pad_ref[S + M:L2, :] = jnp.zeros((L2 - S - M, Cp), jnp.bfloat16)
    pad_ref[S:S + M, :] = h1.astype(jnp.bfloat16)

    # ---- conv2: same flat-view tap trick on the padded-h1 scratch. ----------
    base = S - (Wp + 1)
    for dy in range(3):
        for dx in range(3):
            t = dy * 3 + dx
            off = base + dy * Wp + dx
            patch_ref[:, t * Cp:(t + 1) * Cp] = pad_ref[off:off + M, :]
    h2 = jnp.dot(patch_ref[...], w2_ref[...],
                 preferred_element_type=jnp.float32) + b2_ref[...]

    # ---- CALayer: global avg pool -> 1x1 conv -> ReLU -> 1x1 conv -> sigmoid.
    pooled = jnp.sum(jnp.where(valid, h2, 0.0), axis=0, keepdims=True) \
        * (1.0 / (H * W))                                            # (1, Cp)
    z1 = jnp.maximum(
        jnp.dot(pooled, wca1_ref[...], preferred_element_type=jnp.float32)
        + bca1_ref[...], 0.0)                                        # (1, Cm)
    att = jax.nn.sigmoid(
        jnp.dot(z1, wca2_ref[...], preferred_element_type=jnp.float32)
        + bca2_ref[...])                                             # (1, Cp)

    # ---- attention * h2 + residual, ReLU; contiguous lane-dense store. ------
    x_res = x_ref[0, Wp + 1:Wp + 1 + M, :]            # residual on ext. grid
    o_ref[0] = jnp.maximum(h2 * att + x_res, 0.0).astype(o_ref.dtype)


def ca_residual_block(x_nchw, params):
    """Pallas forward of CAResidualBlock (mode='origin').

    x_nchw: (N, C, H, W) float32 -> (N, C, H, W) float32.
    """
    x_nchw = x_nchw.astype(jnp.float32)
    N, C, H, W = x_nchw.shape
    Hp, Wp = H + 2, W + 2
    M = H * Wp                                    # extended-grid rows per image
    Cp = _round_up(C, 128)                        # lane-dense channel count
    Cmid = params["ca1_w"].shape[0]
    Cm = _round_up(Cmid, 128)
    L = _round_up(Hp * Wp + 2, 8)                 # flat padded rows (+ tap slack)
    S = _round_up(Wp + 1, 8)                      # aligned h1 write offset
    L2 = _round_up(S + M + Wp + 1, 8)             # padded-h1 scratch rows

    # NCHW -> NHWC, 1-pixel spatial zero-pad, channel zero-pad to Cp, flatten.
    xh = jnp.transpose(x_nchw, (0, 2, 3, 1))
    xp = jnp.pad(xh, ((0, 0), (1, 1), (1, 1), (0, Cp - C)))
    xp = jnp.pad(xp.reshape(N, Hp * Wp, Cp), ((0, 0), (0, L - Hp * Wp), (0, 0)))

    # torch conv weight (Cout, Cin, 3, 3) -> channel-padded, stacked
    # (9*Cp, Cp) bf16 with row index (dy*3 + dx)*Cp + cin (matches patch order).
    def stack3x3(w):
        w = jnp.pad(w.astype(jnp.float32),
                    ((0, Cp - C), (0, Cp - C), (0, 0), (0, 0)))
        return jnp.transpose(w, (2, 3, 1, 0)).reshape(9 * Cp, Cp).astype(jnp.bfloat16)

    def padvec(v, n):
        return jnp.pad(v.astype(jnp.float32), (0, n - v.shape[0])).reshape(1, n)

    w1 = stack3x3(params["conv1_w"])
    w2 = stack3x3(params["conv2_w"])
    b1 = padvec(params["conv1_b"], Cp)
    b2 = padvec(params["conv2_b"], Cp)
    wca1 = jnp.pad(params["ca1_w"][:, :, 0, 0].astype(jnp.float32),
                   ((0, Cm - Cmid), (0, Cp - C))).T                 # (Cp, Cm)
    bca1 = padvec(params["ca1_b"], Cm)
    wca2 = jnp.pad(params["ca2_w"][:, :, 0, 0].astype(jnp.float32),
                   ((0, Cp - C), (0, Cm - Cmid))).T                 # (Cm, Cp)
    bca2 = padvec(params["ca2_b"], Cp)

    def const(shape):
        return pl.BlockSpec(shape, lambda n: (0,) * len(shape))

    kernel = functools.partial(_ca_residual_kernel, H=H, W=W, S=S)

    # Corrected (advisory) cost estimate: two K=9*Cp convs on the extended grid.
    flops = N * (2 * 2 * M * (9 * Cp) * Cp + 4 * Cp * Cm + 8 * M * Cp)
    bytes_accessed = (4 * N * (L + M) * Cp                 # x in + out (f32)
                      + 2 * 2 * 9 * Cp * Cp                # w1, w2 (bf16)
                      + 4 * (2 * Cp * Cm + 2 * Cp + Cm))   # CA weights/biases
    cost = pl.CostEstimate(flops=flops, transcendentals=N * Cp,
                           bytes_accessed=int(bytes_accessed))

    out = pl.pallas_call(
        kernel,
        out_shape=jax.ShapeDtypeStruct((N, M, Cp), jnp.float32),
        grid=(N,),
        in_specs=[pl.BlockSpec((1, L, Cp), lambda n: (n, 0, 0)),
                  const((9 * Cp, Cp)), const((1, Cp)),
                  const((9 * Cp, Cp)), const((1, Cp)),
                  const((Cp, Cm)), const((1, Cm)),
                  const((Cm, Cp)), const((1, Cp))],
        out_specs=pl.BlockSpec((1, M, Cp), lambda n: (n, 0, 0)),
        scratch_shapes=[pltpu.VMEM((L2, Cp), jnp.bfloat16),
                        pltpu.VMEM((M, 9 * Cp), jnp.bfloat16)],
        compiler_params=pltpu.CompilerParams(
            dimension_semantics=("parallel",),
            vmem_limit_bytes=32 * 1024 * 1024),
        cost_estimate=cost,
    )(xp, w1, b1, w2, b2, wca1, bca1, wca2, bca2)

    # Strip the 2 junk columns and padded channels, back to NCHW.
    out = out.reshape(N, H, Wp, Cp)[:, :, :W, :C]
    return jnp.transpose(out, (0, 3, 1, 2))


def ca_residual_block_reference(x_nchw, params):
    """Pure-JAX f32 reference (XLA convs) for correctness checking."""
    x = jnp.transpose(x_nchw, (0, 2, 3, 1)).astype(jnp.float32)

    def conv3x3(inp, w, b):
        w_hwio = jnp.transpose(w, (2, 3, 1, 0))
        y = jax.lax.conv_general_dilated(
            inp, w_hwio, window_strides=(1, 1), padding="SAME",
            dimension_numbers=("NHWC", "HWIO", "NHWC"))
        return y + b[None, None, None, :]

    h = jax.nn.relu(conv3x3(x, params["conv1_w"], params["conv1_b"]))
    h = conv3x3(h, params["conv2_w"], params["conv2_b"])
    pooled = jnp.mean(h, axis=(1, 2), keepdims=True)                 # (N,1,1,C)
    z = jax.nn.relu(
        jnp.einsum("nhwc,mc->nhwm", pooled, params["ca1_w"][:, :, 0, 0])
        + params["ca1_b"])
    att = jax.nn.sigmoid(
        jnp.einsum("nhwm,cm->nhwc", z, params["ca2_w"][:, :, 0, 0])
        + params["ca2_b"])
    out = jax.nn.relu(h * att + x)
    return jnp.transpose(out, (0, 3, 1, 2))


def _make_params(key, C, Cmid):
    ks = jax.random.split(key, 8)
    return {
        "conv1_w": jax.random.normal(ks[0], (C, C, 3, 3), jnp.float32) * 0.05,
        "conv1_b": jax.random.normal(ks[1], (C,), jnp.float32) * 0.05,
        "conv2_w": jax.random.normal(ks[2], (C, C, 3, 3), jnp.float32) * 0.05,
        "conv2_b": jax.random.normal(ks[3], (C,), jnp.float32) * 0.05,
        "ca1_w": jax.random.normal(ks[4], (Cmid, C, 1, 1), jnp.float32) * 0.1,
        "ca1_b": jax.random.normal(ks[5], (Cmid,), jnp.float32) * 0.1,
        "ca2_w": jax.random.normal(ks[6], (C, Cmid, 1, 1), jnp.float32) * 0.1,
        "ca2_b": jax.random.normal(ks[7], (C,), jnp.float32) * 0.1,
    }


if __name__ == "__main__":
    key = jax.random.PRNGKey(0)
    # First config uses native C=128 lanes; second exercises the channel
    # zero-padding path (C=32 -> padded to 128).
    for (N, C, H, W, red) in [(2, 128, 16, 16, 16), (2, 32, 16, 16, 8)]:
        kp, kx, key = jax.random.split(key, 3)
        params = _make_params(kp, C, C // red)
        x = jax.random.normal(kx, (N, C, H, W), jnp.float32)

        out = jax.block_until_ready(ca_residual_block(x, params))
        ref = jax.block_until_ready(ca_residual_block_reference(x, params))

        assert out.shape == (N, C, H, W), out.shape
        max_err = float(jnp.max(jnp.abs(out - ref)))
        # bf16 matmul operands (f32 accumulation) => looser tolerance than f32.
        assert jnp.allclose(out, ref, atol=1e-1, rtol=1e-1), max_err
    print("KERNEL_OK")
</pallas_src>

<mosaic_0001>
module attributes {stable_mosaic.version = 11 : i64} {
  func.func @_ca_residual_kernel(%arg0: i32, %arg1: memref<1x328x128xf32, #tpu.memory_space<vmem>>, %arg2: memref<1152x128xbf16, #tpu.memory_space<vmem>>, %arg3: memref<1x128xf32, #tpu.memory_space<vmem>>, %arg4: memref<1152x128xbf16, #tpu.memory_space<vmem>>, %arg5: memref<1x128xf32, #tpu.memory_space<vmem>>, %arg6: memref<128x128xf32, #tpu.memory_space<vmem>>, %arg7: memref<1x128xf32, #tpu.memory_space<vmem>>, %arg8: memref<128x128xf32, #tpu.memory_space<vmem>>, %arg9: memref<1x128xf32, #tpu.memory_space<vmem>>, %arg10: memref<1x288x128xf32, #tpu.memory_space<vmem>>, %arg11: memref<336x128xbf16, #tpu.memory_space<vmem>>, %arg12: memref<288x1152xbf16, #tpu.memory_space<vmem>>) attributes {dimension_semantics = [#tpu.dimension_semantics<parallel>], iteration_bounds = array<i64: 2>, scalar_prefetch = 0 : i64, scratch_operands = 2 : i64, tpu.core_type = #tpu.core_type<tc>, window_params = [{transform_indices = @transform_0, window_bounds = array<i64: 1, 328, 128>}, {pipeline_mode = #tpu.pipeline_mode<synchronous>, transform_indices = @transform_1, window_bounds = array<i64: 1152, 128>}, {pipeline_mode = #tpu.pipeline_mode<synchronous>, transform_indices = @transform_2, window_bounds = array<i64: 1, 128>}, {pipeline_mode = #tpu.pipeline_mode<synchronous>, transform_indices = @transform_3, window_bounds = array<i64: 1152, 128>}, {pipeline_mode = #tpu.pipeline_mode<synchronous>, transform_indices = @transform_4, window_bounds = array<i64: 1, 128>}, {pipeline_mode = #tpu.pipeline_mode<synchronous>, transform_indices = @transform_5, window_bounds = array<i64: 128, 128>}, {pipeline_mode = #tpu.pipeline_mode<synchronous>, transform_indices = @transform_6, window_bounds = array<i64: 1, 128>}, {pipeline_mode = #tpu.pipeline_mode<synchronous>, transform_indices = @transform_7, window_bounds = array<i64: 128, 128>}, {pipeline_mode = #tpu.pipeline_mode<synchronous>, transform_indices = @transform_8, window_bounds = array<i64: 1, 128>}, {transform_indices = @transform_9, window_bounds = array<i64: 1, 288, 128>}]} {
    %0 = tpu.iota {dimensions = array<i32: 0>} : vector<288x1xi32>
    %c18_i32 = arith.constant 18 : i32
    %c0_i32 = arith.constant 0 : i32
    %1 = arith.cmpi eq, %c18_i32, %c0_i32 : i32
    %c1_i32 = arith.constant 1 : i32
    %2 = arith.select %1, %c1_i32, %c18_i32 : i32
    %3 = vector.broadcast %2 : i32 to vector<288x1xi32>
    %4 = arith.remsi %0, %3 : vector<288x1xi32>
    %c0_i32_0 = arith.constant 0 : i32
    %5 = vector.broadcast %c0_i32_0 : i32 to vector<288x1xi32>
    %6 = arith.cmpi ne, %4, %5 : vector<288x1xi32>
    %c0_i32_1 = arith.constant 0 : i32
    %7 = vector.broadcast %c0_i32_1 : i32 to vector<288x1xi32>
    %8 = arith.cmpi slt, %4, %7 : vector<288x1xi32>
    %c0_i32_2 = arith.constant 0 : i32
    %9 = arith.cmpi slt, %2, %c0_i32_2 : i32
    %10 = vector.broadcast %9 : i1 to vector<288x1xi1>
    %11 = vector.broadcast %10 : vector<288x1xi1> to vector<288x1xi1>
    %12 = arith.xori %8, %11 : vector<288x1xi1>
    %13 = arith.andi %12, %6 : vector<288x1xi1>
    %14 = vector.broadcast %2 : i32 to vector<288x1xi32>
    %15 = arith.addi %4, %14 : vector<288x1xi32>
    %16 = arith.select %13, %15, %4 : vector<288x1xi1>, vector<288x1xi32>
    %c16_i32 = arith.constant 16 : i32
    %17 = vector.broadcast %c16_i32 : i32 to vector<288x1xi32>
    %18 = arith.cmpi slt, %16, %17 : vector<288x1xi32>
    %c0 = arith.constant 0 : index
    %c0_3 = arith.constant 0 : index
    %c0_4 = arith.constant 0 : index
    %19 = vector.load %arg1[%c0, %c0_3, %c0_4] : memref<1x328x128xf32, #tpu.memory_space<vmem>>, vector<1x288x128xf32>
    %20 = vector.shape_cast %19 : vector<1x288x128xf32> to vector<288x128xf32>
    %21 = arith.truncf %20 : vector<288x128xf32> to vector<288x128xbf16>
    %c0_5 = arith.constant 0 : index
    %c0_6 = arith.constant 0 : index
    %22 = vector.load %arg12[%c0_5, %c0_6] : memref<288x1152xbf16, #tpu.memory_space<vmem>>, vector<288x128xbf16>
    tpu.vector_store %arg12[%c0_5, %c0_6], %21 {strides = array<i32>} : memref<288x1152xbf16, #tpu.memory_space<vmem>>, vector<288x128xbf16>,
    %c0_7 = arith.constant 0 : index
    %c1 = arith.constant 1 : index
    %c0_8 = arith.constant 0 : index
    %23 = vector.load %arg1[%c0_7, %c1, %c0_8] : memref<1x328x128xf32, #tpu.memory_space<vmem>>, vector<1x288x128xf32>
    %24 = vector.shape_cast %23 : vector<1x288x128xf32> to vector<288x128xf32>
    %25 = arith.truncf %24 : vector<288x128xf32> to vector<288x128xbf16>
    %c0_9 = arith.constant 0 : index
    %c128 = arith.constant 128 : index
    %26 = vector.load %arg12[%c0_9, %c128] : memref<288x1152xbf16, #tpu.memory_space<vmem>>, vector<288x128xbf16>
    tpu.vector_store %arg12[%c0_9, %c128], %25 {strides = array<i32>} : memref<288x1152xbf16, #tpu.memory_space<vmem>>, vector<288x128xbf16>,
    %c0_10 = arith.constant 0 : index
    %c2 = arith.constant 2 : index
    %c0_11 = arith.constant 0 : index
    %27 = vector.load %arg1[%c0_10, %c2, %c0_11] : memref<1x328x128xf32, #tpu.memory_space<vmem>>, vector<1x288x128xf32>
    %28 = vector.shape_cast %27 : vector<1x288x128xf32> to vector<288x128xf32>
    %29 = arith.truncf %28 : vector<288x128xf32> to vector<288x128xbf16>
    %c0_12 = arith.constant 0 : index
    %c256 = arith.constant 256 : index
    %30 = vector.load %arg12[%c0_12, %c256] : memref<288x1152xbf16, #tpu.memory_space<vmem>>, vector<288x128xbf16>
    tpu.vector_store %arg12[%c0_12, %c256], %29 {strides = array<i32>} : memref<288x1152xbf16, #tpu.memory_space<vmem>>, vector<288x128xbf16>,
    %c0_13 = arith.constant 0 : index
    %c18 = arith.constant 18 : index
    %c0_14 = arith.constant 0 : index
    %31 = vector.load %arg1[%c0_13, %c18, %c0_14] : memref<1x328x128xf32, #tpu.memory_space<vmem>>, vector<1x288x128xf32>
    %32 = vector.shape_cast %31 : vector<1x288x128xf32> to vector<288x128xf32>
    %33 = arith.truncf %32 : vector<288x128xf32> to vector<288x128xbf16>
    %c0_15 = arith.constant 0 : index
    %c384 = arith.constant 384 : index
    %34 = vector.load %arg12[%c0_15, %c384] : memref<288x1152xbf16, #tpu.memory_space<vmem>>, vector<288x128xbf16>
    tpu.vector_store %arg12[%c0_15, %c384], %33 {strides = array<i32>} : memref<288x1152xbf16, #tpu.memory_space<vmem>>, vector<288x128xbf16>,
    %c0_16 = arith.constant 0 : index
    %c19 = arith.constant 19 : index
    %c0_17 = arith.constant 0 : index
    %35 = vector.load %arg1[%c0_16, %c19, %c0_17] : memref<1x328x128xf32, #tpu.memory_space<vmem>>, vector<1x288x128xf32>
    %36 = vector.shape_cast %35 : vector<1x288x128xf32> to vector<288x128xf32>
    %37 = arith.truncf %36 : vector<288x128xf32> to vector<288x128xbf16>
    %c0_18 = arith.constant 0 : index
    %c512 = arith.constant 512 : index
    %38 = vector.load %arg12[%c0_18, %c512] : memref<288x1152xbf16, #tpu.memory_space<vmem>>, vector<288x128xbf16>
    tpu.vector_store %arg12[%c0_18, %c512], %37 {strides = array<i32>} : memref<288x1152xbf16, #tpu.memory_space<vmem>>, vector<288x128xbf16>,
    %c0_19 = arith.constant 0 : index
    %c20 = arith.constant 20 : index
    %c0_20 = arith.constant 0 : index
    %39 = vector.load %arg1[%c0_19, %c20, %c0_20] : memref<1x328x128xf32, #tpu.memory_space<vmem>>, vector<1x288x128xf32>
    %40 = vector.shape_cast %39 : vector<1x288x128xf32> to vector<288x128xf32>
    %41 = arith.truncf %40 : vector<288x128xf32> to vector<288x128xbf16>
    %c0_21 = arith.constant 0 : index
    %c640 = arith.constant 640 : index
    %42 = vector.load %arg12[%c0_21, %c640] : memref<288x1152xbf16, #tpu.memory_space<vmem>>, vector<288x128xbf16>
    tpu.vector_store %arg12[%c0_21, %c640], %41 {strides = array<i32>} : memref<288x1152xbf16, #tpu.memory_space<vmem>>, vector<288x128xbf16>,
    %c0_22 = arith.constant 0 : index
    %c36 = arith.constant 36 : index
    %c0_23 = arith.constant 0 : index
    %43 = vector.load %arg1[%c0_22, %c36, %c0_23] : memref<1x328x128xf32, #tpu.memory_space<vmem>>, vector<1x288x128xf32>
    %44 = vector.shape_cast %43 : vector<1x288x128xf32> to vector<288x128xf32>
    %45 = arith.truncf %44 : vector<288x128xf32> to vector<288x128xbf16>
    %c0_24 = arith.constant 0 : index
    %c768 = arith.constant 768 : index
    %46 = vector.load %arg12[%c0_24, %c768] : memref<288x1152xbf16, #tpu.memory_space<vmem>>, vector<288x128xbf16>
    tpu.vector_store %arg12[%c0_24, %c768], %45 {strides = array<i32>} : memref<288x1152xbf16, #tpu.memory_space<vmem>>, vector<288x128xbf16>,
    %c0_25 = arith.constant 0 : index
    %c37 = arith.constant 37 : index
    %c0_26 = arith.constant 0 : index
    %47 = vector.load %arg1[%c0_25, %c37, %c0_26] : memref<1x328x128xf32, #tpu.memory_space<vmem>>, vector<1x288x128xf32>
    %48 = vector.shape_cast %47 : vector<1x288x128xf32> to vector<288x128xf32>
    %49 = arith.truncf %48 : vector<288x128xf32> to vector<288x128xbf16>
    %c0_27 = arith.constant 0 : index
    %c896 = arith.constant 896 : index
    %50 = vector.load %arg12[%c0_27, %c896] : memref<288x1152xbf16, #tpu.memory_space<vmem>>, vector<288x128xbf16>
    tpu.vector_store %arg12[%c0_27, %c896], %49 {strides = array<i32>} : memref<288x1152xbf16, #tpu.memory_space<vmem>>, vector<288x128xbf16>,
    %c0_28 = arith.constant 0 : index
    %c38 = arith.constant 38 : index
    %c0_29 = arith.constant 0 : index
    %51 = vector.load %arg1[%c0_28, %c38, %c0_29] : memref<1x328x128xf32, #tpu.memory_space<vmem>>, vector<1x288x128xf32>
    %52 = vector.shape_cast %51 : vector<1x288x128xf32> to vector<288x128xf32>
    %53 = arith.truncf %52 : vector<288x128xf32> to vector<288x128xbf16>
    %c0_30 = arith.constant 0 : index
    %c1024 = arith.constant 1024 : index
    %54 = vector.load %arg12[%c0_30, %c1024] : memref<288x1152xbf16, #tpu.memory_space<vmem>>, vector<288x128xbf16>
    tpu.vector_store %arg12[%c0_30, %c1024], %53 {strides = array<i32>} : memref<288x1152xbf16, #tpu.memory_space<vmem>>, vector<288x128xbf16>,
    %c0_31 = arith.constant 0 : index
    %c0_32 = arith.constant 0 : index
    %55 = vector.load %arg12[%c0_31, %c0_32] : memref<288x1152xbf16, #tpu.memory_space<vmem>>, vector<288x1152xbf16>
    %c0_33 = arith.constant 0 : index
    %c0_34 = arith.constant 0 : index
    %56 = vector.load %arg2[%c0_33, %c0_34] : memref<1152x128xbf16, #tpu.memory_space<vmem>>, vector<1152x128xbf16>
    %cst = arith.constant dense<0.000000e+00> : vector<288x128xf32>
    %57 = tpu.matmul %55, %56, %cst {dimension_numbers = #tpu.dot_dimension_numbers<[1], [0], [0], [1], [0, 0, 1, 1], [], []>} : vector<288x1152xbf16>, vector<1152x128xbf16>, vector<288x128xf32> -> vector<288x128xf32>
    %c0_35 = arith.constant 0 : index
    %c0_36 = arith.constant 0 : index
    %58 = vector.load %arg3[%c0_35, %c0_36] : memref<1x128xf32, #tpu.memory_space<vmem>>, vector<1x128xf32>
    %59 = vector.broadcast %58 : vector<1x128xf32> to vector<288x128xf32>
    %60 = arith.addf %57, %59 : vector<288x128xf32>
    %cst_37 = arith.constant 0.000000e+00 : f32
    %61 = vector.broadcast %cst_37 : f32 to vector<288x128xf32>
    %62 = arith.maximumf %60, %61 : vector<288x128xf32>
    %cst_38 = arith.constant 0.000000e+00 : f32
    %63 = vector.shape_cast %18 : vector<288x1xi1> to vector<288x1xi1>
    %64 = vector.broadcast %63 : vector<288x1xi1> to vector<288x128xi1>
    %65 = vector.broadcast %cst_38 : f32 to vector<288x128xf32>
    %66 = arith.select %64, %62, %65 : vector<288x128xi1>, vector<288x128xf32>
    %cst_39 = arith.constant 0.000000e+00 : bf16
    %67 = vector.broadcast %cst_39 : bf16 to vector<24x128xbf16>
    %c0_40 = arith.constant 0 : index
    %c0_41 = arith.constant 0 : index
    %68 = vector.load %arg11[%c0_40, %c0_41] : memref<336x128xbf16, #tpu.memory_space<vmem>>, vector<24x128xbf16>
    tpu.vector_store %arg11[%c0_40, %c0_41], %67 {strides = array<i32>} : memref<336x128xbf16, #tpu.memory_space<vmem>>, vector<24x128xbf16>,
    %cst_42 = arith.constant 0.000000e+00 : bf16
    %69 = vector.broadcast %cst_42 : bf16 to vector<24x128xbf16>
    %c312 = arith.constant 312 : index
    %c0_43 = arith.constant 0 : index
    %70 = vector.load %arg11[%c312, %c0_43] : memref<336x128xbf16, #tpu.memory_space<vmem>>, vector<24x128xbf16>
    tpu.vector_store %arg11[%c312, %c0_43], %69 {strides = array<i32>} : memref<336x128xbf16, #tpu.memory_space<vmem>>, vector<24x128xbf16>,
    %71 = arith.truncf %66 : vector<288x128xf32> to vector<288x128xbf16>
    %c24 = arith.constant 24 : index
    %c0_44 = arith.constant 0 : index
    %72 = vector.load %arg11[%c24, %c0_44] : memref<336x128xbf16, #tpu.memory_space<vmem>>, vector<288x128xbf16>
    tpu.vector_store %arg11[%c24, %c0_44], %71 {strides = array<i32>} : memref<336x128xbf16, #tpu.memory_space<vmem>>, vector<288x128xbf16>,
    %c5 = arith.constant 5 : index
    %c0_45 = arith.constant 0 : index
    %73 = vector.load %arg11[%c5, %c0_45] : memref<336x128xbf16, #tpu.memory_space<vmem>>, vector<288x128xbf16>
    %c0_46 = arith.constant 0 : index
    %c0_47 = arith.constant 0 : index
    %74 = vector.load %arg12[%c0_46, %c0_47] : memref<288x1152xbf16, #tpu.memory_space<vmem>>, vector<288x128xbf16>
    tpu.vector_store %arg12[%c0_46, %c0_47], %73 {strides = array<i32>} : memref<288x1152xbf16, #tpu.memory_space<vmem>>, vector<288x128xbf16>,
    %c6 = arith.constant 6 : index
    %c0_48 = arith.constant 0 : index
    %75 = vector.load %arg11[%c6, %c0_48] : memref<336x128xbf16, #tpu.memory_space<vmem>>, vector<288x128xbf16>
    %c0_49 = arith.constant 0 : index
    %c128_50 = arith.constant 128 : index
    %76 = vector.load %arg12[%c0_49, %c128_50] : memref<288x1152xbf16, #tpu.memory_space<vmem>>, vector<288x128xbf16>
    tpu.vector_store %arg12[%c0_49, %c128_50], %75 {strides = array<i32>} : memref<288x1152xbf16, #tpu.memory_space<vmem>>, vector<288x128xbf16>,
    %c7 = arith.constant 7 : index
    %c0_51 = arith.constant 0 : index
    %77 = vector.load %arg11[%c7, %c0_51] : memref<336x128xbf16, #tpu.memory_space<vmem>>, vector<288x128xbf16>
    %c0_52 = arith.constant 0 : index
    %c256_53 = arith.constant 256 : index
    %78 = vector.load %arg12[%c0_52, %c256_53] : memref<288x1152xbf16, #tpu.memory_space<vmem>>, vector<288x128xbf16>
    tpu.vector_store %arg12[%c0_52, %c256_53], %77 {strides = array<i32>} : memref<288x1152xbf16, #tpu.memory_space<vmem>>, vector<288x128xbf16>,
    %c23 = arith.constant 23 : index
    %c0_54 = arith.constant 0 : index
    %79 = vector.load %arg11[%c23, %c0_54] : memref<336x128xbf16, #tpu.memory_space<vmem>>, vector<288x128xbf16>
    %c0_55 = arith.constant 0 : index
    %c384_56 = arith.constant 384 : index
    %80 = vector.load %arg12[%c0_55, %c384_56] : memref<288x1152xbf16, #tpu.memory_space<vmem>>, vector<288x128xbf16>
    tpu.vector_store %arg12[%c0_55, %c384_56], %79 {strides = array<i32>} : memref<288x1152xbf16, #tpu.memory_space<vmem>>, vector<288x128xbf16>,
    %c24_57 = arith.constant 24 : index
    %c0_58 = arith.constant 0 : index
    %81 = vector.load %arg11[%c24_57, %c0_58] : memref<336x128xbf16, #tpu.memory_space<vmem>>, vector<288x128xbf16>
    %c0_59 = arith.constant 0 : index
    %c512_60 = arith.constant 512 : index
    %82 = vector.load %arg12[%c0_59, %c512_60] : memref<288x1152xbf16, #tpu.memory_space<vmem>>, vector<288x128xbf16>
    tpu.vector_store %arg12[%c0_59, %c512_60], %81 {strides = array<i32>} : memref<288x1152xbf16, #tpu.memory_space<vmem>>, vector<288x128xbf16>,
    %c25 = arith.constant 25 : index
    %c0_61 = arith.constant 0 : index
    %83 = vector.load %arg11[%c25, %c0_61] : memref<336x128xbf16, #tpu.memory_space<vmem>>, vector<288x128xbf16>
    %c0_62 = arith.constant 0 : index
    %c640_63 = arith.constant 640 : index
    %84 = vector.load %arg12[%c0_62, %c640_63] : memref<288x1152xbf16, #tpu.memory_space<vmem>>, vector<288x128xbf16>
    tpu.vector_store %arg12[%c0_62, %c640_63], %83 {strides = array<i32>} : memref<288x1152xbf16, #tpu.memory_space<vmem>>, vector<288x128xbf16>,
    %c41 = arith.constant 41 : index
    %c0_64 = arith.constant 0 : index
    %85 = vector.load %arg11[%c41, %c0_64] : memref<336x128xbf16, #tpu.memory_space<vmem>>, vector<288x128xbf16>
    %c0_65 = arith.constant 0 : index
    %c768_66 = arith.constant 768 : index
    %86 = vector.load %arg12[%c0_65, %c768_66] : memref<288x1152xbf16, #tpu.memory_space<vmem>>, vector<288x128xbf16>
    tpu.vector_store %arg12[%c0_65, %c768_66], %85 {strides = array<i32>} : memref<288x1152xbf16, #tpu.memory_space<vmem>>, vector<288x128xbf16>,
    %c42 = arith.constant 42 : index
    %c0_67 = arith.constant 0 : index
    %87 = vector.load %arg11[%c42, %c0_67] : memref<336x128xbf16, #tpu.memory_space<vmem>>, vector<288x128xbf16>
    %c0_68 = arith.constant 0 : index
    %c896_69 = arith.constant 896 : index
    %88 = vector.load %arg12[%c0_68, %c896_69] : memref<288x1152xbf16, #tpu.memory_space<vmem>>, vector<288x128xbf16>
    tpu.vector_store %arg12[%c0_68, %c896_69], %87 {strides = array<i32>} : memref<288x1152xbf16, #tpu.memory_space<vmem>>, vector<288x128xbf16>,
    %c43 = arith.constant 43 : index
    %c0_70 = arith.constant 0 : index
    %89 = vector.load %arg11[%c43, %c0_70] : memref<336x128xbf16, #tpu.memory_space<vmem>>, vector<288x128xbf16>
    %c0_71 = arith.constant 0 : index
    %c1024_72 = arith.constant 1024 : index
    %90 = vector.load %arg12[%c0_71, %c1024_72] : memref<288x1152xbf16, #tpu.memory_space<vmem>>, vector<288x128xbf16>
    tpu.vector_store %arg12[%c0_71, %c1024_72], %89 {strides = array<i32>} : memref<288x1152xbf16, #tpu.memory_space<vmem>>, vector<288x128xbf16>,
    %c0_73 = arith.constant 0 : index
    %c0_74 = arith.constant 0 : index
    %91 = vector.load %arg12[%c0_73, %c0_74] : memref<288x1152xbf16, #tpu.memory_space<vmem>>, vector<288x1152xbf16>
    %c0_75 = arith.constant 0 : index
    %c0_76 = arith.constant 0 : index
    %92 = vector.load %arg4[%c0_75, %c0_76] : memref<1152x128xbf16, #tpu.memory_space<vmem>>, vector<1152x128xbf16>
    %cst_77 = arith.constant dense<0.000000e+00> : vector<288x128xf32>
    %93 = tpu.matmul %91, %92, %cst_77 {dimension_numbers = #tpu.dot_dimension_numbers<[1], [0], [0], [1], [0, 0, 1, 1], [], []>} : vector<288x1152xbf16>, vector<1152x128xbf16>, vector<288x128xf32> -> vector<288x128xf32>
    %c0_78 = arith.constant 0 : index
    %c0_79 = arith.constant 0 : index
    %94 = vector.load %arg5[%c0_78, %c0_79] : memref<1x128xf32, #tpu.memory_space<vmem>>, vector<1x128xf32>
    %95 = vector.broadcast %94 : vector<1x128xf32> to vector<288x128xf32>
    %96 = arith.addf %93, %95 : vector<288x128xf32>
    %cst_80 = arith.constant 0.000000e+00 : f32
    %97 = vector.shape_cast %18 : vector<288x1xi1> to vector<288x1xi1>
    %98 = vector.broadcast %97 : vector<288x1xi1> to vector<288x128xi1>
    %99 = vector.broadcast %cst_80 : f32 to vector<288x128xf32>
    %100 = arith.select %98, %96, %99 : vector<288x128xi1>, vector<288x128xf32>
    %cst_81 = arith.constant dense<0.000000e+00> : vector<128xf32>
    %101 = vector.multi_reduction <add>, %100, %cst_81 [0] : vector<288x128xf32> to vector<128xf32>
    %102 = vector.shape_cast %101 : vector<128xf32> to vector<1x128xf32>
    %cst_82 = arith.constant 3.906250e-03 : f32
    %103 = vector.broadcast %cst_82 : f32 to vector<1x128xf32>
    %104 = arith.mulf %102, %103 : vector<1x128xf32>
    %c0_83 = arith.constant 0 : index
    %c0_84 = arith.constant 0 : index
    %105 = vector.load %arg6[%c0_83, %c0_84] : memref<128x128xf32, #tpu.memory_space<vmem>>, vector<128x128xf32>
    %cst_85 = arith.constant dense<0.000000e+00> : vector<1x128xf32>
    %106 = tpu.matmul %104, %105, %cst_85 {dimension_numbers = #tpu.dot_dimension_numbers<[1], [0], [0], [1], [0, 0, 1, 1], [], []>} : vector<1x128xf32>, vector<128x128xf32>, vector<1x128xf32> -> vector<1x128xf32>
    %c0_86 = arith.constant 0 : index
    %c0_87 = arith.constant 0 : index
    %107 = vector.load %arg7[%c0_86, %c0_87] : memref<1x128xf32, #tpu.memory_space<vmem>>, vector<1x128xf32>
    %108 = arith.addf %106, %107 : vector<1x128xf32>
    %cst_88 = arith.constant 0.000000e+00 : f32
    %109 = vector.broadcast %cst_88 : f32 to vector<1x128xf32>
    %110 = arith.maximumf %108, %109 : vector<1x128xf32>
    %c0_89 = arith.constant 0 : index
    %c0_90 = arith.constant 0 : index
    %111 = vector.load %arg8[%c0_89, %c0_90] : memref<128x128xf32, #tpu.memory_space<vmem>>, vector<128x128xf32>
    %cst_91 = arith.constant dense<0.000000e+00> : vector<1x128xf32>
    %112 = tpu.matmul %110, %111, %cst_91 {dimension_numbers = #tpu.dot_dimension_numbers<[1], [0], [0], [1], [0, 0, 1, 1], [], []>} : vector<1x128xf32>, vector<128x128xf32>, vector<1x128xf32> -> vector<1x128xf32>
    %c0_92 = arith.constant 0 : index
    %c0_93 = arith.constant 0 : index
    %113 = vector.load %arg9[%c0_92, %c0_93] : memref<1x128xf32, #tpu.memory_space<vmem>>, vector<1x128xf32>
    %114 = arith.addf %112, %113 : vector<1x128xf32>
    %115 = arith.negf %114 : vector<1x128xf32>
    %116 = math.exp %115 : vector<1x128xf32>
    %cst_94 = arith.constant 1.000000e+00 : f32
    %117 = vector.broadcast %cst_94 : f32 to vector<1x128xf32>
    %118 = arith.addf %117, %116 : vector<1x128xf32>
    %119 = arith.divf %117, %118 : vector<1x128xf32>
    %c0_95 = arith.constant 0 : index
    %c19_96 = arith.constant 19 : index
    %c0_97 = arith.constant 0 : index
    %120 = vector.load %arg1[%c0_95, %c19_96, %c0_97] : memref<1x328x128xf32, #tpu.memory_space<vmem>>, vector<1x288x128xf32>
    %121 = vector.shape_cast %120 : vector<1x288x128xf32> to vector<288x128xf32>
    %122 = vector.broadcast %119 : vector<1x128xf32> to vector<288x128xf32>
    %123 = arith.mulf %96, %122 : vector<288x128xf32>
    %124 = arith.addf %123, %121 : vector<288x128xf32>
    %cst_98 = arith.constant 0.000000e+00 : f32
    %125 = vector.broadcast %cst_98 : f32 to vector<288x128xf32>
    %126 = arith.maximumf %124, %125 : vector<288x128xf32>
    %c0_99 = arith.constant 0 : index
    %c0_100 = arith.constant 0 : index
    %c0_101 = arith.constant 0 : index
    %127 = vector.load %arg10[%c0_99, %c0_100, %c0_101] : memref<1x288x128xf32, #tpu.memory_space<vmem>>, vector<1x288x128xf32>
    %128 = vector.shape_cast %127 : vector<1x288x128xf32> to vector<288x128xf32>
    %129 = vector.shape_cast %126 : vector<288x128xf32> to vector<1x288x128xf32>
    tpu.vector_store %arg10[%c0_99, %c0_100, %c0_101], %129 {strides = array<i32>} : memref<1x288x128xf32, #tpu.memory_space<vmem>>, vector<1x288x128xf32>,
    return
  }
  func.func @transform_0(%arg0: i32) -> (i32, i32, i32) {
    %c0_i32 = arith.constant 0 : i32
    %c0_i32_0 = arith.constant 0 : i32
    %c0_i32_1 = arith.constant 0 : i32
    return %arg0, %c0_i32, %c0_i32_0 : i32, i32, i32
  }
  func.func @transform_1(%arg0: i32) -> (i32, i32) {
    %c0_i32 = arith.constant 0 : i32
    %c0_i32_0 = arith.constant 0 : i32
    %c0_i32_1 = arith.constant 0 : i32
    return %c0_i32, %c0_i32_0 : i32, i32
  }
  func.func @transform_2(%arg0: i32) -> (i32, i32) {
    %c0_i32 = arith.constant 0 : i32
    %c0_i32_0 = arith.constant 0 : i32
    %c0_i32_1 = arith.constant 0 : i32
    return %c0_i32, %c0_i32_0 : i32, i32
  }
  func.func @transform_3(%arg0: i32) -> (i32, i32) {
    %c0_i32 = arith.constant 0 : i32
    %c0_i32_0 = arith.constant 0 : i32
    %c0_i32_1 = arith.constant 0 : i32
    return %c0_i32, %c0_i32_0 : i32, i32
  }
  func.func @transform_4(%arg0: i32) -> (i32, i32) {
    %c0_i32 = arith.constant 0 : i32
    %c0_i32_0 = arith.constant 0 : i32
    %c0_i32_1 = arith.constant 0 : i32
    return %c0_i32, %c0_i32_0 : i32, i32
  }
  func.func @transform_5(%arg0: i32) -> (i32, i32) {
    %c0_i32 = arith.constant 0 : i32
    %c0_i32_0 = arith.constant 0 : i32
    %c0_i32_1 = arith.constant 0 : i32
    return %c0_i32, %c0_i32_0 : i32, i32
  }
  func.func @transform_6(%arg0: i32) -> (i32, i32) {
    %c0_i32 = arith.constant 0 : i32
    %c0_i32_0 = arith.constant 0 : i32
    %c0_i32_1 = arith.constant 0 : i32
    return %c0_i32, %c0_i32_0 : i32, i32
  }
  func.func @transform_7(%arg0: i32) -> (i32, i32) {
    %c0_i32 = arith.constant 0 : i32
    %c0_i32_0 = arith.constant 0 : i32
    %c0_i32_1 = arith.constant 0 : i32
    return %c0_i32, %c0_i32_0 : i32, i32
  }
  func.func @transform_8(%arg0: i32) -> (i32, i32) {
    %c0_i32 = arith.constant 0 : i32
    %c0_i32_0 = arith.constant 0 : i32
    %c0_i32_1 = arith.constant 0 : i32
    return %c0_i32, %c0_i32_0 : i32, i32
  }
  func.func @transform_9(%arg0: i32) -> (i32, i32, i32) {
    %c0_i32 = arith.constant 0 : i32
    %c0_i32_0 = arith.constant 0 : i32
    %c0_i32_1 = arith.constant 0 : i32
    return %arg0, %c0_i32, %c0_i32_0 : i32, i32, i32
  }
}

</mosaic_0001>

<bundles_post_ra>
// kernel: tpu_custom_call.1
= control target key start
LH: loop header
LB: loop body
LE: loop exit
PB: predicated region body
PF: predicated region fallthrough
CT: control target
= control target key end

     0   :  { %s12631_s0 = inlined_call_operand.hbm [shape: f32[2,328,128], index: 0, kind: input, shape index: {}]   ;;  %s12632_s1 = inlined_call_operand.hbm [shape: bf16[1152,128], index: 1, kind: input, shape index: {}]   ;;  %s12633_s2 = inlined_call_operand.vmem [shape: f32[1,128], index: 2, kind: input, shape index: {}]   ;;  %s12634_s3 = inlined_call_operand.hbm [shape: bf16[1152,128], index: 3, kind: input, shape index: {}]   ;;  %s12635_s4 = inlined_call_operand.vmem [shape: f32[1,128], index: 4, kind: input, shape index: {}]   ;;  %s12636_s5 = inlined_call_operand.hbm [shape: f32[128,128], index: 5, kind: input, shape index: {}]   ;;  %s12637_s6 = inlined_call_operand.vmem [shape: f32[1,128], index: 6, kind: input, shape index: {}]   ;;  %s12638_s7 = inlined_call_operand.hbm [shape: f32[128,128], index: 7, kind: input, shape index: {}]   ;;  %s12639_s8 = inlined_call_operand.vmem [shape: f32[1,128], index: 8, kind: input, shape index: {}]   ;;  %s12640_s9 = inlined_call_operand.hbm [shape: f32[2,288,128], index: 9, kind: output, shape index: {}]  }
   0x1   :  { %12790 = sst [smem:[#allocation85_spill]] %s12632_s1 }
   0x2   :  { %12791 = sst [smem:[#allocation86_spill]] %s12634_s3 }
   0x3   :  { %14 = vsyncpa [#allocation5], 0 }
   0x4   :  { %16 = vsyncpa [#allocation5 + $0x1], 0 }
   0x5   :  { %17 = vsyncpa [#allocation8], 0 }
   0x6   :  { %18 = vsyncpa [#allocation11], 0 }
   0x7   :  { %19 = vsyncpa [#allocation6], 0 }
   0x8   :  { %21 = vsyncpa [#allocation6 + $0x1], 0  ;;  %s9069_s30 = smov 0   ;;  %s9071_s10 = smov 0  }
   0x9   :  { %s9073_s11 = smov 0   ;;  %s9075_s12 = smov 0  }
   0xa LB: > { %12792 = sst [smem:[#allocation18_spill]] %s8989_s30  ;;  %s9090_s13 = sadd.s32 4294967295, %s9001_s12   ;;  %s9001_s12 = sphi %s9075_s12, %s13431_s12   ;;  %s8997_s11 = sphi %s9073_s11, %s13430_s11   ;;  %s8993_s10 = sphi %s9071_s10, %s13429_s10   ;;  %s8989_s30 = sphi %s9069_s30, %s13428_s30  }
   0xb   : > { %s7482_s14 = sadd.s32 4294967294, %s9001_s12   ;;  %p47_p0 = scmp.ne.s32.totalorder %s8993_s10, %s8989_s30 }
   0xc   : > { %p12641_p1 = scmp.eq.s32.totalorder %s9090_s13, 0  ;;  %p245_p3 = scmp.eq.s32.totalorder %s7482_s14, 1 }
   0xd   : > { %p7483_p5 = scmp.ge.s32.totalorder %s9001_s12, 1  ;;  %p252_p7 = scmp.lt.s32.totalorder %s9001_s12, 3 }
   0xe   : > { %p9099_p4 = por %p12641_p1, %p47_p0  ;;  %p9104_p6 = por %p245_p3, %p47_p0 }
   0xf   : > { %p9109_p8 = pnand %p7483_p5, %p252_p7  ;;  %s9003_s18 = smov [#allocation7]  }
  0x10   : > { %s12793_s15 = scalar_select %p9099_p4, 1, 0 }
  0x11   : > { %s12794_s16 = scalar_select %p9104_p6, 1, 0 }
  0x12   : > { %s12796_s17 = scalar_select %p9109_p8, 1, 0 }
  0x13   : > { %12795 = sst [smem:[#allocation19_spill]] %s12794_s16  ;;  %s264_s19 = sshll.u32 %s9003_s18, 4  ;;  %s9113_s19 = int_to_ptr.vmem [resolvable:$true] %s264_s19 }
  0x14   : > { %p8554_p9 = pneg %p9109_p8  ;;  %s9004_s21 = smov [#allocation10]  }
  0x15   : > { %s296_s22 = sshll.u32 %s9004_s21, 4  ;;  %s12798_s1 = sld [smem:[#allocation85_spill]]  ;;  %s9124_s22 = int_to_ptr.vmem [resolvable:$true] %s296_s22 }
  0x16   : > { %p9120_p11 = pnand %p8554_p9, %p12641_p1 }
  0x18   : > { %p9134_p13 = pneg %p9120_p11 }
  0x1b   : > { %s8785_s25 = scalar_lea.hbm %s12798_s1, 9216 }
  0x1c   : > { %p8786_p12 = scmp.ne.s32.totalorder %s12798_s1, %s8785_s25  ;;  %p8792_p5 = scmp.lt.u32.totalorder %s8785_s25, %s12798_s1 }
  0x1e   : > { %p8788_p0 = pnand %p9134_p13, %p8786_p12 }
  0x20   : > { %p8789_p3 = pneg %p8788_p0 }
  0x22   : > { %p8794_p7 = pnand %p8792_p5, %p8789_p3 }
  0x24   : > { %8797 = shalt.err (!%p8794_p7)
}
  0x25   : > { %s8798_s18 = scalar_lea.vmem %s9113_s19, 9216  ;;  %p8806_p2 = scmp.lt.s32.totalorder %s9113_s19, %s9113_s19 }
  0x26   : > { %p8799_p9 = scmp.ne.s32.totalorder %s9113_s19, %s8798_s18  ;;  %p8807_p6 = scmp.lt.s32.totalorder %s8798_s18, %s8798_s18 }
  0x28   : > { %p8801_p10 = pnand %p8799_p9, %p9134_p13  ;;  %p8808_p12 = por %p8807_p6, %p8806_p2 }
  0x2a   : > { %p8802_p1 = pneg %p8801_p10 }
  0x2c   : > { %p8809_p0 = pnand %p8808_p12, %p8802_p1 }
  0x2e   : > { %8812 = shalt.err (!%p8809_p0)
}
  0x2f   : > { %s12644_s21 = smov 64   ;;  %s12645_s23 = smov 4  }
  0x30   : > { %8557 = dma.hbm_to_vmem [thread:$0]  (!%p9120_p11), %s12798_s1, 9216, %s9113_s19, [#allocation8], %s12644_s21, %s12644_s21, %s12645_s23  }
  0x31   : > { %s8813_s29 = scalar_lea.hbm %s12636_s5, 2048 }
  0x32   : > { %p8814_p1 = scmp.ne.s32.totalorder %s12636_s5, %s8813_s29  ;;  %p8820_p10 = scmp.lt.u32.totalorder %s8813_s29, %s12636_s5 }
  0x34   : > { %p8816_p2 = pnand %p8814_p1, %p9134_p13 }
  0x36   : > { %p8817_p6 = pneg %p8816_p2 }
  0x38   : > { %p8822_p3 = pnand %p8820_p10, %p8817_p6 }
  0x3a   : > { %8825 = shalt.err (!%p8822_p3)
}
  0x3b   : > { %s8826_s19 = scalar_lea.vmem %s9124_s22, 2048  ;;  %p8834_p12 = scmp.lt.s32.totalorder %s9124_s22, %s9124_s22 }
  0x3c   : > { %p8827_p5 = scmp.ne.s32.totalorder %s9124_s22, %s8826_s19  ;;  %p8835_p0 = scmp.lt.s32.totalorder %s8826_s19, %s8826_s19 }
  0x3e   : > { %p8829_p7 = pnand %p8827_p5, %p9134_p13  ;;  %p8836_p1 = por %p8835_p0, %p8834_p12 }
  0x40   : > { %p8830_p9 = pneg %p8829_p7 }
  0x42   : > { %p8837_p2 = pnand %p8836_p1, %p8830_p9 }
  0x44   : > { %8840 = shalt.err (!%p8837_p2)
}
  0x45   : > { %s12648_s24 = smov 128   ;;  %s12650_s30 = smov 8  }
  0x46   : > { %8563 = dma.hbm_to_vmem [thread:$0]  (!%p9120_p11), %s12636_s5, 2048, %s9124_s22, [#allocation11], %s12648_s24, %s12648_s24, %s12650_s30  }
  0x47   : > { %s9009_s26 = smov [#allocation9]   ;;  %s9010_s29 = smov [#allocation12]  }
  0x48   : > { %s280_s27 = sshll.u32 %s9009_s26, 4  ;;  %s312_s14 = sshll.u32 %s9010_s29, 4  ;;  %s281_s27 = int_to_ptr.vmem [resolvable:$true] %s280_s27  ;;  %s9184_s14 = int_to_ptr.vmem [resolvable:$true] %s312_s14 }
  0x49   : > { %s12800_s3 = sld [smem:[#allocation86_spill]] }
  0x4f   : > { %s8841_s21 = scalar_lea.hbm %s12800_s3, 9216 }
  0x50   : > { %p8842_p6 = scmp.ne.s32.totalorder %s12800_s3, %s8841_s21  ;;  %p8848_p5 = scmp.lt.u32.totalorder %s8841_s21, %s12800_s3 }
  0x52   : > { %p8844_p10 = pnand %p8842_p6, %p9134_p13 }
  0x54   : > { %p8845_p3 = pneg %p8844_p10 }
  0x56   : > { %p8850_p7 = pnand %p8848_p5, %p8845_p3 }
  0x58   : > { %8853 = shalt.err (!%p8850_p7)
}
  0x59   : > { %s8854_s25 = scalar_lea.vmem %s281_s27, 9216  ;;  %p8862_p1 = scmp.lt.s32.totalorder %s281_s27, %s281_s27 }
  0x5a   : > { %p8855_p9 = scmp.ne.s32.totalorder %s281_s27, %s8854_s25  ;;  %p8863_p2 = scmp.lt.s32.totalorder %s8854_s25, %s8854_s25 }
  0x5c   : > { %p8857_p12 = pnand %p8855_p9, %p9134_p13  ;;  %p8864_p4 = por %p8863_p2, %p8862_p1 }
  0x5e   : > { %p8858_p0 = pneg %p8857_p12 }
  0x60   : > { %p8865_p8 = pnand %p8864_p4, %p8858_p0 }
  0x62   : > { %8868 = shalt.err (!%p8865_p8)
}
  0x63   : > { %s12801_s1 = smov 4   ;;  %s12802_s23 = smov 64  }
  0x64   : > { %8560 = dma.hbm_to_vmem [thread:$0]  (!%p9120_p11), %s12800_s3, 9216, %s281_s27, [#allocation8], %s12802_s23, %s12802_s23, %s12801_s1  }
  0x65   : > { %s8869_s19 = scalar_lea.hbm %s12638_s7, 2048 }
  0x66   : > { %p8870_p6 = scmp.ne.s32.totalorder %s12638_s7, %s8869_s19  ;;  %p8876_p10 = scmp.lt.u32.totalorder %s8869_s19, %s12638_s7 }
  0x68   : > { %p8872_p4 = pnand %p8870_p6, %p9134_p13 }
  0x6a   : > { %p8873_p8 = pneg %p8872_p4 }
  0x6c   : > { %p8878_p3 = pnand %p8876_p10, %p8873_p8 }
  0x6e   : > { %8881 = shalt.err (!%p8878_p3)
}
  0x6f   : > { %s8882_s27 = scalar_lea.vmem %s9184_s14, 2048  ;;  %p8890_p12 = scmp.lt.s32.totalorder %s9184_s14, %s9184_s14 }
  0x70   : > { %p8883_p5 = scmp.ne.s32.totalorder %s9184_s14, %s8882_s27  ;;  %p8891_p0 = scmp.lt.s32.totalorder %s8882_s27, %s8882_s27 }
  0x72   : > { %p8885_p7 = pnand %p8883_p5, %p9134_p13  ;;  %p8892_p1 = por %p8891_p0, %p8890_p12 }
  0x74   : > { %p8886_p9 = pneg %p8885_p7 }
  0x76   : > { %p8893_p2 = pnand %p8892_p1, %p8886_p9 }
  0x78   : > { %8896 = shalt.err (!%p8893_p2)
}
  0x79   : > { %s12803_s24 = smov 128   ;;  %s9234_s20 = sadd.s32 1, %s9001_s12  }
  0x7a   : > { %8566 = dma.hbm_to_vmem [thread:$0]  (!%p9120_p11), %s12638_s7, 2048, %s9184_s14, [#allocation11], %s12803_s24, %s12803_s24, %s12650_s30  }
  0x7b   : > { %s31_s28 = ssub.s32 %s9001_s12, %s9234_s20  ;;  %s34_s26 = sadd.s32 1, %s8997_s11 }
  0x7c   : > { %p32_p13 = scmp.eq.s32.totalorder %s31_s28, 0  ;;  %p41_p6 = scmp.ne.s32.totalorder %s8997_s11, %s8993_s10 }
  0x7d   : > { %p42_p4 = scmp.eq.s32.totalorder %s9001_s12, 0  ;;  %p12804_p10 = scmp.eq.s32.totalorder %s9090_s13, 1 }
  0x7e   : > { %s9243_s21 = scalar_select %p32_p13, %s8997_s11, %s34_s26  }
  0x7f   : > { %p43_p8 = por %p42_p4, %p41_p6  ;;  %p9247_p3 = por %p12804_p10, %p41_p6 }
  0x80   : > { %p8579_p5 = scmp.lt.s32.totalorder %s9001_s12, 2  ;;  %s329_s18 = sand.u32 1, %s8997_s11  }
  0x81   : > { %s8457_s19 = smul.u32 328, %s329_s18  ;;  %s9265_s28 = scalar_lea.sflag [#allocation5], %s329_s18 }
  0x82   : > { %s8458_s14 = smul.u32 5248, %s9001_s12  ;;  %p9254_p11 = pnand %p8579_p5, %p43_p8 }
  0x83   : > { %s333_s1 = scalar_lea.vmem [#allocation4], %s8457_s19  ;;  %s8902_s25 = scalar_lea.hbm %s12631_s0, 10496 }
  0x84   : > { %s9261_s27 = scalar_lea.hbm %s12631_s0, %s8458_s14  ;;  %s340_s23 = sshll.u32 %s333_s1, 4  ;;  %s9263_s23 = int_to_ptr.vmem [resolvable:$true] %s340_s23 }
  0x85   : > { %s8897_s26 = scalar_lea.hbm %s9261_s27, 5248  ;;  %p8899_p9 = pneg %p9254_p11 }
  0x86   : > { %p8898_p7 = scmp.ne.s32.totalorder %s9261_s27, %s8897_s26  ;;  %p8903_p1 = scmp.lt.u32.totalorder %s9261_s27, %s12631_s0 }
  0x87   : > { %p8904_p2 = scmp.lt.u32.totalorder %s8902_s25, %s8897_s26  ;;  %p8906_p6 = scmp.lt.u32.totalorder %s8897_s26, %s9261_s27 }
  0x88   : > { %p8900_p12 = pnand %p8899_p9, %p8898_p7 }
  0x89   : > { %p8905_p13 = por %p8904_p2, %p8903_p1 }
  0x8a   : > { %p8901_p0 = pneg %p8900_p12 }
  0x8b   : > { %p8907_p4 = por %p8906_p6, %p8905_p13 }
  0x8d   : > { %p8908_p8 = pnand %p8907_p4, %p8901_p0 }
  0x8f   : > { %8911 = shalt.err (!%p8908_p8)
}
  0x90   : > { %s8912_s18 = scalar_lea.vmem %s9263_s23, 5248  ;;  %s9011_s19 = smov [#allocation4]  }
  0x91   : > { %p8913_p10 = scmp.ne.s32.totalorder %s9263_s23, %s8912_s18  ;;  %s8917_s1 = sshll.u32 %s9011_s19, 4  ;;  %s8918_s1 = int_to_ptr.vmem [resolvable:$false] %s8917_s1 }
  0x92   : > { %s8919_s3 = scalar_lea.vmem %s8918_s1, 10496  ;;  %p8920_p12 = scmp.lt.s32.totalorder %s9263_s23, %s8918_s1 }
  0x93   : > { %p8915_p5 = pnand %p8913_p10, %p8899_p9  ;;  %p8921_p1 = scmp.lt.s32.totalorder %s8919_s3, %s8912_s18 }
  0x95   : > { %p8916_p7 = pneg %p8915_p5  ;;  %p8922_p2 = por %p8921_p1, %p8920_p12 }
  0x97   : > { %p8923_p13 = pnand %p8922_p2, %p8916_p7 }
  0x99   : > { %8926 = shalt.err (!%p8923_p13)
}
  0x9a   : > { %s12807_s30 = smov 8   ;;  %p12808_p9 = scmp.ne.s32.totalorder %s12796_s17, 0 }
  0x9b   : > { %8570 = dma.hbm_to_vmem [thread:$0]  (!%p9254_p11), %s9261_s27, 5248, %s9263_s23, %s9265_s28, %s12803_s24, %s12803_s24, %s12807_s30  }
  0x9c   : > { %352 = sbr.rel (%p12808_p9) target bundleno = 2272 (0x8e0), region = 56 }
  0xa3   : > { %s9299_s26 = sand.u32 1, %s8993_s10   ;;  %p12809_p0 = scmp.ne.s32.totalorder %s12793_s15, 0 }
  0xa4   : > { %s8459_s14 = smul.u32 328, %s9299_s26  ;;  %s355_s22 = scalar_lea.sflag [#allocation5], %s9299_s26 }
  0xa6   : > { %s9303_s25 = scalar_lea.vmem [#allocation4], %s8459_s14 }
  0xa7   : > { %8972 = dma.done.wait (%p12809_p0), %s355_s22, 5248  }
  0xa8   : > { %8974 = vsyncadd (%p12809_p0), %s355_s22, 4294962048  ;;  %p12810_p11 = scmp.eq.s32.totalorder %s9090_s13, 0 }
  0xaa   : > { %8976 = dma.done.wait (%p12810_p11), [#allocation8], 18432   ;;  %p12811_p6 = pmov %p12810_p11 }
  0xac   : > { %8978 = vsyncadd (%p12811_p6), [#allocation8], 4294948864  ;;  %p12812_p4 = pmov %p12811_p6 }
  0xae   : > { %8980 = dma.done.wait (%p12812_p4), [#allocation11], 4096   ;;  %p12813_p8 = pmov %p12812_p4 }
  0xaf   : > { %v9012_v0 = vmov 0   ;;  %v8631_v1 = vld [vmem:[#allocation7] sm:$0xff]   ;;  %v8632_v2 = vld [vmem:[#allocation7 + $0x8] sm:$0xff]   ;;  %v8633_v3 = vld [vmem:[#allocation7 + $0x10] sm:$0xff]   ;;  %s8460_s3 = smul.u32 288, %s9299_s26  ;;  %s9016_s16 = smov [#allocation13]  }
  0xb0   : > { %8982 = vsyncadd (%p12813_p8), [#allocation11], 4294963200  ;;  %2452 = vmatprep.subr.bf16.mxu0 %v9012_v0  ;;  %3481 = vst [vmem:[#allocation2] sm:$0xff] %v9012_v0  ;;  %v8634_v4 = vld [vmem:[#allocation7 + $0x18] sm:$0xff]   ;;  %v8635_v5 = vld [vmem:[#allocation7 + $0x20] sm:$0xff]   ;;  %s8533_s14 = smul.u32 4608, %s9090_s13 }
  0xb1   : > { %3482 = vst [vmem:[#allocation2 + $0x8] sm:$0xf] %v9012_v0  ;;  %3483 = vst [vmem:[#allocation2 + $0x98] sm:$0xf0] %v9012_v0  ;;  %2453 = vmatpush1.bf16.msra.mxu0 %v8631_v1  ;;  %v1131_v6 = vld [vmem:[%s9303_s25 + $0x1] sm:$0xff]  ;;  %v1132_v7 = vld [vmem:[%s9303_s25 + $0x9] sm:$0xff] }
  0xb2   : > { %3484 = vst [vmem:[#allocation2 + $0xa0] sm:$0xff] %v9012_v0  ;;  %2454 = vmatprep.subr.bf16.mxu0 %v9012_v0  ;;  %v1167_v8 = vpack.c.bf16 %v1132_v7, %v1131_v6  ;;  %v8636_v9 = vld [vmem:[#allocation7 + $0x28] sm:$0xff]   ;;  %v8637_v10 = vld [vmem:[#allocation7 + $0x30] sm:$0xff]   ;;  %v8638_v11 = vld [vmem:[#allocation7 + $0x38] sm:$0xff]   ;;  %s12516_s30 = scalar_lea.vmem [#allocation13], %s8460_s3  ;;  %s12569_s17 = scalar_lea.hbm %s12640_s9, %s8533_s14 }
  0xb3   : > { %v8639_v12 = vld [vmem:[#allocation7 + $0x40] sm:$0xff]   ;;  %v8640_v13 = vld [vmem:[#allocation7 + $0x48] sm:$0xff]   ;;  %v8641_v14 = vld [vmem:[#allocation7 + $0x50] sm:$0xff]   ;;  %s7371_s22 = sshll.u32 %s12516_s30, 4  ;;  %s7358_s13 = scalar_lea.sflag [#allocation6], %s9299_s26  ;;  %s12579_s22 = int_to_ptr.vmem [resolvable:$true] %s7371_s22 }
  0xb4   : > { %2484 = vmatprep.mubr.bf16.mxu0 %v1167_v8  ;;  %v8642_v15 = vld [vmem:[#allocation7 + $0x58] sm:$0xff]   ;;  %v8643_v16 = vld [vmem:[#allocation7 + $0x60] sm:$0xff]   ;;  %v8644_v17 = vld [vmem:[#allocation7 + $0x68] sm:$0xff]   ;;  %s8927_s24 = scalar_lea.vmem %s12579_s22, 4608  ;;  %s8931_s27 = sshll.u32 %s9016_s16, 4  ;;  %s8932_s27 = int_to_ptr.vmem [resolvable:$false] %s8931_s27 }
  0xb5   : > { %2455 = vmatpush1.bf16.msra.mxu0 %v8632_v2  ;;  %v8645_v18 = vld [vmem:[#allocation7 + $0x70] sm:$0xff]   ;;  %v8646_v19 = vld [vmem:[#allocation7 + $0x78] sm:$0xff]   ;;  %v8647_v24 = vld [vmem:[#allocation7 + $0x80] sm:$0xff]   ;;  %p8928_p10 = scmp.ne.s32.totalorder %s12579_s22, %s8927_s24  ;;  %s8933_s23 = scalar_lea.vmem %s8932_s27, 9216 }
  0xb6   : > { %2456 = vmatprep.subr.bf16.mxu0 %v9012_v0  ;;  %v1059_v20 = vld [vmem:[%s9303_s25] sm:$0xff]  ;;  %v1060_v21 = vld [vmem:[%s9303_s25 + $0x8] sm:$0xff]  ;;  %v1133_v22 = vld [vmem:[%s9303_s25 + $0x11] sm:$0xff]  ;;  %p8934_p12 = scmp.lt.s32.totalorder %s12579_s22, %s8932_s27  ;;  %p8935_p1 = scmp.lt.s32.totalorder %s8933_s23, %s8927_s24 }
  0xb7   : > { %v1134_v23 = vld [vmem:[%s9303_s25 + $0x19] sm:$0xff]  ;;  %v1095_v25 = vpack.c.bf16 %v1060_v21, %v1059_v20  ;;  %v1061_v27 = vld [vmem:[%s9303_s25 + $0x10] sm:$0xff]  ;;  %v1135_v30 = vld [vmem:[%s9303_s25 + $0x21] sm:$0xff]  ;;  %p8929_p5 = pnand %p8928_p10, %p9247_p3 }
  0xb8   : > { %v1168_v26 = vpack.c.bf16 %v1134_v23, %v1133_v22  ;;  %v1062_v28 = vld [vmem:[%s9303_s25 + $0x18] sm:$0xff]  ;;  %v1136_v31 = vld [vmem:[%s9303_s25 + $0x29] sm:$0xff]  ;;  %v1063_v35 = vld [vmem:[%s9303_s25 + $0x20] sm:$0xff]  ;;  %p8936_p2 = por %p8935_p1, %p8934_p12 }
  0xb9   : > { %2457 = vmatpush1.bf16.msra.mxu0 %v8633_v3  ;;  %v8648_v29 = vld [vmem:[#allocation7 + $0x88] sm:$0xff]   ;;  %v8649_v32 = vld [vmem:[#allocation7 + $0x90] sm:$0xff]   ;;  %v1096_v33 = vpack.c.bf16 %v1062_v28, %v1061_v27  ;;  %v1169_v34 = vpack.c.bf16 %v1136_v31, %v1135_v30  ;;  %v1064_v36 = vld [vmem:[%s9303_s25 + $0x28] sm:$0xff]  ;;  %p8930_p7 = pneg %p8929_p5 }
  0xba   : > { %2458 = vmatprep.subr.bf16.mxu0 %v9012_v0  ;;  %v1137_v37 = vld [vmem:[%s9303_s25 + $0x31] sm:$0xff]  ;;  %v1138_v38 = vld [vmem:[%s9303_s25 + $0x39] sm:$0xff]  ;;  %v1097_v41 = vpack.c.bf16 %v1064_v36, %v1063_v35  ;;  %v1139_v45 = vld [vmem:[%s9303_s25 + $0x41] sm:$0xff] }
  0xbb   : > { %v8650_v39 = vld [vmem:[#allocation7 + $0x98] sm:$0xff]   ;;  %v8651_v40 = vld [vmem:[#allocation7 + $0xa0] sm:$0xff]   ;;  %v1170_v42 = vpack.c.bf16 %v1138_v38, %v1137_v37  ;;  %v1066_v44 = vld [vmem:[%s9303_s25 + $0x38] sm:$0xff]  ;;  %p8937_p13 = pnand %p8936_p2, %p8930_p7 }
  0xbc   : > { %v1065_v43 = vld [vmem:[%s9303_s25 + $0x30] sm:$0xff]  ;;  %v8653_v48 = vld [vmem:[#allocation7 + $0xb0] sm:$0xff]   ;;  %v1068_v52 = vld [vmem:[%s9303_s25 + $0x48] sm:$0xff] }
  0xbd   : > { %2459 = vmatpush1.bf16.msra.mxu0 %v8634_v4  ;;  %v1140_v46 = vld [vmem:[%s9303_s25 + $0x49] sm:$0xff]  ;;  %v1098_v49 = vpack.c.bf16 %v1066_v44, %v1065_v43  ;;  %v1067_v51 = vld [vmem:[%s9303_s25 + $0x40] sm:$0xff]  ;;  %v1141_v53 = vld [vmem:[%s9303_s25 + $0x51] sm:$0xff] }
  0xbe   : > { %2460 = vmatprep.subr.bf16.mxu0 %v9012_v0  ;;  %v8652_v47 = vld [vmem:[#allocation7 + $0xa8] sm:$0xff]   ;;  %v1171_v50 = vpack.c.bf16 %v1140_v46, %v1139_v45  ;;  %v8654_v55 = vld [vmem:[#allocation7 + $0xb8] sm:$0xff]   ;;  %v8655_v56 = vld [vmem:[#allocation7 + $0xc0] sm:$0xff]   ;;  %v1099_v57 = vpack.c.bf16 %v1068_v52, %v1067_v51 }
  0xbf   : > { %v1142_v54 = vld [vmem:[%s9303_s25 + $0x59] sm:$0xff]  ;;  %v1069_v59 = vld [vmem:[%s9303_s25 + $0x50] sm:$0xff]  ;;  %v1143_v61 = vld [vmem:[%s9303_s25 + $0x61] sm:$0xff] }
  0xc0   : > { %v1172_v58 = vpack.c.bf16 %v1142_v54, %v1141_v53  ;;  %v1070_v60 = vld [vmem:[%s9303_s25 + $0x58] sm:$0xff]  ;;  %v1144_v62 = vld [vmem:[%s9303_s25 + $0x69] sm:$0xff]  ;;  %v1071_v4 = vld [vmem:[%s9303_s25 + $0x60] sm:$0xff] }
  0xc1   : > { %2461 = vmatpush1.bf16.msra.mxu0 %v8635_v5  ;;  %v8656_v63 = vld [vmem:[#allocation7 + $0xc8] sm:$0xff]   ;;  %v8657_v1 = vld [vmem:[#allocation7 + $0xd0] sm:$0xff]   ;;  %v1100_v2 = vpack.c.bf16 %v1070_v60, %v1069_v59  ;;  %v1173_v3 = vpack.c.bf16 %v1144_v62, %v1143_v61  ;;  %v1072_v5 = vld [vmem:[%s9303_s25 + $0x68] sm:$0xff] }
  0xc2   : > { %2462 = vmatprep.subr.bf16.mxu0 %v9012_v0  ;;  %v1145_v6 = vld [vmem:[%s9303_s25 + $0x71] sm:$0xff]  ;;  %v1146_v7 = vld [vmem:[%s9303_s25 + $0x79] sm:$0xff]  ;;  %v1076_v21 = vld [vmem:[%s9303_s25 + $0x88] sm:$0xff] }
  0xc3   : > { %v8658_v8 = vld [vmem:[#allocation7 + $0xd8] sm:$0xff]   ;;  %v1149_v22 = vld [vmem:[%s9303_s25 + $0x91] sm:$0xff] }
  0xc4   : > { %v1075_v20 = vld [vmem:[%s9303_s25 + $0x80] sm:$0xff]  ;;  %v1077_v27 = vld [vmem:[%s9303_s25 + $0x90] sm:$0xff]  ;;  %v1078_v28 = vld [vmem:[%s9303_s25 + $0x98] sm:$0xff] }
  0xc5   : > { %2463 = vmatpush1.bf16.msra.mxu0 %v8636_v9  ;;  %v8659_v9 = vld [vmem:[#allocation7 + $0xe0] sm:$0xff]   ;;  %v1150_v23 = vld [vmem:[%s9303_s25 + $0x99] sm:$0xff]  ;;  %v1104_v31 = vpack.c.bf16 %v1078_v28, %v1077_v27 }
  0xc6   : > { %2464 = vmatprep.subr.bf16.mxu0 %v9012_v0  ;;  %v1152_v30 = vld [vmem:[%s9303_s25 + $0xa9] sm:$0xff]  ;;  %v1153_v35 = vld [vmem:[%s9303_s25 + $0xb1] sm:$0xff]  ;;  %v1083_v44 = vld [vmem:[%s9303_s25 + $0xc0] sm:$0xff] }
  0xc7   : > { %v1081_v38 = vld [vmem:[%s9303_s25 + $0xb0] sm:$0xff]  ;;  %v1084_v45 = vld [vmem:[%s9303_s25 + $0xc8] sm:$0xff]  ;;  %v1086_v51 = vld [vmem:[%s9303_s25 + $0xd8] sm:$0xff] }
  0xc8   : > { %v1157_v46 = vld [vmem:[%s9303_s25 + $0xd1] sm:$0xff]  ;;  %v1159_v52 = vld [vmem:[%s9303_s25 + $0xe1] sm:$0xff]  ;;  %v1160_v53 = vld [vmem:[%s9303_s25 + $0xe9] sm:$0xff] }
  0xc9   : > { %2465 = vmatpush1.bf16.msra.mxu0 %v8637_v10  ;;  %v1101_v10 = vpack.c.bf16 %v1072_v5, %v1071_v4  ;;  %v1162_v59 = vld [vmem:[%s9303_s25 + $0xf9] sm:$0xff]  ;;  %v1089_v62 = vld [vmem:[%s9303_s25 + $0xf0] sm:$0xff] }
  0xca   : > { %2466 = vmatprep.subr.bf16.mxu0 %v9012_v0  ;;  %v1091_v5 = vld [vmem:[%s9303_s25 + $0x100] sm:$0xff] }
  0xcb   : > { %v1280_v27 = vld [vmem:[%s9303_s25 + $0x3a] sm:$0xff] }
  0xcd   : > { %2467 = vmatpush1.bf16.msra.mxu0 %v8638_v11  ;;  %v1174_v11 = vpack.c.bf16 %v1146_v7, %v1145_v6  ;;  %v1092_v6 = vld [vmem:[%s9303_s25 + $0x108] sm:$0xff]  ;;  %v1165_v7 = vld [vmem:[%s9303_s25 + $0x111] sm:$0xff] }
  0xce   : > { %2468 = vmatprep.subr.bf16.mxu0 %v9012_v0 }
  0xd1   : > { %2469 = vmatpush1.bf16.msra.mxu0 %v8639_v12  ;;  %v1073_v12 = vld [vmem:[%s9303_s25 + $0x70] sm:$0xff] }
  0xd2   : > { %2470 = vmatprep.subr.bf16.mxu0 %v9012_v0 }
  0xd5   : > { %2471 = vmatpush1.bf16.msra.mxu0 %v8640_v13  ;;  %v1074_v13 = vld [vmem:[%s9303_s25 + $0x78] sm:$0xff] }
  0xd6   : > { %2472 = vmatprep.subr.bf16.mxu0 %v9012_v0 }
  0xd9   : > { %2473 = vmatpush1.bf16.msra.mxu0 %v8641_v14  ;;  %v1147_v14 = vld [vmem:[%s9303_s25 + $0x81] sm:$0xff] }
  0xda   : > { %2474 = vmatprep.subr.bf16.mxu0 %v9012_v0 }
  0xdd   : > { %2475 = vmatpush1.bf16.msra.mxu0 %v8642_v15  ;;  %v1148_v15 = vld [vmem:[%s9303_s25 + $0x89] sm:$0xff] }
  0xde   : > { %2476 = vmatprep.subr.bf16.mxu0 %v9012_v0 }
  0xe1   : > { %2477 = vmatpush1.bf16.msra.mxu0 %v8643_v16  ;;  %v8660_v16 = vld [vmem:[#allocation7 + $0xe8] sm:$0xff]  }
  0xe2   : > { %2478 = vmatprep.subr.bf16.mxu0 %v9012_v0 }
  0xe5   : > { %2479 = vmatpush1.bf16.msra.mxu0 %v8644_v17  ;;  %v8661_v17 = vld [vmem:[#allocation7 + $0xf0] sm:$0xff]  }
  0xe6   : > { %2480 = vmatprep.subr.bf16.mxu0 %v9012_v0 }
  0xe9   : > { %2481 = vmatpush1.bf16.msra.mxu0 %v8645_v18  ;;  %v1102_v18 = vpack.c.bf16 %v1074_v13, %v1073_v12  ;;  %v1094_v12 = vld [vmem:[%s9303_s25 + $0x118] sm:$0xff] }
  0xea   : > { %2482 = vmatprep.subr.bf16.mxu0 %v9012_v0  ;;  %v1275_v13 = vld [vmem:[%s9303_s25 + $0x12] sm:$0xff] }
  0xed   : > { %2483 = vmatpush1.bf16.msra.mxu0 %v8646_v19  ;;  %v1175_v19 = vpack.c.bf16 %v1148_v15, %v1147_v14  ;;  %v1276_v14 = vld [vmem:[%s9303_s25 + $0x1a] sm:$0xff] }
  0xee   : > { %2629 = vmatprep.subr.bf16.mxu0 %v9012_v0 }
  0xf0   : > { %2485 = vmatmul.mubr.bf16.vlgmr.msra.gmra.mrb[0].mxu0 %v1095_v25  ;;  %v1103_v25 = vpack.c.bf16 %v1076_v21, %v1075_v20  ;;  %v1278_v20 = vld [vmem:[%s9303_s25 + $0x2a] sm:$0xff] }
  0xf1   : > { %2630 = vmatpush1.bf16.msra.mxu0 %v8647_v24  ;;  %2492 = vmatprep.mubr.bf16.mxu0 %v1168_v26  ;;  %v8662_v24 = vld [vmem:[#allocation7 + $0xf8] sm:$0xff]   ;;  %v1176_v26 = vpack.c.bf16 %v1150_v23, %v1149_v22  ;;  %v8663_v22 = vld [vmem:[#allocation7 + $0x100] sm:$0xff]  }
  0xf2   : > { %2631 = vmatprep.subr.bf16.mxu0 %v9012_v0 }
  0xf5   : > { %2632 = vmatpush1.bf16.msra.mxu0 %v8648_v29  ;;  %v1151_v29 = vld [vmem:[%s9303_s25 + $0xa1] sm:$0xff] }
  0xf6   : > { %2633 = vmatprep.subr.bf16.mxu0 %v9012_v0 }
  0xf8   : > { %2493 = vmatmul.mubr.bf16.gmra.mrb[4].mxu0 %v1096_v33  ;;  %v1079_v33 = vld [vmem:[%s9303_s25 + $0xa0] sm:$0xff] }
  0xf9   : > { %2500 = vmatprep.mubr.bf16.mxu0 %v1169_v34  ;;  %2634 = vmatpush1.bf16.msra.mxu0 %v8649_v32  ;;  %v1177_v32 = vpack.c.bf16 %v1152_v30, %v1151_v29  ;;  %v1080_v34 = vld [vmem:[%s9303_s25 + $0xa8] sm:$0xff]  ;;  %v8665_v29 = vld [vmem:[#allocation7 + $0x110] sm:$0xff]  }
  0xfa   : > { %2635 = vmatprep.subr.bf16.mxu0 %v9012_v0  ;;  %v1105_v36 = vpack.c.bf16 %v1080_v34, %v1079_v33  ;;  %v8666_v30 = vld [vmem:[#allocation7 + $0x118] sm:$0xff]   ;;  %v8667_v34 = vld [vmem:[#allocation7 + $0x120] sm:$0xff]  }
  0xfd   : > { %2636 = vmatpush1.bf16.msra.mxu0 %v8650_v39  ;;  %v1082_v39 = vld [vmem:[%s9303_s25 + $0xb8] sm:$0xff] }
  0xfe   : > { %2637 = vmatprep.subr.bf16.mxu0 %v9012_v0 }
 0x100   : > { %2501 = vmatmul.mubr.bf16.gmra.mrb[8].mxu0 %v1097_v41  ;;  %v1156_v41 = vld [vmem:[%s9303_s25 + $0xc9] sm:$0xff] }
 0x101   : > { %2508 = vmatprep.mubr.bf16.mxu0 %v1170_v42  ;;  %2638 = vmatpush1.bf16.msra.mxu0 %v8651_v40  ;;  %v1155_v40 = vld [vmem:[%s9303_s25 + $0xc1] sm:$0xff]  ;;  %v1106_v42 = vpack.c.bf16 %v1082_v39, %v1081_v38 }
 0x102   : > { %2639 = vmatprep.subr.bf16.mxu0 %v9012_v0  ;;  %v1179_v43 = vpack.c.bf16 %v1156_v41, %v1155_v40  ;;  %v8669_v38 = vld [vmem:[#allocation7 + $0x130] sm:$0xff]   ;;  %v8670_v39 = vld [vmem:[#allocation7 + $0x138] sm:$0xff]  }
 0x103   : > { %v1285_v40 = vld [vmem:[%s9303_s25 + $0x62] sm:$0xff]  ;;  %v1286_v41 = vld [vmem:[%s9303_s25 + $0x6a] sm:$0xff] }
 0x105   : > { %2640 = vmatpush1.bf16.msra.mxu0 %v8652_v47  ;;  %v1158_v47 = vld [vmem:[%s9303_s25 + $0xd9] sm:$0xff] }
 0x106   : > { %2641 = vmatprep.subr.bf16.mxu0 %v9012_v0 }
 0x108   : > { %2509 = vmatmul.mubr.bf16.gmra.mrb[12].mxu0 %v1098_v49  ;;  %v1180_v49 = vpack.c.bf16 %v1158_v47, %v1157_v46  ;;  %v1288_v46 = vld [vmem:[%s9303_s25 + $0x7a] sm:$0xff] }
 0x109   : > { %2516 = vmatprep.mubr.bf16.mxu0 %v1171_v50  ;;  %2642 = vmatpush1.bf16.msra.mxu0 %v8653_v48  ;;  %v1107_v48 = vpack.c.bf16 %v1084_v45, %v1083_v44  ;;  %v1085_v50 = vld [vmem:[%s9303_s25 + $0xd0] sm:$0xff] }
 0x10a   : > { %2643 = vmatprep.subr.bf16.mxu0 %v9012_v0  ;;  %v1108_v54 = vpack.c.bf16 %v1086_v51, %v1085_v50  ;;  %v8672_v44 = vld [vmem:[#allocation7 + $0x148] sm:$0xff]   ;;  %v1289_v50 = vld [vmem:[%s9303_s25 + $0x82] sm:$0xff] }
 0x10b   : > { %v1287_v45 = vld [vmem:[%s9303_s25 + $0x72] sm:$0xff]  ;;  %v1290_v51 = vld [vmem:[%s9303_s25 + $0x8a] sm:$0xff] }
 0x10c   : > { %v1317_v47 = vpack.c.bf16 %v1288_v46, %v1287_v45 }
 0x10d   : > { %2644 = vmatpush1.bf16.msra.mxu0 %v8654_v55  ;;  %v1181_v55 = vpack.c.bf16 %v1160_v53, %v1159_v52  ;;  %v1318_v52 = vpack.c.bf16 %v1290_v51, %v1289_v50  ;;  %v8675_v53 = vld [vmem:[#allocation7 + $0x160] sm:$0xff]   ;;  %v1352_v50 = vld [vmem:[%s9303_s25 + $0x3b] sm:$0xff] }
 0x10e   : > { %2645 = vmatprep.subr.bf16.mxu0 %v9012_v0  ;;  %v8702_v51 = vld [vmem:[#allocation7 + $0x238] sm:$0xff]  }
 0x110   : > { %2517 = vmatmul.mubr.bf16.gmra.mrb[16].mxu0 %v1099_v57  ;;  %v1088_v57 = vld [vmem:[%s9303_s25 + $0xe8] sm:$0xff] }
 0x111   : > { %2524 = vmatprep.mubr.bf16.mxu0 %v1172_v58  ;;  %2646 = vmatpush1.bf16.msra.mxu0 %v8655_v56  ;;  %v1087_v56 = vld [vmem:[%s9303_s25 + $0xe0] sm:$0xff]  ;;  %v1161_v58 = vld [vmem:[%s9303_s25 + $0xf1] sm:$0xff] }
 0x112   : > { %2647 = vmatprep.subr.bf16.mxu0 %v9012_v0  ;;  %v1109_v60 = vpack.c.bf16 %v1088_v57, %v1087_v56  ;;  %v1182_v61 = vpack.c.bf16 %v1162_v59, %v1161_v58  ;;  %v1292_v56 = vld [vmem:[%s9303_s25 + $0x9a] sm:$0xff] }
 0x113   : > { %v8677_v58 = vld [vmem:[#allocation7 + $0x170] sm:$0xff]   ;;  %v8678_v59 = vld [vmem:[#allocation7 + $0x178] sm:$0xff]  }
 0x115   : > { %2648 = vmatpush1.bf16.msra.mxu0 %v8656_v63  ;;  %v1090_v63 = vld [vmem:[%s9303_s25 + $0xf8] sm:$0xff] }
 0x116   : > { %2649 = vmatprep.subr.bf16.mxu0 %v9012_v0 }
 0x118   : > { %2525 = vmatmul.mubr.bf16.gmra.mrb[20].mxu0 %v1100_v2  ;;  %v1164_v2 = vld [vmem:[%s9303_s25 + $0x109] sm:$0xff] }
 0x119   : > { %2532 = vmatprep.mubr.bf16.mxu0 %v1173_v3  ;;  %2650 = vmatpush1.bf16.msra.mxu0 %v8657_v1  ;;  %v1163_v1 = vld [vmem:[%s9303_s25 + $0x101] sm:$0xff]  ;;  %v1110_v3 = vpack.c.bf16 %v1090_v63, %v1089_v62  ;;  %v1295_v63 = vld [vmem:[%s9303_s25 + $0xb2] sm:$0xff] }
 0x11a   : > { %2651 = vmatprep.subr.bf16.mxu0 %v9012_v0  ;;  %v1183_v4 = vpack.c.bf16 %v1164_v2, %v1163_v1  ;;  %v1296_v1 = vld [vmem:[%s9303_s25 + $0xba] sm:$0xff] }
 0x11b   : > { %v1321_v2 = vpack.c.bf16 %v1296_v1, %v1295_v63  ;;  %v1353_v1 = vld [vmem:[%s9303_s25 + $0x43] sm:$0xff] }
 0x11d   : > { %2652 = vmatpush1.bf16.msra.mxu0 %v8658_v8  ;;  %v1166_v8 = vld [vmem:[%s9303_s25 + $0x119] sm:$0xff] }
 0x11e   : > { %2653 = vmatprep.subr.bf16.mxu0 %v9012_v0 }
 0x120   : > { %2533 = vmatmul.mubr.bf16.gmra.mrb[24].mxu0 %v1101_v10  ;;  %v1184_v10 = vpack.c.bf16 %v1166_v8, %v1165_v7  ;;  %v1300_v7 = vld [vmem:[%s9303_s25 + $0xda] sm:$0xff] }
 0x121   : > { %2540 = vmatprep.mubr.bf16.mxu0 %v1174_v11  ;;  %2654 = vmatpush1.bf16.msra.mxu0 %v8659_v9  ;;  %v1111_v9 = vpack.c.bf16 %v1092_v6, %v1091_v5  ;;  %v1093_v11 = vld [vmem:[%s9303_s25 + $0x110] sm:$0xff] }
 0x122   : > { %2655 = vmatprep.subr.bf16.mxu0 %v9012_v0  ;;  %v1112_v15 = vpack.c.bf16 %v1094_v12, %v1093_v11  ;;  %v1299_v6 = vld [vmem:[%s9303_s25 + $0xd2] sm:$0xff] }
 0x123   : > { %v1323_v8 = vpack.c.bf16 %v1300_v7, %v1299_v6  ;;  %v1303_v12 = vld [vmem:[%s9303_s25 + $0xf2] sm:$0xff] }
 0x125   : > { %2656 = vmatpush1.bf16.msra.mxu0 %v8660_v16  ;;  %v1311_v16 = vpack.c.bf16 %v1276_v14, %v1275_v13  ;;  %v1304_v13 = vld [vmem:[%s9303_s25 + $0xfa] sm:$0xff] }
 0x126   : > { %2657 = vmatprep.subr.bf16.mxu0 %v9012_v0  ;;  %v1325_v14 = vpack.c.bf16 %v1304_v13, %v1303_v12  ;;  %v1640_v12 = vld [vmem:[%s9303_s25 + $0x4e] sm:$0xff] }
 0x127   : > { %v8686_v13 = vld [vmem:[#allocation7 + $0x1b8] sm:$0xff]  }
 0x128   : > { %2541 = vmatmul.mubr.bf16.gmra.mrb[28].mxu0 %v1102_v18  ;;  %v1204_v18 = vld [vmem:[%s9303_s25 + $0xa] sm:$0xff] }
 0x129   : > { %2548 = vmatprep.mubr.bf16.mxu0 %v1175_v19  ;;  %2658 = vmatpush1.bf16.msra.mxu0 %v8661_v17  ;;  %v1203_v17 = vld [vmem:[%s9303_s25 + $0x2] sm:$0xff] }
 0x12a   : > { %2659 = vmatprep.subr.bf16.mxu0 %v9012_v0  ;;  %v1277_v19 = vld [vmem:[%s9303_s25 + $0x22] sm:$0xff]  ;;  %v1239_v21 = vpack.c.bf16 %v1204_v18, %v1203_v17  ;;  %v1307_v18 = vld [vmem:[%s9303_s25 + $0x112] sm:$0xff] }
 0x12b   : > { %v1312_v23 = vpack.c.bf16 %v1278_v20, %v1277_v19  ;;  %v1308_v19 = vld [vmem:[%s9303_s25 + $0x11a] sm:$0xff] }
 0x12c   : > { %v1327_v20 = vpack.c.bf16 %v1308_v19, %v1307_v18  ;;  %v1430_v18 = vld [vmem:[%s9303_s25 + $0x6c] sm:$0xff] }
 0x12d   : > { %2660 = vmatpush1.bf16.msra.mxu0 %v8662_v24  ;;  %v8664_v24 = vld [vmem:[#allocation7 + $0x108] sm:$0xff]  }
 0x12e   : > { %2806 = vmatprep.subr.bf16.mxu0 %v9012_v0  ;;  %v1154_v0 = vld [vmem:[%s9303_s25 + $0xb9] sm:$0xff] }
 0x12f   : > { %v1178_v37 = vpack.c.bf16 %v1154_v0, %v1153_v35  ;;  %v8668_v35 = vld [vmem:[#allocation7 + $0x128] sm:$0xff]  }
 0x130   : > { %2549 = vmatmul.mubr.bf16.gmra.mrb[32].mxu0 %v1103_v25  ;;  %v9432_v25 = vld [vmem:[#allocation2] sm:$0xff] }
 0x131   : > { %2556 = vmatprep.mubr.bf16.mxu0 %v1176_v26  ;;  %v1279_v26 = vld [vmem:[%s9303_s25 + $0x32] sm:$0xff] }
 0x132   : > { %v1313_v28 = vpack.c.bf16 %v1280_v27, %v1279_v26  ;;  %v1283_v0 = vld [vmem:[%s9303_s25 + $0x52] sm:$0xff] }
 0x133   : > { %v8693_v26 = vld [vmem:[#allocation7 + $0x208] sm:$0xff]  }
 0x134   : > { %v1419_v27 = vld [vmem:[%s9303_s25 + $0x14] sm:$0xff] }
 0x138   : > { %2557 = vmatmul.mubr.bf16.gmra.mrb[36].mxu0 %v1104_v31  ;;  %v1281_v31 = vld [vmem:[%s9303_s25 + $0x42] sm:$0xff] }
 0x139   : > { %2564 = vmatprep.mubr.bf16.mxu0 %v1177_v32  ;;  %v1282_v32 = vld [vmem:[%s9303_s25 + $0x4a] sm:$0xff] }
 0x13a   : > { %v1314_v33 = vpack.c.bf16 %v1282_v32, %v1281_v31  ;;  %v8696_v31 = vld [vmem:[#allocation7 + $0x218] sm:$0xff]   ;;  %v1347_v32 = vld [vmem:[%s9303_s25 + $0x13] sm:$0xff] }
 0x140   : > { %2565 = vmatmul.mubr.bf16.gmra.mrb[40].mxu0 %v1105_v36  ;;  %v1284_v36 = vld [vmem:[%s9303_s25 + $0x5a] sm:$0xff] }
 0x141   : > { %2572 = vmatprep.mubr.bf16.mxu0 %v1178_v37  ;;  %v1315_v37 = vpack.c.bf16 %v1284_v36, %v1283_v0  ;;  %v8679_v36 = vld [vmem:[#allocation7 + $0x180] sm:$0xff]  }
 0x148   : > { %2573 = vmatmul.mubr.bf16.gmra.mrb[44].mxu0 %v1106_v42  ;;  %v1316_v42 = vpack.c.bf16 %v1286_v41, %v1285_v40  ;;  %v1349_v40 = vld [vmem:[%s9303_s25 + $0x23] sm:$0xff]  ;;  %v1350_v41 = vld [vmem:[%s9303_s25 + $0x2b] sm:$0xff] }
 0x149   : > { %2580 = vmatprep.mubr.bf16.mxu0 %v1179_v43  ;;  %v8671_v43 = vld [vmem:[#allocation7 + $0x140] sm:$0xff]   ;;  %v1384_v45 = vpack.c.bf16 %v1350_v41, %v1349_v40 }
 0x14a   : > { %v1433_v40 = vld [vmem:[%s9303_s25 + $0x84] sm:$0xff]  ;;  %v1434_v41 = vld [vmem:[%s9303_s25 + $0x8c] sm:$0xff] }
 0x150   : > { %2581 = vmatmul.mubr.bf16.gmra.mrb[48].mxu0 %v1107_v48  ;;  %v8673_v48 = vld [vmem:[#allocation7 + $0x150] sm:$0xff]  }
 0x151   : > { %2588 = vmatprep.mubr.bf16.mxu0 %v1180_v49  ;;  %v8674_v49 = vld [vmem:[#allocation7 + $0x158] sm:$0xff]  }
 0x158   : > { %2589 = vmatmul.mubr.bf16.gmra.mrb[52].mxu0 %v1108_v54  ;;  %v8676_v54 = vld [vmem:[#allocation7 + $0x168] sm:$0xff]  }
 0x159   : > { %2596 = vmatprep.mubr.bf16.mxu0 %v1181_v55  ;;  %v1291_v55 = vld [vmem:[%s9303_s25 + $0x92] sm:$0xff] }
 0x15a   : > { %v1319_v57 = vpack.c.bf16 %v1292_v56, %v1291_v55  ;;  %v1425_v55 = vld [vmem:[%s9303_s25 + $0x44] sm:$0xff]  ;;  %v1426_v56 = vld [vmem:[%s9303_s25 + $0x4c] sm:$0xff] }
 0x160   : > { %2597 = vmatmul.mubr.bf16.gmra.mrb[56].mxu0 %v1109_v60  ;;  %v1293_v60 = vld [vmem:[%s9303_s25 + $0xa2] sm:$0xff] }
 0x161   : > { %2604 = vmatprep.mubr.bf16.mxu0 %v1182_v61  ;;  %v1294_v61 = vld [vmem:[%s9303_s25 + $0xaa] sm:$0xff] }
 0x162   : > { %v1320_v62 = vpack.c.bf16 %v1294_v61, %v1293_v60  ;;  %v1638_v60 = vld [vmem:[%s9303_s25 + $0x3e] sm:$0xff]  ;;  %v9509_v61 = vpack.c.bf16 %v1426_v56, %v1425_v55  ;;  %v1363_v55 = vld [vmem:[%s9303_s25 + $0x93] sm:$0xff] }
 0x163   : > { %v1364_v56 = vld [vmem:[%s9303_s25 + $0x9b] sm:$0xff] }
 0x168   : > { %2605 = vmatmul.mubr.bf16.gmra.mrb[60].mxu0 %v1110_v3  ;;  %v1297_v3 = vld [vmem:[%s9303_s25 + $0xc2] sm:$0xff] }
 0x169   : > { %2612 = vmatprep.mubr.bf16.mxu0 %v1183_v4  ;;  %v1298_v4 = vld [vmem:[%s9303_s25 + $0xca] sm:$0xff] }
 0x16a   : > { %v1322_v5 = vpack.c.bf16 %v1298_v4, %v1297_v3  ;;  %v8684_v3 = vld [vmem:[#allocation7 + $0x1a8] sm:$0xff]  }
 0x16b   : > { %v1427_v4 = vld [vmem:[%s9303_s25 + $0x54] sm:$0xff] }
 0x170   : > { %2613 = vmatmul.mubr.bf16.gmra.mrb[64].mxu0 %v1111_v9  ;;  %v1301_v9 = vld [vmem:[%s9303_s25 + $0xe2] sm:$0xff] }
 0x171   : > { %2620 = vmatprep.mubr.bf16.mxu0 %v1184_v10  ;;  %v1302_v10 = vld [vmem:[%s9303_s25 + $0xea] sm:$0xff] }
 0x172   : > { %v1324_v11 = vpack.c.bf16 %v1302_v10, %v1301_v9  ;;  %v1355_v9 = vld [vmem:[%s9303_s25 + $0x53] sm:$0xff]  ;;  %v1356_v10 = vld [vmem:[%s9303_s25 + $0x5b] sm:$0xff] }
 0x178   : > { %2621 = vmatmul.mubr.bf16.gmra.mrb[68].mxu0 %v1112_v15  ;;  %v1305_v15 = vld [vmem:[%s9303_s25 + $0x102] sm:$0xff] }
 0x179   : > { %2661 = vmatprep.mubr.bf16.mxu0 %v1311_v16 }
 0x180   : > { %2662 = vmatmul.mubr.bf16.vlgmr.msra.gmra.mrb[0].mxu0 %v1239_v21  ;;  %v1309_v21 = vld [vmem:[%s9303_s25 + $0x122] sm:$0xff] }
 0x181   : > { %2807 = vmatpush1.bf16.msra.mxu0 %v8663_v22  ;;  %2669 = vmatprep.mubr.bf16.mxu0 %v1312_v23  ;;  %v1310_v22 = vld [vmem:[%s9303_s25 + $0x12a] sm:$0xff] }
 0x182   : > { %2808 = vmatprep.subr.bf16.mxu0 %v9432_v25 }
 0x185   : > { %2809 = vmatpush1.bf16.msra.mxu0 %v8664_v24  ;;  %v8692_v24 = vld [vmem:[#allocation7 + $0x200] sm:$0xff]  }
 0x186   : > { %2810 = vmatprep.subr.bf16.mxu0 %v9432_v25  ;;  %7731 = vmatprep.subr.bf16.mxu1 %v8692_v24 }
 0x187   : > { %7732 = vmatpush3.bf16.msra.mxu1 %v8692_v24  ;;  %v1358_v24 = vld [vmem:[%s9303_s25 + $0x6b] sm:$0xff] }
 0x188   : > { %2670 = vmatmul.mubr.bf16.gmra.mrb[4].mxu0 %v1311_v16  ;;  %v1306_v16 = vld [vmem:[%s9303_s25 + $0x10a] sm:$0xff]  ;;  %7733 = vmatprep.subr.bf16.mxu1 %v8693_v26 }
 0x189   : > { %2677 = vmatprep.mubr.bf16.mxu0 %v1313_v28  ;;  %2811 = vmatpush1.bf16.msra.mxu0 %v8665_v29  ;;  %v1326_v17 = vpack.c.bf16 %v1306_v16, %v1305_v15  ;;  %v1641_v15 = vld [vmem:[%s9303_s25 + $0x56] sm:$0xff]  ;;  %v1642_v16 = vld [vmem:[%s9303_s25 + $0x5e] sm:$0xff] }
 0x18a   : > { %2812 = vmatprep.subr.bf16.mxu0 %v9432_v25  ;;  %v1674_v19 = vpack.c.bf16 %v1642_v16, %v1641_v15  ;;  %v1652_v15 = vld [vmem:[%s9303_s25 + $0xae] sm:$0xff]  ;;  %v1368_v16 = vld [vmem:[%s9303_s25 + $0xbb] sm:$0xff] }
 0x18b   : > { %7734 = vmatpush3.bf16.msra.mxu1 %v8693_v26  ;;  %v8688_v26 = vld [vmem:[#allocation7 + $0x1c8] sm:$0xff]  }
 0x18d   : > { %2813 = vmatpush1.bf16.msra.mxu0 %v8666_v30  ;;  %v8695_v30 = vld [vmem:[#allocation7 + $0x210] sm:$0xff]  }
 0x18e   : > { %2814 = vmatprep.subr.bf16.mxu0 %v9432_v25  ;;  %7735 = vmatprep.subr.bf16.mxu1 %v8695_v30 }
 0x18f   : > { %7736 = vmatpush3.bf16.msra.mxu1 %v8695_v30 }
 0x190   : > { %2678 = vmatmul.mubr.bf16.gmra.mrb[8].mxu0 %v1312_v23  ;;  %v1328_v23 = vpack.c.bf16 %v1310_v22, %v1309_v21  ;;  %7737 = vmatprep.subr.bf16.mxu1 %v8696_v31  ;;  %v8687_v22 = vld [vmem:[#allocation7 + $0x1c0] sm:$0xff]  }
 0x191   : > { %2685 = vmatprep.mubr.bf16.mxu0 %v1314_v33  ;;  %2815 = vmatpush1.bf16.msra.mxu0 %v8667_v34  ;;  %v1421_v34 = vld [vmem:[%s9303_s25 + $0x24] sm:$0xff] }
 0x192   : > { %2816 = vmatprep.subr.bf16.mxu0 %v9432_v25 }
 0x193   : > { %7738 = vmatpush3.bf16.msra.mxu1 %v8696_v31  ;;  %v8689_v31 = vld [vmem:[#allocation7 + $0x1d0] sm:$0xff]  }
 0x195   : > { %2817 = vmatpush1.bf16.msra.mxu0 %v8668_v35  ;;  %v1422_v35 = vld [vmem:[%s9303_s25 + $0x2c] sm:$0xff] }
 0x196   : > { %2818 = vmatprep.subr.bf16.mxu0 %v9432_v25 }
 0x198   : > { %2686 = vmatmul.mubr.bf16.gmra.mrb[12].mxu0 %v1313_v28  ;;  %v1420_v28 = vld [vmem:[%s9303_s25 + $0x1c] sm:$0xff] }
 0x199   : > { %2693 = vmatprep.mubr.bf16.mxu0 %v1315_v37  ;;  %2819 = vmatpush1.bf16.msra.mxu0 %v8669_v38  ;;  %v1455_v29 = vpack.c.bf16 %v1420_v28, %v1419_v27  ;;  %v8698_v38 = vld [vmem:[#allocation7 + $0x220] sm:$0xff]   ;;  %v1432_v28 = vld [vmem:[%s9303_s25 + $0x7c] sm:$0xff] }
 0x19a   : > { %2820 = vmatprep.subr.bf16.mxu0 %v9432_v25  ;;  %7739 = vmatprep.subr.bf16.mxu1 %v8698_v38  ;;  %v1431_v27 = vld [vmem:[%s9303_s25 + $0x74] sm:$0xff] }
 0x19b   : > { %7740 = vmatpush3.bf16.msra.mxu1 %v8698_v38  ;;  %v9541_v30 = vpack.c.bf16 %v1432_v28, %v1431_v27  ;;  %v1645_v38 = vld [vmem:[%s9303_s25 + $0x76] sm:$0xff]  ;;  %v1369_v27 = vld [vmem:[%s9303_s25 + $0xc3] sm:$0xff]  ;;  %v1370_v28 = vld [vmem:[%s9303_s25 + $0xcb] sm:$0xff] }
 0x19d   : > { %2821 = vmatpush1.bf16.msra.mxu0 %v8670_v39  ;;  %v8699_v39 = vld [vmem:[#allocation7 + $0x228] sm:$0xff]  }
 0x19e   : > { %2822 = vmatprep.subr.bf16.mxu0 %v9432_v25  ;;  %7741 = vmatprep.subr.bf16.mxu1 %v8699_v39 }
 0x19f   : > { %7742 = vmatpush3.bf16.msra.mxu1 %v8699_v39  ;;  %v1646_v39 = vld [vmem:[%s9303_s25 + $0x7e] sm:$0xff] }
 0x1a0   : > { %2694 = vmatmul.mubr.bf16.gmra.mrb[16].mxu0 %v1314_v33  ;;  %v1348_v33 = vld [vmem:[%s9303_s25 + $0x1b] sm:$0xff] }
 0x1a1   : > { %2701 = vmatprep.mubr.bf16.mxu0 %v1316_v42  ;;  %2823 = vmatpush1.bf16.msra.mxu0 %v8671_v43  ;;  %v1383_v0 = vpack.c.bf16 %v1348_v33, %v1347_v32  ;;  %v1423_v43 = vld [vmem:[%s9303_s25 + $0x34] sm:$0xff] }
 0x1a2   : > { %2824 = vmatprep.subr.bf16.mxu0 %v9432_v25  ;;  %v1359_v32 = vld [vmem:[%s9303_s25 + $0x73] sm:$0xff]  ;;  %v1360_v33 = vld [vmem:[%s9303_s25 + $0x7b] sm:$0xff] }
 0x1a5   : > { %2825 = vmatpush1.bf16.msra.mxu0 %v8672_v44  ;;  %v1424_v44 = vld [vmem:[%s9303_s25 + $0x3c] sm:$0xff] }
 0x1a6   : > { %2826 = vmatprep.subr.bf16.mxu0 %v9432_v25  ;;  %v9496_v46 = vpack.c.bf16 %v1424_v44, %v1423_v43  ;;  %v1389_v43 = vpack.c.bf16 %v1360_v33, %v1359_v32  ;;  %v9554_v44 = vpack.c.bf16 %v1434_v41, %v1433_v40  ;;  %v1394_v32 = vpack.c.bf16 %v1370_v28, %v1369_v27  ;;  %v1658_v40 = vld [vmem:[%s9303_s25 + $0xde] sm:$0xff] }
 0x1a7   : > { %v1445_v41 = vld [vmem:[%s9303_s25 + $0xe4] sm:$0xff] }
 0x1a8   : > { %2702 = vmatmul.mubr.bf16.gmra.mrb[20].mxu0 %v1315_v37  ;;  %v9488_v37 = vpack.c.bf16 %v1422_v35, %v1421_v34  ;;  %v1643_v34 = vld [vmem:[%s9303_s25 + $0x66] sm:$0xff]  ;;  %v1644_v35 = vld [vmem:[%s9303_s25 + $0x6e] sm:$0xff] }
 0x1a9   : > { %2709 = vmatprep.mubr.bf16.mxu0 %v1317_v47  ;;  %2827 = vmatpush1.bf16.msra.mxu0 %v8673_v48  ;;  %v8701_v48 = vld [vmem:[#allocation7 + $0x230] sm:$0xff]  }
 0x1aa   : > { %2828 = vmatprep.subr.bf16.mxu0 %v9432_v25  ;;  %7743 = vmatprep.subr.bf16.mxu1 %v8701_v48 }
 0x1ab   : > { %7744 = vmatpush3.bf16.msra.mxu1 %v8701_v48  ;;  %v1362_v48 = vld [vmem:[%s9303_s25 + $0x8b] sm:$0xff] }
 0x1ac   : > { %7745 = vmatprep.subr.bf16.mxu1 %v8702_v51 }
 0x1ad   : > { %2829 = vmatpush1.bf16.msra.mxu0 %v8674_v49  ;;  %v1351_v49 = vld [vmem:[%s9303_s25 + $0x33] sm:$0xff] }
 0x1ae   : > { %2830 = vmatprep.subr.bf16.mxu0 %v9432_v25 }
 0x1af   : > { %7746 = vmatpush3.bf16.msra.mxu1 %v8702_v51  ;;  %v1436_v51 = vld [vmem:[%s9303_s25 + $0x9c] sm:$0xff] }
 0x1b0   : > { %2710 = vmatmul.mubr.bf16.gmra.mrb[24].mxu0 %v1316_v42  ;;  %v8680_v42 = vld [vmem:[#allocation7 + $0x188] sm:$0xff]   ;;  %6029 = vmatprep.subr.bf16.mxu1 %v9432_v25 }
 0x1b1   : > { %2717 = vmatprep.mubr.bf16.mxu0 %v1318_v52  ;;  %2831 = vmatpush1.bf16.msra.mxu0 %v8675_v53  ;;  %v1635_v53 = vld [vmem:[%s9303_s25 + $0x26] sm:$0xff] }
 0x1b2   : > { %2832 = vmatprep.subr.bf16.mxu0 %v9432_v25 }
 0x1b5   : > { %2833 = vmatpush1.bf16.msra.mxu0 %v8676_v54  ;;  %v1636_v54 = vld [vmem:[%s9303_s25 + $0x2e] sm:$0xff] }
 0x1b6   : > { %2834 = vmatprep.subr.bf16.mxu0 %v9432_v25 }
 0x1b8   : > { %2718 = vmatmul.mubr.bf16.gmra.mrb[28].mxu0 %v1317_v47  ;;  %v8681_v47 = vld [vmem:[#allocation7 + $0x190] sm:$0xff]  }
 0x1b9   : > { %2725 = vmatprep.mubr.bf16.mxu0 %v1319_v57  ;;  %2835 = vmatpush1.bf16.msra.mxu0 %v8677_v58  ;;  %v1385_v58 = vpack.c.bf16 %v1352_v50, %v1351_v49  ;;  %v8694_v49 = vld [vmem:[#allocation7 + $0x1e8] sm:$0xff]  }
 0x1ba   : > { %2836 = vmatprep.subr.bf16.mxu0 %v9432_v25  ;;  %v1435_v50 = vld [vmem:[%s9303_s25 + $0x94] sm:$0xff] }
 0x1bd   : > { %2837 = vmatpush1.bf16.msra.mxu0 %v8678_v59  ;;  %v1637_v59 = vld [vmem:[%s9303_s25 + $0x36] sm:$0xff] }
 0x1be   : > { %2983 = vmatprep.subr.bf16.mxu0 %v9432_v25  ;;  %v1672_v63 = vpack.c.bf16 %v1638_v60, %v1637_v59  ;;  %v8700_v59 = vld [vmem:[#allocation7 + $0x1f8] sm:$0xff]  }
 0x1c0   : > { %2726 = vmatmul.mubr.bf16.gmra.mrb[32].mxu0 %v1318_v52  ;;  %v8682_v52 = vld [vmem:[#allocation7 + $0x198] sm:$0xff]  }
 0x1c1   : > { %2733 = vmatprep.mubr.bf16.mxu0 %v1320_v62 }
 0x1c8   : > { %2734 = vmatmul.mubr.bf16.gmra.mrb[36].mxu0 %v1319_v57  ;;  %v1671_v57 = vpack.c.bf16 %v1636_v54, %v1635_v53  ;;  %v9563_v53 = vpack.c.bf16 %v1436_v51, %v1435_v50  ;;  %v8697_v54 = vld [vmem:[#allocation7 + $0x1f0] sm:$0xff]  }
 0x1c9   : > { %2741 = vmatprep.mubr.bf16.mxu0 %v1321_v2  ;;  %v1447_v50 = vld [vmem:[%s9303_s25 + $0xf4] sm:$0xff]  ;;  %v1448_v51 = vld [vmem:[%s9303_s25 + $0xfc] sm:$0xff] }
 0x1ca   : > { %7747 = vmatprep.mubr.bf16.mxu1 %v1671_v57  ;;  %v1647_v57 = vld [vmem:[%s9303_s25 + $0x86] sm:$0xff] }
 0x1cb   : > { %7748 = vmatmul.mubr.bf16.vlgmr.msra.gmra.mrb[0].mxu1 %v1672_v63  ;;  %v1650_v63 = vld [vmem:[%s9303_s25 + $0x9e] sm:$0xff] }
 0x1d0   : > { %2742 = vmatmul.mubr.bf16.gmra.mrb[40].mxu0 %v1320_v62  ;;  %v8683_v62 = vld [vmem:[#allocation7 + $0x1a0] sm:$0xff]  }
 0x1d1   : > { %2749 = vmatprep.mubr.bf16.mxu0 %v1322_v5 }
 0x1d8   : > { %2750 = vmatmul.mubr.bf16.gmra.mrb[44].mxu0 %v1321_v2  ;;  %v1354_v2 = vld [vmem:[%s9303_s25 + $0x4b] sm:$0xff] }
 0x1d9   : > { %2757 = vmatprep.mubr.bf16.mxu0 %v1323_v8  ;;  %v1386_v6 = vpack.c.bf16 %v1354_v2, %v1353_v1  ;;  %v1437_v1 = vld [vmem:[%s9303_s25 + $0xa4] sm:$0xff]  ;;  %v1438_v2 = vld [vmem:[%s9303_s25 + $0xac] sm:$0xff] }
 0x1e0   : > { %2758 = vmatmul.mubr.bf16.gmra.mrb[48].mxu0 %v1322_v5  ;;  %v1428_v5 = vld [vmem:[%s9303_s25 + $0x5c] sm:$0xff] }
 0x1e1   : > { %2765 = vmatprep.mubr.bf16.mxu0 %v1324_v11  ;;  %v9519_v7 = vpack.c.bf16 %v1428_v5, %v1427_v4  ;;  %v1391_v4 = vpack.c.bf16 %v1364_v56, %v1363_v55  ;;  %v9576_v5 = vpack.c.bf16 %v1438_v2, %v1437_v1  ;;  %v1375_v55 = vld [vmem:[%s9303_s25 + $0xf3] sm:$0xff]  ;;  %v1659_v56 = vld [vmem:[%s9303_s25 + $0xe6] sm:$0xff] }
 0x1e2   : > { %v1450_v1 = vld [vmem:[%s9303_s25 + $0x10c] sm:$0xff] }
 0x1e8   : > { %2766 = vmatmul.mubr.bf16.gmra.mrb[52].mxu0 %v1323_v8  ;;  %v8685_v8 = vld [vmem:[#allocation7 + $0x1b0] sm:$0xff]  }
 0x1e9   : > { %2773 = vmatprep.mubr.bf16.mxu0 %v1325_v14 }
 0x1f0   : > { %2774 = vmatmul.mubr.bf16.gmra.mrb[56].mxu0 %v1324_v11  ;;  %v1639_v11 = vld [vmem:[%s9303_s25 + $0x46] sm:$0xff] }
 0x1f1   : > { %2781 = vmatprep.mubr.bf16.mxu0 %v1326_v17 }
 0x1f8   : > { %2782 = vmatmul.mubr.bf16.gmra.mrb[60].mxu0 %v1325_v14  ;;  %v1673_v14 = vpack.c.bf16 %v1640_v12, %v1639_v11 }
 0x1f9   : > { %2789 = vmatprep.mubr.bf16.mxu0 %v1327_v20 }
 0x1fa   : > { %7751 = vmatprep.mubr.bf16.mxu1 %v1673_v14  ;;  %v1651_v14 = vld [vmem:[%s9303_s25 + $0xa6] sm:$0xff] }
 0x1fb   : > { %7752 = vmatmul.mubr.bf16.gmra.mrb[4].mxu1 %v1674_v19  ;;  %v1654_v19 = vld [vmem:[%s9303_s25 + $0xbe] sm:$0xff] }
 0x200   : > { %2790 = vmatmul.mubr.bf16.gmra.mrb[64].mxu0 %v1326_v17  ;;  %v1429_v17 = vld [vmem:[%s9303_s25 + $0x64] sm:$0xff] }
 0x201   : > { %2797 = vmatprep.mubr.bf16.mxu0 %v1328_v23  ;;  %v9532_v21 = vpack.c.bf16 %v1430_v18, %v1429_v17  ;;  %v1357_v23 = vld [vmem:[%s9303_s25 + $0x63] sm:$0xff]  ;;  %v1679_v17 = vpack.c.bf16 %v1652_v15, %v1651_v14  ;;  %v1653_v18 = vld [vmem:[%s9303_s25 + $0xb6] sm:$0xff] }
 0x202   : > { %v1379_v14 = vld [vmem:[%s9303_s25 + $0x113] sm:$0xff]  ;;  %v1663_v15 = vld [vmem:[%s9303_s25 + $0x106] sm:$0xff] }
 0x208   : > { %2798 = vmatmul.mubr.bf16.gmra.mrb[68].mxu0 %v1327_v20  ;;  %v1387_v20 = vpack.c.bf16 %v1356_v10, %v1355_v9  ;;  %v1439_v9 = vld [vmem:[%s9303_s25 + $0xb4] sm:$0xff]  ;;  %v1440_v10 = vld [vmem:[%s9303_s25 + $0xbc] sm:$0xff] }
 0x209   : > { %2838 = vmatprep.mubr.bf16.mxu0 %v1455_v29  ;;  %v1388_v29 = vpack.c.bf16 %v1358_v24, %v1357_v23  ;;  %v9583_v12 = vpack.c.bf16 %v1440_v10, %v1439_v9  ;;  %v1680_v23 = vpack.c.bf16 %v1654_v19, %v1653_v18  ;;  %v1451_v9 = vld [vmem:[%s9303_s25 + $0x114] sm:$0xff]  ;;  %v1452_v10 = vld [vmem:[%s9303_s25 + $0x11c] sm:$0xff] }
 0x20a   : > { %v1665_v19 = vld [vmem:[%s9303_s25 + $0x116] sm:$0xff] }
 0x210   : > { %2839 = vmatmul.mubr.bf16.vlgmr.msra.gmra.mrb[0].mxu0 %v1383_v0  ;;  %v8690_v0 = vld [vmem:[#allocation7 + $0x1d8] sm:$0xff]  }
 0x211   : > { %2984 = vmatpush1.bf16.msra.mxu0 %v8679_v36  ;;  %2846 = vmatprep.mubr.bf16.mxu0 %v9488_v37  ;;  %v1675_v36 = vpack.c.bf16 %v1644_v35, %v1643_v34  ;;  %v1371_v34 = vld [vmem:[%s9303_s25 + $0xd3] sm:$0xff]  ;;  %v1655_v35 = vld [vmem:[%s9303_s25 + $0xc6] sm:$0xff] }
 0x212   : > { %2985 = vmatprep.subr.bf16.mxu0 %v9432_v25 }
 0x213   : > { %7755 = vmatprep.mubr.bf16.mxu1 %v1675_v36  ;;  %v1372_v36 = vld [vmem:[%s9303_s25 + $0xdb] sm:$0xff] }
 0x215   : > { %2986 = vmatpush1.bf16.msra.mxu0 %v8680_v42  ;;  %v1676_v42 = vpack.c.bf16 %v1646_v39, %v1645_v38  ;;  %v1657_v39 = vld [vmem:[%s9303_s25 + $0xd6] sm:$0xff] }
 0x216   : > { %2987 = vmatprep.subr.bf16.mxu0 %v9432_v25 }
 0x217   : > { %7756 = vmatmul.mubr.bf16.gmra.mrb[8].mxu1 %v1676_v42  ;;  %v1446_v42 = vld [vmem:[%s9303_s25 + $0xec] sm:$0xff] }
 0x218   : > { %2847 = vmatmul.mubr.bf16.gmra.mrb[4].mxu0 %v1384_v45  ;;  %v8691_v45 = vld [vmem:[#allocation7 + $0x1e0] sm:$0xff]  }
 0x219   : > { %2854 = vmatprep.mubr.bf16.mxu0 %v9496_v46  ;;  %2988 = vmatpush1.bf16.msra.mxu0 %v8681_v47  ;;  %v1361_v47 = vld [vmem:[%s9303_s25 + $0x83] sm:$0xff] }
 0x21a   : > { %2989 = vmatprep.subr.bf16.mxu0 %v9432_v25 }
 0x21d   : > { %2990 = vmatpush1.bf16.msra.mxu0 %v8682_v52  ;;  %v1390_v52 = vpack.c.bf16 %v1362_v48, %v1361_v47  ;;  %v9612_v47 = vpack.c.bf16 %v1446_v42, %v1445_v41  ;;  %v1373_v48 = vld [vmem:[%s9303_s25 + $0xe3] sm:$0xff]  ;;  %v1565_v42 = vld [vmem:[%s9303_s25 + $0x35] sm:$0xff] }
 0x21e   : > { %2991 = vmatprep.subr.bf16.mxu0 %v9432_v25  ;;  %v1670_v41 = vld [vmem:[%s9303_s25 + $0x13e] sm:$0xff] }
 0x220   : > { %2855 = vmatmul.mubr.bf16.gmra.mrb[8].mxu0 %v1385_v58  ;;  %v1648_v58 = vld [vmem:[%s9303_s25 + $0x8e] sm:$0xff] }
 0x221   : > { %2862 = vmatprep.mubr.bf16.mxu0 %v9509_v61  ;;  %2992 = vmatpush1.bf16.msra.mxu0 %v8683_v62  ;;  %v1677_v60 = vpack.c.bf16 %v1648_v58, %v1647_v57  ;;  %v1649_v62 = vld [vmem:[%s9303_s25 + $0x96] sm:$0xff]  ;;  %v1660_v57 = vld [vmem:[%s9303_s25 + $0xee] sm:$0xff] }
 0x222   : > { %2993 = vmatprep.subr.bf16.mxu0 %v9432_v25  ;;  %v1376_v58 = vld [vmem:[%s9303_s25 + $0xfb] sm:$0xff] }
 0x223   : > { %7759 = vmatprep.mubr.bf16.mxu1 %v1677_v60  ;;  %v1661_v60 = vld [vmem:[%s9303_s25 + $0xf6] sm:$0xff] }
 0x225   : > { %2994 = vmatpush1.bf16.msra.mxu0 %v8684_v3  ;;  %v1678_v3 = vpack.c.bf16 %v1650_v63, %v1649_v62  ;;  %v1662_v62 = vld [vmem:[%s9303_s25 + $0xfe] sm:$0xff] }
 0x226   : > { %2995 = vmatprep.subr.bf16.mxu0 %v9432_v25  ;;  %v1449_v63 = vld [vmem:[%s9303_s25 + $0x104] sm:$0xff]  ;;  %v1684_v2 = vpack.c.bf16 %v1662_v62, %v1661_v60 }
 0x227   : > { %7760 = vmatmul.mubr.bf16.gmra.mrb[12].mxu1 %v1678_v3  ;;  %v1397_v3 = vpack.c.bf16 %v1376_v58, %v1375_v55  ;;  %v1569_v55 = vld [vmem:[%s9303_s25 + $0x55] sm:$0xff]  ;;  %v8706_v60 = vld [vmem:[#allocation9 + $0x18] sm:$0xff]  }
 0x228   : > { %2863 = vmatmul.mubr.bf16.gmra.mrb[12].mxu0 %v1386_v6  ;;  %v1365_v6 = vld [vmem:[%s9303_s25 + $0xa3] sm:$0xff]  ;;  %7763 = vmatprep.mubr.bf16.mxu1 %v1679_v17  ;;  %v1380_v17 = vld [vmem:[%s9303_s25 + $0x11b] sm:$0xff] }
 0x229   : > { %2870 = vmatprep.mubr.bf16.mxu0 %v9519_v7  ;;  %2996 = vmatpush1.bf16.msra.mxu0 %v8685_v8  ;;  %v1366_v8 = vld [vmem:[%s9303_s25 + $0xab] sm:$0xff]  ;;  %v1399_v27 = vpack.c.bf16 %v1380_v17, %v1379_v14  ;;  %v1578_v14 = vld [vmem:[%s9303_s25 + $0x9d] sm:$0xff] }
 0x22a   : > { %2997 = vmatprep.subr.bf16.mxu0 %v9432_v25  ;;  %v1392_v11 = vpack.c.bf16 %v1366_v8, %v1365_v6  ;;  %v1377_v6 = vld [vmem:[%s9303_s25 + $0x103] sm:$0xff]  ;;  %v1378_v8 = vld [vmem:[%s9303_s25 + $0x10b] sm:$0xff] }
 0x22b   : > { %v1580_v17 = vld [vmem:[%s9303_s25 + $0xad] sm:$0xff] }
 0x22d   : > { %2998 = vmatpush1.bf16.msra.mxu0 %v8686_v13  ;;  %v1367_v13 = vld [vmem:[%s9303_s25 + $0xb3] sm:$0xff] }
 0x22e   : > { %2999 = vmatprep.subr.bf16.mxu0 %v9432_v25  ;;  %v1393_v24 = vpack.c.bf16 %v1368_v16, %v1367_v13  ;;  %v9637_v13 = vpack.c.bf16 %v1452_v10, %v1451_v9  ;;  %v1664_v16 = vld [vmem:[%s9303_s25 + $0x10e] sm:$0xff] }
 0x22f   : > { %7764 = vmatmul.mubr.bf16.gmra.mrb[16].mxu1 %v1680_v23  ;;  %v1685_v18 = vpack.c.bf16 %v1664_v16, %v1663_v15  ;;  %v1454_v23 = vld [vmem:[%s9303_s25 + $0x12c] sm:$0xff] }
 0x230   : > { %2871 = vmatmul.mubr.bf16.gmra.mrb[16].mxu0 %v1387_v20  ;;  %v1441_v20 = vld [vmem:[%s9303_s25 + $0xc4] sm:$0xff]  ;;  %v1576_v9 = vld [vmem:[%s9303_s25 + $0x8d] sm:$0xff] }
 0x231   : > { %2878 = vmatprep.mubr.bf16.mxu0 %v9532_v21  ;;  %3000 = vmatpush1.bf16.msra.mxu0 %v8687_v22  ;;  %v1442_v22 = vld [vmem:[%s9303_s25 + $0xcc] sm:$0xff] }
 0x232   : > { %3001 = vmatprep.subr.bf16.mxu0 %v9432_v25  ;;  %v1579_v16 = vld [vmem:[%s9303_s25 + $0xa5] sm:$0xff] }
 0x235   : > { %3002 = vmatpush1.bf16.msra.mxu0 %v8688_v26  ;;  %v9594_v26 = vpack.c.bf16 %v1442_v22, %v1441_v20  ;;  %v1666_v20 = vld [vmem:[%s9303_s25 + $0x11e] sm:$0xff] }
 0x236   : > { %3003 = vmatprep.subr.bf16.mxu0 %v9432_v25  ;;  %v1453_v22 = vld [vmem:[%s9303_s25 + $0x124] sm:$0xff] }
 0x237   : > { %v9648_v28 = vpack.c.bf16 %v1454_v23, %v1453_v22  ;;  %v1583_v22 = vld [vmem:[%s9303_s25 + $0xc5] sm:$0xff]  ;;  %v1584_v23 = vld [vmem:[%s9303_s25 + $0xcd] sm:$0xff] }
 0x238   : > { %2879 = vmatmul.mubr.bf16.gmra.mrb[20].mxu0 %v1388_v29  ;;  %v1443_v29 = vld [vmem:[%s9303_s25 + $0xd4] sm:$0xff] }
 0x239   : > { %2886 = vmatprep.mubr.bf16.mxu0 %v9541_v30  ;;  %3004 = vmatpush1.bf16.msra.mxu0 %v8689_v31  ;;  %v1444_v31 = vld [vmem:[%s9303_s25 + $0xdc] sm:$0xff] }
 0x23a   : > { %3005 = vmatprep.subr.bf16.mxu0 %v9432_v25  ;;  %v9601_v33 = vpack.c.bf16 %v1444_v31, %v1443_v29  ;;  %v1381_v29 = vld [vmem:[%s9303_s25 + $0x123] sm:$0xff]  ;;  %v1382_v31 = vld [vmem:[%s9303_s25 + $0x12b] sm:$0xff] }
 0x23d   : > { %3006 = vmatpush1.bf16.msra.mxu0 %v8690_v0  ;;  %v1656_v0 = vld [vmem:[%s9303_s25 + $0xce] sm:$0xff] }
 0x23e   : > { %3007 = vmatprep.subr.bf16.mxu0 %v9432_v25  ;;  %v1681_v38 = vpack.c.bf16 %v1656_v0, %v1655_v35  ;;  %v1400_v35 = vpack.c.bf16 %v1382_v31, %v1381_v29  ;;  %v1588_v31 = vld [vmem:[%s9303_s25 + $0xed] sm:$0xff] }
 0x240   : > { %2887 = vmatmul.mubr.bf16.gmra.mrb[24].mxu0 %v1389_v43  ;;  %v1682_v43 = vpack.c.bf16 %v1658_v40, %v1657_v39  ;;  %7767 = vmatprep.mubr.bf16.mxu1 %v1681_v38  ;;  %v1668_v38 = vld [vmem:[%s9303_s25 + $0x12e] sm:$0xff]  ;;  %v1669_v40 = vld [vmem:[%s9303_s25 + $0x136] sm:$0xff] }
 0x241   : > { %2894 = vmatprep.mubr.bf16.mxu0 %v9554_v44  ;;  %3008 = vmatpush1.bf16.msra.mxu0 %v8691_v45  ;;  %v1395_v45 = vpack.c.bf16 %v1372_v36, %v1371_v34  ;;  %v1564_v34 = vld [vmem:[%s9303_s25 + $0x2d] sm:$0xff] }
 0x242   : > { %3009 = vmatprep.subr.bf16.mxu0 %v9432_v25  ;;  %7768 = vmatmul.mubr.bf16.gmra.mrb[20].mxu1 %v1682_v43  ;;  %v1667_v36 = vld [vmem:[%s9303_s25 + $0x126] sm:$0xff]  ;;  %v1566_v43 = vld [vmem:[%s9303_s25 + $0x3d] sm:$0xff] }
 0x243   : > { %v1687_v39 = vpack.c.bf16 %v1668_v38, %v1667_v36  ;;  %v8713_v36 = vld [vmem:[#allocation9 + $0x50] sm:$0xff]  }
 0x244   : > { %v1590_v38 = vld [vmem:[%s9303_s25 + $0xfd] sm:$0xff] }
 0x245   : > { %3010 = vmatpush1.bf16.msra.mxu0 %v8694_v49  ;;  %v1374_v49 = vld [vmem:[%s9303_s25 + $0xeb] sm:$0xff] }
 0x246   : > { %3011 = vmatprep.subr.bf16.mxu0 %v9432_v25 }
 0x248   : > { %2895 = vmatmul.mubr.bf16.gmra.mrb[28].mxu0 %v1390_v52  ;;  %v1396_v52 = vpack.c.bf16 %v1374_v49, %v1373_v48  ;;  %v1600_v48 = vpack.c.bf16 %v1566_v43, %v1565_v42  ;;  %v1567_v49 = vld [vmem:[%s9303_s25 + $0x45] sm:$0xff]  ;;  %v1592_v43 = vld [vmem:[%s9303_s25 + $0x10d] sm:$0xff] }
 0x249   : > { %2902 = vmatprep.mubr.bf16.mxu0 %v9563_v53  ;;  %3012 = vmatpush1.bf16.msra.mxu0 %v8697_v54  ;;  %v9619_v54 = vpack.c.bf16 %v1448_v51, %v1447_v50  ;;  %v1568_v50 = vld [vmem:[%s9303_s25 + $0x4d] sm:$0xff] }
 0x24a   : > { %3013 = vmatprep.subr.bf16.mxu0 %v9432_v25  ;;  %v1601_v51 = vpack.c.bf16 %v1568_v50, %v1567_v49  ;;  %v8715_v42 = vld [vmem:[#allocation9 + $0x60] sm:$0xff]  }
 0x24d   : > { %3014 = vmatpush1.bf16.msra.mxu0 %v8700_v59  ;;  %v1683_v59 = vpack.c.bf16 %v1660_v57, %v1659_v56  ;;  %v1570_v56 = vld [vmem:[%s9303_s25 + $0x5d] sm:$0xff] }
 0x24e   : > { %v8704_v57 = vld [vmem:[#allocation9 + $0x8] sm:$0xff]   ;;  %v1602_v58 = vpack.c.bf16 %v1570_v56, %v1569_v55  ;;  %v8717_v55 = vld [vmem:[#allocation9 + $0x70] sm:$0xff]  }
 0x24f   : > { %7771 = vmatprep.mubr.bf16.mxu1 %v1683_v59  ;;  %v1571_v59 = vld [vmem:[%s9303_s25 + $0x65] sm:$0xff] }
 0x250   : > { %2903 = vmatmul.mubr.bf16.gmra.mrb[32].mxu0 %v1391_v4  ;;  %7772 = vmatmul.mubr.bf16.gmra.mrb[24].mxu1 %v1684_v2  ;;  %v9630_v4 = vpack.c.bf16 %v1450_v1, %v1449_v63  ;;  %v8707_v63 = vld [vmem:[#allocation9 + $0x20] sm:$0xff]   ;;  %v1574_v2 = vld [vmem:[%s9303_s25 + $0x7d] sm:$0xff] }
 0x251   : > { %2910 = vmatprep.mubr.bf16.mxu0 %v9576_v5  ;;  %7775 = vmatprep.mubr.bf16.mxu1 %v1685_v18  ;;  %v1573_v1 = vld [vmem:[%s9303_s25 + $0x75] sm:$0xff]  ;;  %v1607_v18 = vpack.c.bf16 %v1580_v17, %v1579_v16 }
 0x252   : > { %v8721_v56 = vld [vmem:[#allocation9 + $0x210] sm:$0xff]  }
 0x258   : > { %2911 = vmatmul.mubr.bf16.gmra.mrb[36].mxu0 %v1392_v11  ;;  %v1398_v11 = vpack.c.bf16 %v1378_v8, %v1377_v6  ;;  %v8709_v6 = vld [vmem:[#allocation9 + $0x30] sm:$0xff]  }
 0x259   : > { %2918 = vmatprep.mubr.bf16.mxu0 %v9583_v12  ;;  %v1575_v8 = vld [vmem:[%s9303_s25 + $0x85] sm:$0xff] }
 0x25a   : > { %v1605_v10 = vpack.c.bf16 %v1576_v9, %v1575_v8  ;;  %v1597_v8 = vld [vmem:[%s9303_s25 + $0x135] sm:$0xff]  ;;  %v1598_v9 = vld [vmem:[%s9303_s25 + $0x13d] sm:$0xff] }
 0x260   : > { %2919 = vmatmul.mubr.bf16.gmra.mrb[40].mxu0 %v1393_v24  ;;  %v1686_v24 = vpack.c.bf16 %v1666_v20, %v1665_v19  ;;  %v1582_v19 = vld [vmem:[%s9303_s25 + $0xbd] sm:$0xff] }
 0x261   : > { %2926 = vmatprep.mubr.bf16.mxu0 %v9594_v26 }
 0x262   : > { %7776 = vmatmul.mubr.bf16.gmra.mrb[28].mxu1 %v1686_v24  ;;  %v1585_v24 = vld [vmem:[%s9303_s25 + $0xd5] sm:$0xff] }
 0x263   : > { %7779 = vmatprep.mubr.bf16.mxu1 %v1687_v39  ;;  %v9715_v39 = vld [vmem:[#allocation2] sm:$0xff] }
 0x264   : > { %12814 = vst [vmem:[#allocation20_spill] sm:$0xff] %v9715_v39 }
 0x268   : > { %2927 = vmatmul.mubr.bf16.gmra.mrb[44].mxu0 %v1394_v32  ;;  %v1563_v32 = vld [vmem:[%s9303_s25 + $0x25] sm:$0xff] }
 0x269   : > { %2934 = vmatprep.mubr.bf16.mxu0 %v9601_v33  ;;  %v1599_v0 = vpack.c.bf16 %v1564_v34, %v1563_v32 }
 0x270   : > { %2935 = vmatmul.mubr.bf16.gmra.mrb[48].mxu0 %v1395_v45  ;;  %v1688_v45 = vpack.c.bf16 %v1670_v41, %v1669_v40  ;;  %v8714_v40 = vld [vmem:[#allocation9 + $0x58] sm:$0xff]  }
 0x271   : > { %2942 = vmatprep.mubr.bf16.mxu0 %v9612_v47 }
 0x272   : > { %7780 = vmatmul.mubr.bf16.gmra.mrb[32].mxu1 %v1688_v45  ;;  %v8716_v45 = vld [vmem:[#allocation9 + $0x68] sm:$0xff]  }
 0x278   : > { %2943 = vmatmul.mubr.bf16.gmra.mrb[52].mxu0 %v1396_v52  ;;  %v8703_v52 = vld [vmem:[#allocation9] sm:$0xff]  }
 0x279   : > { %2950 = vmatprep.mubr.bf16.mxu0 %v9619_v54  ;;  %6030 = vmatpush1.bf16.msra.mxu1 %v8703_v52 }
 0x27a   : > { %6031 = vmatprep.subr.bf16.mxu1 %v9432_v25 }
 0x27d   : > { %6032 = vmatpush1.bf16.msra.mxu1 %v8704_v57  ;;  %v1593_v57 = vld [vmem:[%s9303_s25 + $0x115] sm:$0xff] }
 0x27e   : > { %6033 = vmatprep.subr.bf16.mxu1 %v9432_v25 }
 0x280   : > { %2951 = vmatmul.mubr.bf16.gmra.mrb[56].mxu0 %v1397_v3  ;;  %v1604_v3 = vpack.c.bf16 %v1574_v2, %v1573_v1  ;;  %v8726_v1 = vld [vmem:[#allocation9 + $0x228] sm:$0xff]  }
 0x281   : > { %2958 = vmatprep.mubr.bf16.mxu0 %v9630_v4 }
 0x288   : > { %2959 = vmatmul.mubr.bf16.gmra.mrb[60].mxu0 %v1398_v11  ;;  %v8711_v11 = vld [vmem:[#allocation9 + $0x40] sm:$0xff]  }
 0x289   : > { %2966 = vmatprep.mubr.bf16.mxu0 %v9637_v13 }
 0x290   : > { %2967 = vmatmul.mubr.bf16.gmra.mrb[64].mxu0 %v1399_v27  ;;  %v1586_v27 = vld [vmem:[%s9303_s25 + $0xdd] sm:$0xff] }
 0x291   : > { %2974 = vmatprep.mubr.bf16.mxu0 %v9648_v28  ;;  %v1610_v29 = vpack.c.bf16 %v1586_v27, %v1585_v24 }
 0x298   : > { %2975 = vmatmul.mubr.bf16.gmra.mrb[68].mxu0 %v1400_v35 }
 0x299   : > { %3015 = vmatprep.mubr.bf16.mxu0 %v1599_v0 }
 0x29e   : > { %v9703_v32 = vpop.f32.mrb[0].mxu1 }
 0x29f   : > { %v9705_v34 = vpop.f32.mrb[1].mxu1 }
 0x2a0   : > { %3016 = vmatmul.mubr.bf16.vlgmr.msra.gmra.mrb[0].mxu0 %v9488_v37  ;;  %v8705_v37 = vld [vmem:[#allocation9 + $0x10] sm:$0xff]   ;;  %v9707_v35 = vpop.f32.mrb[2].mxu1 }
 0x2a1   : > { %3023 = vmatprep.mubr.bf16.mxu0 %v1600_v48  ;;  %6034 = vmatpush1.bf16.msra.mxu1 %v8705_v37  ;;  %v8720_v48 = vld [vmem:[#allocation9 + $0x208] sm:$0xff]   ;;  %v8719_v37 = vld [vmem:[#allocation9 + $0x78] sm:$0xff]  }
 0x2a2   : > { %6035 = vmatprep.subr.bf16.mxu1 %v9432_v25 }
 0x2a5   : > { %6036 = vmatpush1.bf16.msra.mxu1 %v8706_v60  ;;  %v1595_v60 = vld [vmem:[%s9303_s25 + $0x125] sm:$0xff] }
 0x2a6   : > { %6037 = vmatprep.subr.bf16.mxu1 %v9432_v25 }
 0x2a8   : > { %3024 = vmatmul.mubr.bf16.gmra.mrb[4].mxu0 %v9496_v46  ;;  %v1572_v46 = vld [vmem:[%s9303_s25 + $0x6d] sm:$0xff] }
 0x2a9   : > { %3031 = vmatprep.mubr.bf16.mxu0 %v1601_v51  ;;  %v1603_v62 = vpack.c.bf16 %v1572_v46, %v1571_v59  ;;  %6038 = vmatpush1.bf16.msra.mxu1 %v8707_v63  ;;  %v8723_v59 = vld [vmem:[#allocation9 + $0x218] sm:$0xff]  }
 0x2aa   : > { %6039 = vmatprep.subr.bf16.mxu1 %v9432_v25 }
 0x2b0   : > { %3032 = vmatmul.mubr.bf16.gmra.mrb[8].mxu0 %v9509_v61  ;;  %v8708_v61 = vld [vmem:[#allocation9 + $0x28] sm:$0xff]  }
 0x2b1   : > { %3039 = vmatprep.mubr.bf16.mxu0 %v1602_v58  ;;  %6040 = vmatpush1.bf16.msra.mxu1 %v8708_v61  ;;  %v1594_v58 = vld [vmem:[%s9303_s25 + $0x11d] sm:$0xff] }
 0x2b2   : > { %6041 = vmatprep.subr.bf16.mxu1 %v9432_v25  ;;  %v1614_v46 = vpack.c.bf16 %v1594_v58, %v1593_v57 }
 0x2b5   : > { %6042 = vmatpush1.bf16.msra.mxu1 %v8709_v6  ;;  %v8727_v6 = vld [vmem:[#allocation9 + $0x230] sm:$0xff]  }
 0x2b6   : > { %6043 = vmatprep.subr.bf16.mxu1 %v9432_v25 }
 0x2b8   : > { %3040 = vmatmul.mubr.bf16.gmra.mrb[12].mxu0 %v9519_v7  ;;  %v8710_v7 = vld [vmem:[#allocation9 + $0x38] sm:$0xff]  }
 0x2b9   : > { %3047 = vmatprep.mubr.bf16.mxu0 %v1603_v62  ;;  %6044 = vmatpush1.bf16.msra.mxu1 %v8710_v7  ;;  %v1596_v62 = vld [vmem:[%s9303_s25 + $0x12d] sm:$0xff]  ;;  %v1616_v7 = vpack.c.bf16 %v1598_v9, %v1597_v8 }
 0x2ba   : > { %6045 = vmatprep.subr.bf16.mxu1 %v9432_v25  ;;  %v1615_v2 = vpack.c.bf16 %v1596_v62, %v1595_v60 }
 0x2bd   : > { %6046 = vmatpush1.bf16.msra.mxu1 %v8711_v11  ;;  %v1525_v11 = vld [vmem:[%s9303_s25 + $0x134] sm:$0xff] }
 0x2be   : > { %6047 = vmatprep.subr.bf16.mxu1 %v9432_v25 }
 0x2c0   : > { %3048 = vmatmul.mubr.bf16.gmra.mrb[16].mxu0 %v9532_v21  ;;  %v1577_v21 = vld [vmem:[%s9303_s25 + $0x95] sm:$0xff] }
 0x2c1   : > { %3055 = vmatprep.mubr.bf16.mxu0 %v1604_v3  ;;  %v1606_v15 = vpack.c.bf16 %v1578_v14, %v1577_v21  ;;  %v1526_v21 = vld [vmem:[%s9303_s25 + $0x13c] sm:$0xff] }
 0x2c2   : > { %v1544_v14 = vpack.c.bf16 %v1526_v21, %v1525_v11 }
 0x2c8   : > { %3056 = vmatmul.mubr.bf16.gmra.mrb[20].mxu0 %v9541_v30  ;;  %v1581_v30 = vld [vmem:[%s9303_s25 + $0xb5] sm:$0xff] }
 0x2c9   : > { %3063 = vmatprep.mubr.bf16.mxu0 %v1605_v10  ;;  %v1608_v20 = vpack.c.bf16 %v1582_v19, %v1581_v30  ;;  %v8729_v10 = vld [vmem:[#allocation9 + $0x238] sm:$0xff]  }
 0x2d0   : > { %3064 = vmatmul.mubr.bf16.gmra.mrb[24].mxu0 %v9554_v44  ;;  %v1609_v44 = vpack.c.bf16 %v1584_v23, %v1583_v22 }
 0x2d1   : > { %3071 = vmatprep.mubr.bf16.mxu0 %v1606_v15 }
 0x2d8   : > { %3072 = vmatmul.mubr.bf16.gmra.mrb[28].mxu0 %v9563_v53  ;;  %v1587_v53 = vld [vmem:[%s9303_s25 + $0xe5] sm:$0xff] }
 0x2d9   : > { %3079 = vmatprep.mubr.bf16.mxu0 %v1607_v18  ;;  %v1611_v0 = vpack.c.bf16 %v1588_v31, %v1587_v53  ;;  %v410_v18 = vlaneseq }
 0x2db   : > { %v9762_v30 = vshrl.u32 %v410_v18, 7 }
 0x2dd   : > { %12825 = vst [vmem:[#allocation31_spill] sm:$0xff] %v9762_v30  ;;  %v412_v19 = vadd.s32 8, %v9762_v30  ;;  %v9831_v11 = vadd.s32 64, %v9762_v30 }
 0x2e0   : > { %3080 = vmatmul.mubr.bf16.gmra.mrb[32].mxu0 %v9576_v5  ;;  %v8712_v5 = vld [vmem:[#allocation9 + $0x48] sm:$0xff]  }
 0x2e1   : > { %3087 = vmatprep.mubr.bf16.mxu0 %v1608_v20  ;;  %6048 = vmatpush1.bf16.msra.mxu1 %v8712_v5  ;;  %v9767_v20 = vmul.u32.u64.low 3817748708, %v9762_v30  ;;  %v9768_v22 = vmul.u32.u64.high 3817748708, %v9762_v30, %v9767_v20 }
 0x2e2   : > { %6049 = vmatprep.subr.bf16.mxu1 %v9432_v25  ;;  %v8718_v25 = vld [vmem:[#allocation9 + $0x200] sm:$0xff]  }
 0x2e3   : > { %7783 = vmatprep.subr.bf16.mxu0 %v8718_v25 }
 0x2e4   : > { %7784 = vmatpush3.bf16.msra.mxu0 %v8718_v25 }
 0x2e5   : > { %6050 = vmatpush1.bf16.msra.mxu1 %v8713_v36  ;;  %7785 = vmatprep.subr.bf16.mxu0 %v8720_v48  ;;  %v415_v36 = vadd.s32 32, %v9762_v30 }
 0x2e6   : > { %6051 = vmatprep.subr.bf16.mxu1 %v9715_v39 }
 0x2e8   : > { %3088 = vmatmul.mubr.bf16.gmra.mrb[36].mxu0 %v9583_v12  ;;  %v9709_v12 = vpop.f32.mrb[3].mxu1 }
 0x2e9   : > { %3095 = vmatprep.mubr.bf16.mxu0 %v1609_v44  ;;  %6052 = vmatpush1.bf16.msra.mxu1 %v8714_v40  ;;  %v9723_v49 = vpop.f32.mrb[4].mxu1  ;;  %v9772_v44 = vmul.u32.u64.low 3817748708, %v412_v19  ;;  %v9773_v24 = vmul.u32.u64.high 3817748708, %v412_v19, %v9772_v44 }
 0x2ea   : > { %6053 = vmatprep.subr.bf16.mxu1 %v9715_v39  ;;  %12815 = vst [vmem:[#allocation21_spill] sm:$0xff] %v9723_v49  ;;  %v9725_v51 = vpop.f32.mrb[5].mxu1  ;;  %7786 = vmatpush3.bf16.msra.mxu0 %v8720_v48 }
 0x2eb   : > { %7787 = vmatprep.subr.bf16.mxu0 %v8721_v56 }
 0x2ed   : > { %6054 = vmatpush1.bf16.msra.mxu1 %v8715_v42  ;;  %v464_v42 = vshrl.u32 %v9773_v24, 4  ;;  %v12906_v24 = vmov 0 }
 0x2ee   : > { %6055 = vmatprep.subr.bf16.mxu1 %v9715_v39  ;;  %7788 = vmatpush3.bf16.msra.mxu0 %v8721_v56  ;;  %v9803_v56 = vadd.s32 56, %v9762_v30 }
 0x2ef   : > { %7789 = vmatprep.subr.bf16.mxu0 %v8723_v59  ;;  %v465_v57 = vmul.u32 18, %v464_v42 }
 0x2f0   : > { %3096 = vmatmul.mubr.bf16.gmra.mrb[40].mxu0 %v9594_v26  ;;  %v1589_v26 = vld [vmem:[%s9303_s25 + $0xf5] sm:$0xff] }
 0x2f1   : > { %3103 = vmatprep.mubr.bf16.mxu0 %v1610_v29  ;;  %v1612_v41 = vpack.c.bf16 %v1590_v38, %v1589_v26  ;;  %6056 = vmatpush1.bf16.msra.mxu1 %v8716_v45  ;;  %v416_v26 = vadd.s32 40, %v9762_v30  ;;  %v453_v38 = vshrl.u32 %v9768_v22, 4 }
 0x2f2   : > { %6057 = vmatprep.subr.bf16.mxu1 %v9715_v39  ;;  %7790 = vmatpush3.bf16.msra.mxu0 %v8723_v59 }
 0x2f3   : > { %v9796_v45 = vmul.u32.u64.low 3817748708, %v416_v26  ;;  %v9797_v48 = vmul.u32.u64.high 3817748708, %v416_v26, %v9796_v45 }
 0x2f5   : > { %6058 = vmatpush1.bf16.msra.mxu1 %v8717_v55  ;;  %v454_v55 = vmul.u32 18, %v453_v38 }
 0x2f6   : > { %6059 = vmatprep.subr.bf16.mxu1 %v9715_v39 }
 0x2f8   : > { %3104 = vmatmul.mubr.bf16.gmra.mrb[44].mxu0 %v9601_v33  ;;  %v1591_v33 = vld [vmem:[%s9303_s25 + $0x105] sm:$0xff] }
 0x2f9   : > { %3111 = vmatprep.mubr.bf16.mxu0 %v1611_v0  ;;  %v1613_v50 = vpack.c.bf16 %v1592_v43, %v1591_v33  ;;  %6060 = vmatpush1.bf16.msra.mxu1 %v8719_v37  ;;  %v414_v0 = vadd.s32 24, %v9762_v30  ;;  %v9792_v25 = vmul.u32.u64.low 3817748708, %v415_v36  ;;  %v9793_v33 = vmul.u32.u64.high 3817748708, %v415_v36, %v9792_v25 }
 0x2fa   : > { %6206 = vmatprep.subr.bf16.mxu1 %v9715_v39 }
 0x300   : > { %3112 = vmatmul.mubr.bf16.gmra.mrb[48].mxu0 %v9612_v47  ;;  %v9727_v47 = vpop.f32.mrb[6].mxu1 }
 0x301   : > { %3119 = vmatprep.mubr.bf16.mxu0 %v1612_v41  ;;  %12816 = vst [vmem:[#allocation22_spill] sm:$0xff] %v9727_v47  ;;  %v9730_v52 = vpop.f32.mrb[7].mxu1  ;;  %v9788_v40 = vmul.u32.u64.low 3817748708, %v414_v0  ;;  %v9789_v41 = vmul.u32.u64.high 3817748708, %v414_v0, %v9788_v40 }
 0x302   : > { %v9740_v63 = vpop.f32.mrb[8].mxu1  ;;  %v9862_v40 = vadd.s32 80, %v9762_v30 }
 0x303   : > { %12817 = vst [vmem:[#allocation23_spill] sm:$0xff] %v9740_v63  ;;  %v9742_v61 = vpop.f32.mrb[9].mxu1  ;;  %v486_v62 = vshrl.u32 %v9789_v41, 4 }
 0x304   : > { %12818 = vst [vmem:[#allocation24_spill] sm:$0xff] %v9742_v61  ;;  %v9744_v3 = vpop.f32.mrb[10].mxu1 }
 0x305   : > { %12819 = vst [vmem:[#allocation25_spill] sm:$0xff] %v9744_v3  ;;  %v487_v18 = vmul.u32 18, %v486_v62 }
 0x307   : > { %v9871_v25 = vsub.s32 %v414_v0, %v487_v18  ;;  %v3595_v18 = vld [vmem:[#allocation2] sm:$0xfc] }
 0x308   : > { %3120 = vmatmul.mubr.bf16.gmra.mrb[52].mxu0 %v9619_v54  ;;  %v8724_v54 = vld [vmem:[#allocation9 + $0x220] sm:$0xff]  }
 0x309   : > { %3127 = vmatprep.mubr.bf16.mxu0 %v1613_v50  ;;  %7791 = vmatprep.subr.bf16.mxu0 %v8724_v54  ;;  %v9800_v50 = vadd.s32 48, %v9762_v30  ;;  %vm846_vm9 = vcmp.ne.s32.totalorder %v9871_v25, 0  ;;  %vm882_vm10 = vcmp.lt.s32.totalorder %v9871_v25, 0  ;;  %v9910_v62 = vadd.s32 18, %v9871_v25 }
 0x30a   : > { %7792 = vmatpush3.bf16.msra.mxu0 %v8724_v54  ;;  %v9813_v54 = vmul.u32.u64.low 3817748708, %v9803_v56  ;;  %v9814_v60 = vmul.u32.u64.high 3817748708, %v9803_v56, %v9813_v54 }
 0x30b   : > { %7793 = vmatprep.subr.bf16.mxu0 %v8726_v1  ;;  %v9806_v37 = vmul.u32.u64.low 3817748708, %v9800_v50  ;;  %v9807_v59 = vmul.u32.u64.high 3817748708, %v9800_v50, %v9806_v37 }
 0x30d   : > { %v519_v44 = vshrl.u32 %v9807_v59, 4  ;;  %v9893_v59 = vmul.u32.u64.low 3817748708, %v9862_v40  ;;  %v9894_v54 = vmul.u32.u64.high 3817748708, %v9862_v40, %v9893_v59 }
 0x30e   : > { %7794 = vmatpush3.bf16.msra.mxu0 %v8726_v1  ;;  %v9938_v59 = vadd.s32 112, %v9762_v30 }
 0x30f   : > { %7795 = vmatprep.subr.bf16.mxu0 %v8727_v6 }
 0x310   : > { %3128 = vmatmul.mubr.bf16.gmra.mrb[56].mxu0 %v9630_v4  ;;  %v9746_v4 = vpop.f32.mrb[11].mxu1 }
 0x311   : > { %3135 = vmatprep.mubr.bf16.mxu0 %v1614_v46  ;;  %12820 = vst [vmem:[#allocation26_spill] sm:$0xff] %v9746_v4  ;;  %v9754_v15 = vpop.f32.mrb[12].mxu1  ;;  %v9810_v46 = vsub.s32 %v9762_v30, %v454_v55 }
 0x312   : > { %7796 = vmatpush3.bf16.msra.mxu0 %v8727_v6  ;;  %12821 = vst [vmem:[#allocation27_spill] sm:$0xff] %v9754_v15  ;;  %v9756_v16 = vpop.f32.mrb[13].mxu1  ;;  %v497_v6 = vshrl.u32 %v9793_v33, 4 }
 0x313   : > { %7797 = vmatprep.subr.bf16.mxu0 %v8729_v10  ;;  %12822 = vst [vmem:[#allocation28_spill] sm:$0xff] %v9756_v16  ;;  %vm843_vm0 = vcmp.ne.s32.totalorder %v9810_v46, 0  ;;  %vm879_vm1 = vcmp.lt.s32.totalorder %v9810_v46, 0 }
 0x314   : > { %v498_v20 = vmul.u32 18, %v497_v6  ;;  %vm9852_vm6 = vmand %vm879_vm1, %vm843_vm0  ;;  %v9914_v6 = vadd.s32 104, %v9762_v30 }
 0x315   : > { %vm9960_vm1 = vmand %vm882_vm10, %vm846_vm9 }
 0x316   : > { %7798 = vmatpush3.bf16.msra.mxu0 %v8729_v10 }
 0x318   : > { %3136 = vmatmul.mubr.bf16.gmra.mrb[60].mxu0 %v9637_v13  ;;  %v9758_v13 = vpop.f32.mrb[14].mxu1 }
 0x319   : > { %3143 = vmatprep.mubr.bf16.mxu0 %v1615_v2  ;;  %12823 = vst [vmem:[#allocation29_spill] sm:$0xff] %v9758_v13  ;;  %v9760_v17 = vpop.f32.mrb[15].mxu1  ;;  %v9819_v2 = vsub.s32 %v412_v19, %v465_v57  ;;  %v9840_v19 = vadd.s32 72, %v9762_v30  ;;  %v520_v57 = vmul.u32 18, %v519_v44 }
 0x31a   : > { %12824 = vst [vmem:[#allocation30_spill] sm:$0xff] %v9760_v17  ;;  %v9770_v23 = vpop.f32.mrb[16].mxu1 }
 0x31b   : > { %12826 = vst [vmem:[#allocation32_spill] sm:$0xff] %v9770_v23  ;;  %v9775_v27 = vpop.f32.mrb[17].mxu1  ;;  %vm844_vm2 = vcmp.ne.s32.totalorder %v9819_v2, 0  ;;  %vm880_vm3 = vcmp.lt.s32.totalorder %v9819_v2, 0 }
 0x31c   : > { %12827 = vst [vmem:[#allocation33_spill] sm:$0xff] %v9775_v27  ;;  %v9780_v31 = vpop.f32.mrb[18].mxu1  ;;  %vm9864_vm7 = vmand %vm880_vm3, %vm844_vm2 }
 0x31d   : > { %12828 = vst [vmem:[#allocation34_spill] sm:$0xff] %v9780_v31  ;;  %v9782_v5 = vpop.f32.mrb[19].mxu1  ;;  %v10010_v31 = vld [vmem:[#allocation2] sm:$0xf8] }
 0x31e   : > { %12829 = vst [vmem:[#allocation35_spill] sm:$0xff] %v9782_v5  ;;  %v9817_v1 = vpop.f32.mrb[20].mxu1  ;;  %12856 = vst [vmem:[#allocation48_spill] sm:$0xff] %v10010_v31 }
 0x31f   : > { %12830 = vst [vmem:[#allocation36_spill] sm:$0xff] %v9817_v1  ;;  %v9822_v8 = vpop.f32.mrb[21].mxu1 }
 0x320   : > { %3144 = vmatmul.mubr.bf16.gmra.mrb[64].mxu0 %v9648_v28  ;;  %v413_v28 = vadd.s32 16, %v9762_v30  ;;  %12831 = vst [vmem:[#allocation37_spill] sm:$0xff] %v9822_v8  ;;  %v9827_v10 = vpop.f32.mrb[22].mxu1 }
 0x321   : > { %3151 = vmatprep.mubr.bf16.mxu0 %v1616_v7  ;;  %v508_v7 = vshrl.u32 %v9797_v48, 4  ;;  %12832 = vst [vmem:[#allocation38_spill] sm:$0xff] %v9827_v10  ;;  %v9833_v21 = vpop.f32.mrb[23].mxu1  ;;  %v9881_v48 = vsub.s32 %v415_v36, %v498_v20  ;;  %v3619_v36 = vshll.u32 %v3595_v18, 16 }
 0x322   : > { %v9777_v29 = vmul.u32.u64.low 3817748708, %v413_v28  ;;  %v9778_v53 = vmul.u32.u64.high 3817748708, %v413_v28, %v9777_v29  ;;  %12833 = vst [vmem:[#allocation39_spill] sm:$0xff] %v9833_v21  ;;  %v9943_v55 = vmul.u32.u64.low 3817748708, %v9914_v6  ;;  %v9944_v10 = vmul.u32.u64.high 3817748708, %v9914_v6, %v9943_v55 }
 0x323   : > { %v509_v22 = vmul.u32 18, %v508_v7  ;;  %v530_v29 = vshrl.u32 %v9814_v60, 4  ;;  %vm847_vm11 = vcmp.ne.s32.totalorder %v9881_v48, 0  ;;  %vm883_vm12 = vcmp.lt.s32.totalorder %v9881_v48, 0 }
 0x324   : > { %v475_v43 = vshrl.u32 %v9778_v53, 4  ;;  %v9858_v53 = vmul.u32.u64.low 3817748708, %v9831_v11  ;;  %v9859_v38 = vmul.u32.u64.high 3817748708, %v9831_v11, %v9858_v53  ;;  %v9918_v7 = vsub.s32 %v9800_v50, %v520_v57 }
 0x325   : > { %v9890_v0 = vsub.s32 %v416_v26, %v509_v22  ;;  %v531_v37 = vmul.u32 18, %v530_v29  ;;  %v9906_v26 = vadd.s32 96, %v9762_v30  ;;  %v9925_v44 = vadd.s32 18, %v9881_v48 }
 0x326   : > { %v476_v58 = vmul.u32 18, %v475_v43  ;;  %v9874_v33 = vmul.u32.u64.low 3817748708, %v9840_v19  ;;  %v9875_v43 = vmul.u32.u64.high 3817748708, %v9840_v19, %v9874_v33  ;;  %12840 = vst [vmem:[#allocation40_spill] sm:$0xff] %v9918_v7  ;;  %v541_v53 = vshrl.u32 %v9859_v38, 4 }
 0x327   : > { %vm848_vm13 = vcmp.ne.s32.totalorder %v9890_v0, 0  ;;  %v9929_v29 = vsub.s32 %v9803_v56, %v531_v37  ;;  %v9934_v50 = vmul.u32.u64.low 3817748708, %v9906_v26  ;;  %v9935_v57 = vmul.u32.u64.high 3817748708, %v9906_v26, %v9934_v50 }
 0x328   : > { %3152 = vmatmul.mubr.bf16.gmra.mrb[68].mxu0 %v1544_v14  ;;  %v9824_v9 = vsub.s32 %v413_v28, %v476_v58  ;;  %v9837_v14 = vadd.s32 18, %v9810_v46  ;;  %v9845_v28 = vadd.s32 18, %v9819_v2  ;;  %v9888_v58 = vadd.s32 88, %v9762_v30 }
 0x329   : > { %12841 = vst [vmem:[#allocation41_spill] sm:$0xff] %v9929_v29  ;;  %v552_v33 = vshrl.u32 %v9875_v43, 4  ;;  %v3616_v60 = vshrl.u32 %v3595_v18, 16  ;;  %vm884_vm14 = vcmp.lt.s32.totalorder %v9890_v0, 0  ;;  %vm849_vm15 = vcmp.ne.s32.totalorder %v9918_v7, 0 }
 0x32a   : > { %vm845_vm4 = vcmp.ne.s32.totalorder %v9824_v9, 0  ;;  %vm881_vm5 = vcmp.lt.s32.totalorder %v9824_v9, 0  ;;  %v9869_v42 = vadd.s32 18, %v9824_v9  ;;  %vm885_vm0 = vcmp.lt.s32.totalorder %v9918_v7, 0 }
 0x32b   : > { %vm9877_vm8 = vmand %vm881_vm5, %vm845_vm4  ;;  %v9921_v20 = vmul.u32.u64.low 3817748708, %v9888_v58  ;;  %v9922_v22 = vmul.u32.u64.high 3817748708, %v9888_v58, %v9921_v20  ;;  %v9952_v38 = vadd.s32 120, %v9762_v30  ;;  %vm850_vm2 = vcmp.ne.s32.totalorder %v9929_v29, 0 }
 0x32c   : > { %v9940_v20 = vpop.f32.mrb[24].mxu1  ;;  %vm886_vm3 = vcmp.lt.s32.totalorder %v9929_v29, 0  ;;  %v542_v55 = vmul.u32 18, %v541_v53  ;;  %v563_v18 = vshrl.u32 %v9894_v54, 4  ;;  %vm9973_vm4 = vmand %vm883_vm12, %vm847_vm11  ;;  %v9982_v21 = vadd.s32 128, %v9762_v30 }
 0x32d   : > { %12842 = vst [vmem:[#allocation42_spill] sm:$0xff] %v9940_v20  ;;  %v9946_v56 = vpop.f32.mrb[25].mxu1  ;;  %v553_v20 = vmul.u32 18, %v552_v33  ;;  %vm9988_vm5 = vmand %vm884_vm14, %vm848_vm13  ;;  %v9993_v53 = vadd.s32 18, %v9890_v0  ;;  %v9996_v33 = vadd.s32 18, %v9918_v7  ;;  %v10013_v23 = vadd.s32 18, %v9929_v29 }
 0x32e   : > { %12843 = vst [vmem:[#allocation43_spill] sm:$0xff] %v9946_v56  ;;  %v9954_v43 = vpop.f32.mrb[26].mxu1  ;;  %v9978_v56 = vmul.u32.u64.low 3817748708, %v9938_v59  ;;  %v9979_v1 = vmul.u32.u64.high 3817748708, %v9938_v59, %v9978_v56  ;;  %vm10006_vm9 = vmand %vm885_vm0, %vm849_vm15  ;;  %v574_v5 = vshrl.u32 %v9922_v22, 4  ;;  %v12858_v22 = vmov 0 }
 0x32f   : > { %12844 = vst [vmem:[#allocation44_spill] sm:$0xff] %v9954_v43  ;;  %v9967_v50 = vpop.f32.mrb[27].mxu1  ;;  %v10000_v56 = vrot.slane %v3619_v36, 3  ;;  %12857 = vst [vmem:[#allocation49_spill] sm:$0xff] %v10013_v23  ;;  %v564_v15 = vmul.u32 18, %v563_v18  ;;  %v10040_v17 = vsub.s32 %v9840_v19, %v553_v20  ;;  %v585_v36 = vshrl.u32 %v9935_v57, 4 }
 0x330   : > { %12847 = vst [vmem:[#allocation45_spill] sm:$0xff] %v9967_v50  ;;  %v9998_v50 = vrot.slane %v3616_v60, 2  ;;  %v10017_v60 = vmul.u32.u64.low 3817748708, %v9952_v38  ;;  %v10018_v27 = vmul.u32.u64.high 3817748708, %v9952_v38, %v10017_v60  ;;  %vm10032_vm10 = vmand %vm886_vm3, %vm850_vm2  ;;  %v575_v57 = vmul.u32 18, %v574_v5  ;;  %v12974_v8 = vld [vmem:[#allocation41_spill] sm:$0xff] }
 0x331   : > { %12853 = vst [vmem:[#allocation47_spill] sm:$0xff] %v10000_v56  ;;  %v12859_v22 = vsel %vm10032_vm10, 4294967295, %v12858_v22  ;;  %v10037_v60 = vsub.s32 %v9831_v11, %v542_v55  ;;  %12861 = vst [vmem:[#allocation51_spill] sm:$0xff] %v10040_v17  ;;  %v10044_v16 = vmul.u32.u64.low 3817748708, %v9982_v21  ;;  %v10045_v13 = vmul.u32.u64.high 3817748708, %v9982_v21, %v10044_v16 }
 0x332   : > { %12852 = vst [vmem:[#allocation46_spill] sm:$0xff] %v9998_v50  ;;  %12860 = vst [vmem:[#allocation50_spill] sm:$0xff] %v12859_v22  ;;  %v596_v55 = vshrl.u32 %v9944_v10, 4  ;;  %v10064_v20 = vadd.s32 136, %v9762_v30  ;;  %v10069_v10 = vsub.s32 %v9862_v40, %v564_v15  ;;  %v10072_v18 = vadd.s32 144, %v9762_v30 }
 0x333   : > { %vm851_vm11 = vcmp.ne.s32.totalorder %v10037_v60, 0  ;;  %vm887_vm12 = vcmp.lt.s32.totalorder %v10037_v60, 0  ;;  %v10075_v11 = vadd.s32 18, %v10037_v60  ;;  %vm852_vm13 = vcmp.ne.s32.totalorder %v10040_v17, 0 }
 0x334   : > { %12862 = vst [vmem:[#allocation52_spill] sm:$0xff] %v10069_v10  ;;  %v586_v63 = vmul.u32 18, %v585_v36  ;;  %v607_v5 = vshrl.u32 %v9979_v1, 4  ;;  %vm888_vm14 = vcmp.lt.s32.totalorder %v10040_v17, 0  ;;  %v10081_v16 = vadd.s32 18, %v10040_v17  ;;  %vm10144_vm2 = vmand %vm887_vm12, %vm851_vm11 }
 0x335   : > { %v597_v19 = vmul.u32 18, %v596_v55  ;;  %v10084_v15 = vadd.s32 152, %v9762_v30  ;;  %v10087_v40 = vsub.s32 %v9888_v58, %v575_v57  ;;  %v618_v3 = vshrl.u32 %v10018_v27, 4  ;;  %v10107_v39 = vpop.f32.mrb[28].mxu1  ;;  %vm10159_vm0 = vmand %vm888_vm14, %vm852_vm13 }
 0x336   : > { %v10091_v4 = vmul.u32.u64.low 3817748708, %v10064_v20  ;;  %v10092_v61 = vmul.u32.u64.high 3817748708, %v10064_v20, %v10091_v4  ;;  %vm853_vm15 = vcmp.ne.s32.totalorder %v10069_v10, 0  ;;  %v10100_v55 = vadd.s32 160, %v9762_v30  ;;  %12865 = vst [vmem:[#allocation55_spill] sm:$0xff] %v10107_v39  ;;  %v10119_v56 = vpop.f32.mrb[29].mxu1 }
 0x337   : > { %12863 = vst [vmem:[#allocation53_spill] sm:$0xff] %v10087_v40  ;;  %v10096_v1 = vmul.u32.u64.low 3817748708, %v10072_v18  ;;  %v10097_v36 = vmul.u32.u64.high 3817748708, %v10072_v18, %v10096_v1  ;;  %v10104_v58 = vsub.s32 %v9906_v26, %v586_v63  ;;  %v608_v57 = vmul.u32 18, %v607_v5  ;;  %12867 = vst [vmem:[#allocation57_spill] sm:$0xff] %v10119_v56 }
 0x338   : > { %v629_v27 = vshrl.u32 %v10045_v13, 4  ;;  %v10110_v4 = vsub.s32 %v9914_v6, %v597_v19  ;;  %v10113_v47 = vmul.u32.u64.low 3817748708, %v10084_v15  ;;  %v10114_v50 = vmul.u32.u64.high 3817748708, %v10084_v15, %v10113_v47  ;;  %v10128_v6 = vpop.f32.mrb[30].mxu1 }
 0x339   : > { %12864 = vst [vmem:[#allocation54_spill] sm:$0xff] %v10104_v58  ;;  %v10117_v1 = vadd.s32 168, %v9762_v30  ;;  %v10122_v63 = vadd.s32 18, %v10069_v10  ;;  %v619_v13 = vmul.u32 18, %v618_v3  ;;  %v10126_v26 = vadd.s32 176, %v9762_v30  ;;  %12868 = vst [vmem:[#allocation58_spill] sm:$0xff] %v10128_v6 }
 0x33a   : > { %12866 = vst [vmem:[#allocation56_spill] sm:$0xff] %v10110_v4  ;;  %v10132_v47 = vmul.u32.u64.low 3817748708, %v10100_v55  ;;  %v10133_v19 = vmul.u32.u64.high 3817748708, %v10100_v55, %v10132_v47  ;;  %v10136_v5 = vadd.s32 184, %v9762_v30  ;;  %v10138_v39 = vpop.f32.mrb[31].mxu1  ;;  %v10149_v6 = vadd.s32 18, %v10087_v40 }
 0x33b   : > { %12869 = vst [vmem:[#allocation59_spill] sm:$0xff] %v10138_v39  ;;  %v10153_v47 = vsub.s32 %v9938_v59, %v608_v57  ;;  %v630_v56 = vmul.u32 18, %v629_v27  ;;  %v12874_v39 = vmov 0  ;;  %vm12876_vm3 = vcmp.lt.s32.totalorder %v10069_v10, 0 }
 0x33c   : > { %12872 = vst [vmem:[#allocation60_spill] sm:$0xff] %v10149_v6  ;;  %v12875_v39 = vsel %vm10159_vm0, 4294967295, %v12874_v39  ;;  %v10166_v49 = vmul.u32.u64.low 3817748708, %v10117_v1  ;;  %v10167_v31 = vmul.u32.u64.high 3817748708, %v10117_v1, %v10166_v49  ;;  %vm10173_vm10 = vmand %vm12876_vm3, %vm853_vm15  ;;  %v12877_v59 = vmov 0 }
 0x33d   : > { %12873 = vst [vmem:[#allocation61_spill] sm:$0xff] %v10153_v47  ;;  %v12878_v59 = vsel %vm10173_vm10, 4294967295, %v12877_v59  ;;  %vm892_vm13 = vcmp.lt.s32.totalorder %v10110_v4, 0  ;;  %v10179_v57 = vsub.s32 %v9952_v38, %v619_v13  ;;  %vm12879_vm14 = vcmp.ne.s32.totalorder %v10087_v40, 0 }
 0x33e   : > { %v10182_v27 = vmul.u32.u64.low 3817748708, %v10126_v26  ;;  %v10183_v29 = vmul.u32.u64.high 3817748708, %v10126_v26, %v10182_v27  ;;  %vm12880_vm12 = vcmp.lt.s32.totalorder %v10087_v40, 0  ;;  %v12881_v49 = vmov 0 }
 0x33f   : > { %vm10189_vm11 = vmand %vm12880_vm12, %vm12879_vm14  ;;  %v640_v23 = vshrl.u32 %v10092_v61, 4  ;;  %v651_v22 = vshrl.u32 %v10097_v36, 4  ;;  %v10196_v7 = vmul.u32.u64.low 3817748708, %v10136_v5  ;;  %v10197_v38 = vmul.u32.u64.high 3817748708, %v10136_v5, %v10196_v7  ;;  %v10250_v61 = vld [vmem:[%s12633_s2] ss:$0 sm:$0xff] }
 0x340   : > { %v12882_v49 = vsel %vm10189_vm11, 4294967295, %v12881_v49  ;;  %v10200_v13 = vadd.s32 18, %v10104_v58  ;;  %v10205_v27 = vsub.s32 %v9982_v21, %v630_v56  ;;  %vm12885_vm12 = vcmp.ne.s32.totalorder %v10104_v58, 0 }
 0x341   : > { %12883 = vst [vmem:[#allocation62_spill] sm:$0xff] %v12882_v49  ;;  %vm12886_vm14 = vcmp.lt.s32.totalorder %v10104_v58, 0  ;;  %v12887_v36 = vmov 0  ;;  %v10224_v21 = vadd.s32 18, %v10110_v4  ;;  %v662_v56 = vshrl.u32 %v10114_v50, 4 }
 0x342   : > { %12884 = vst [vmem:[#allocation63_spill] sm:$0xff] %v10200_v13  ;;  %vm10219_vm15 = vmand %vm12886_vm14, %vm12885_vm12  ;;  %vm12891_vm12 = vcmp.ne.s32.totalorder %v10110_v4, 0  ;;  %v12892_v17 = vmov 0  ;;  %v10244_v50 = vadd.s32 18, %v10153_v47  ;;  %v12896_v7 = vsel %vm9852_vm6, %v9837_v14, %v9810_v46 }
 0x343   : > { %v12888_v36 = vsel %vm10219_vm15, 4294967295, %v12887_v36  ;;  %12890 = vst [vmem:[#allocation65_spill] sm:$0xff] %v10224_v21  ;;  %vm10239_vm14 = vmand %vm892_vm13, %vm12891_vm12  ;;  %vm10257_vm11 = vcmp.lt.s32.totalorder %v12896_v7, 16  ;;  %v12897_v40 = vmov 0  ;;  %v12900_v6 = vsel %vm9864_vm7, %v9845_v28, %v9819_v2 }
 0x344   : > { %12889 = vst [vmem:[#allocation64_spill] sm:$0xff] %v12888_v36  ;;  %v12893_v17 = vsel %vm10239_vm14, 4294967295, %v12892_v17  ;;  %12895 = vst [vmem:[#allocation67_spill] sm:$0xff] %v10244_v50  ;;  %v12898_v40 = vsel %vm10257_vm11, 4294967295, %v12897_v40  ;;  %vm10266_vm13 = vcmp.lt.s32.totalorder %v12900_v6, 16  ;;  %v12901_v49 = vmov 0 }
 0x345   : > { %12894 = vst [vmem:[#allocation66_spill] sm:$0xff] %v12893_v17  ;;  %12899 = vst [vmem:[#allocation68_spill] sm:$0xff] %v12898_v40  ;;  %v12902_v49 = vsel %vm10266_vm13, 4294967295, %v12901_v49  ;;  %vm12904_vm12 = vcmp.ne.s32.totalorder %v10153_v47, 0  ;;  %vm12905_vm3 = vcmp.lt.s32.totalorder %v10153_v47, 0  ;;  %vm894_vm6 = vcmp.lt.s32.totalorder %v10179_v57, 0 }
 0x346   : > { %12903 = vst [vmem:[#allocation69_spill] sm:$0xff] %v12902_v49  ;;  %vm10274_vm10 = vmand %vm12905_vm3, %vm12904_vm12  ;;  %v641_v46 = vmul.u32 18, %v640_v23  ;;  %v652_v14 = vmul.u32 18, %v651_v22  ;;  %v673_v41 = vshrl.u32 %v10133_v19, 4  ;;  %vm859_vm7 = vcmp.ne.s32.totalorder %v10205_v27, 0  ;;  %v10333_v10 = vpop.f32.mrb[32].mxu1 }
 0x347   : > { %v12907_v24 = vsel %vm10274_vm10, 4294967295, %v12906_v24  ;;  %vm895_vm0 = vcmp.lt.s32.totalorder %v10205_v27, 0  ;;  %v10287_v28 = vadd.s32 192, %v9762_v30  ;;  %v10294_v22 = vadd.s32 18, %v10179_v57  ;;  %12914 = vst [vmem:[#allocation71_spill] sm:$0xff] %v10333_v10 }
 0x348   : > { %12908 = vst [vmem:[#allocation70_spill] sm:$0xff] %v12907_v24  ;;  %v663_v19 = vmul.u32 18, %v662_v56  ;;  %v684_v7 = vshrl.u32 %v10167_v31, 4  ;;  %vm12909_vm3 = vcmp.ne.s32.totalorder %v10179_v57, 0  ;;  %v12910_v23 = vmov 0  ;;  %vm10316_vm14 = vmand %vm895_vm0, %vm859_vm7 }
 0x349   : > { %vm10306_vm12 = vmand %vm894_vm6, %vm12909_vm3  ;;  %v10311_v56 = vadd.s32 18, %v10205_v27  ;;  %v695_v31 = vshrl.u32 %v10183_v29, 4  ;;  %v10321_v13 = vsub.s32 %v10064_v20, %v641_v46  ;;  %v10324_v47 = vsub.s32 %v10072_v18, %v652_v14  ;;  %v10345_v46 = vpop.f32.mrb[33].mxu1 }
 0x34a   : > { %v12911_v23 = vsel %vm10306_vm12, 4294967295, %v12910_v23  ;;  %v674_v50 = vmul.u32 18, %v673_v41  ;;  %v706_v24 = vshrl.u32 %v10197_v38, 4  ;;  %v10340_v18 = vsub.s32 %v10084_v15, %v663_v19  ;;  %12915 = vst [vmem:[#allocation72_spill] sm:$0xff] %v10345_v46 }
 0x34b   : > { %v10330_v17 = vmul.u32.u64.low 3817748708, %v10287_v28  ;;  %v10331_v36 = vmul.u32.u64.high 3817748708, %v10287_v28, %v10330_v17  ;;  %v685_v38 = vmul.u32 18, %v684_v7  ;;  %v12917_v15 = vsel %vm9877_vm8, %v9869_v42, %v9824_v9 }
 0x34c   : > { %v696_v41 = vmul.u32 18, %v695_v31  ;;  %vm10359_vm0 = vcmp.lt.s32.totalorder %v12917_v15, 16  ;;  %v12918_v19 = vmov 0  ;;  %vm860_vm7 = vcmp.ne.s32.totalorder %v10321_v13, 0 }
 0x34d   : > { %v12919_v19 = vsel %vm10359_vm0, 4294967295, %v12918_v19  ;;  %vm896_vm3 = vcmp.lt.s32.totalorder %v10321_v13, 0  ;;  %v10375_v45 = vsub.s32 %v10100_v55, %v674_v50  ;;  %v707_v9 = vmul.u32 18, %v706_v24 }
 0x34e   : > { %12920 = vst [vmem:[#allocation74_spill] sm:$0xff] %v12919_v19  ;;  %v10380_v37 = vadd.s32 18, %v10321_v13  ;;  %vm12935_vm10 = vcmp.lt.s32.totalorder %v10340_v18, 0  ;;  %v12961_v17 = vmov 0  ;;  %v10646_v3 = vadd.s32 224, %v9762_v30 }
 0x34f   : > { %v10480_v54 = vadd.s32 18, %v10375_v45 }
 0x373   : > { %v3017_v6 = vpop.f32.mrb[0].mxu0 }
 0x374   : > { %v7953_v2 = vadd.f32 %v10250_v61, %v3017_v6  ;;  %v3019_v58 = vpop.f32.mrb[1].mxu0 }
 0x375   : > { %v3020_v6 = vpop.f32.mrb[2].mxu0  ;;  %v12912_v58 = vmov 0 }
 0x376   : > { %v12913_v58 = vsel %vm10316_vm14, 4294967295, %v12912_v58  ;;  %v3195_v4 = vadd.f32 %v7953_v2, %v9705_v34  ;;  %v7954_v29 = vadd.f32 %v10250_v61, %v3020_v6  ;;  %v3022_v21 = vpop.f32.mrb[3].mxu0  ;;  %v10343_v34 = vadd.s32 200, %v9762_v30  ;;  %v10352_v2 = vpop.f32.mrb[34].mxu1 }
 0x377   : > { %12916 = vst [vmem:[#allocation73_spill] sm:$0xff] %v10352_v2  ;;  %v10377_v42 = vpop.f32.mrb[35].mxu1  ;;  %vm12934_vm14 = vcmp.ne.s32.totalorder %v10340_v18, 0 }
 0x378   : > { %v3337_v21 = vmax.f32 %v3195_v4, 0.0  ;;  %v3198_v14 = vadd.f32 %v7954_v29, %v9709_v12  ;;  %v12921_v12 = vsel %vm9960_vm1, %v9910_v62, %v9871_v25  ;;  %v12922_v4 = vmov 0  ;;  %12925 = vst [vmem:[#allocation76_spill] sm:$0xff] %v10377_v42  ;;  %vm10435_vm15 = vmand %vm12935_vm10, %vm12934_vm14 }
 0x379   : > { %vm10368_vm6 = vcmp.lt.s32.totalorder %v12921_v12, 16  ;;  %v10386_v62 = vsub.s32 %v10117_v1, %v685_v38  ;;  %v10389_v55 = vmul.u32.u64.low 3817748708, %v10343_v34  ;;  %v10390_v50 = vmul.u32.u64.high 3817748708, %v10343_v34, %v10389_v55 }
 0x37a   : > { %v12923_v4 = vsel %vm10368_vm6, 4294967295, %v12922_v4  ;;  %v3338_v7 = vmax.f32 %v3198_v14, 0.0  ;;  %v3445_v24 = vsel %vm10257_vm11, %v3337_v21, 0.0  ;;  %v10398_v14 = vsub.s32 %v10126_v26, %v696_v41  ;;  %vm10411_vm11 = vmand %vm896_vm3, %vm860_vm7 }
 0x37b   : > { %12924 = vst [vmem:[#allocation75_spill] sm:$0xff] %v12923_v4  ;;  %v3025_v25 = vpop.f32.mrb[4].mxu0  ;;  %v10403_v1 = vsub.s32 %v10136_v5, %v707_v9  ;;  %v717_v41 = vshrl.u32 %v10331_v36, 4  ;;  %vm12930_vm1 = vcmp.ne.s32.totalorder %v10324_v47, 0  ;;  %v10426_v9 = vadd.s32 18, %v10324_v47 }
 0x37c   : > { %v3446_v31 = vsel %vm10266_vm13, %v3338_v7, 0.0  ;;  %v7955_v6 = vadd.f32 %v10250_v61, %v3025_v25  ;;  %v3027_v29 = vpop.f32.mrb[5].mxu0  ;;  %12926 = vst [vmem:[#allocation77_spill] sm:$0xff] %v10398_v14  ;;  %vm12931_vm13 = vcmp.lt.s32.totalorder %v10324_v47, 0  ;;  %vm864_vm7 = vcmp.ne.s32.totalorder %v10386_v62, 0 }
 0x37d   : > { %v3485_v15 = vpack.c.bf16 %v3446_v31, %v3445_v24  ;;  %v3028_v12 = vpop.f32.mrb[6].mxu0  ;;  %12927 = vst [vmem:[#allocation78_spill] sm:$0xff] %v10403_v1  ;;  %vm10421_vm12 = vmand %vm12931_vm13, %vm12930_vm1  ;;  %v12938_v24 = vsel %vm9973_vm4, %v9925_v44, %v9881_v48  ;;  %v12942_v31 = vsel %vm9988_vm5, %v9993_v53, %v9890_v0  ;;  %v10460_v29 = vadd.s32 18, %v10340_v18 }
 0x37e   : > { %v3203_v38 = vadd.f32 %v7955_v6, %v9703_v32  ;;  %v7956_v21 = vadd.f32 %v10250_v61, %v3028_v12  ;;  %v3030_v7 = vpop.f32.mrb[7].mxu0  ;;  %vm10446_vm3 = vcmp.lt.s32.totalorder %v12938_v24, 16  ;;  %vm10455_vm10 = vcmp.lt.s32.totalorder %v12942_v31, 16 }
 0x37f   : > { %v3522_v5 = vrot.slane %v3485_v15, 4  ;;  %v12943_v6 = vmov 0  ;;  %vm12946_vm14 = vcmp.ne.s32.totalorder %v10375_v45, 0  ;;  %vm12947_vm4 = vcmp.lt.s32.totalorder %v10375_v45, 0 }
 0x380   : > { %v3339_v25 = vmax.f32 %v3203_v38, 0.0  ;;  %v3206_v55 = vadd.f32 %v7956_v21, %v9707_v35  ;;  %v12939_v35 = vmov 0  ;;  %v12944_v6 = vsel %vm10455_vm10, 4294967295, %v12943_v6  ;;  %vm10466_vm8 = vmand %vm12947_vm4, %vm12946_vm14 }
 0x381   : > { %3576 = vst [vmem:[#allocation2 + $0x8] sm:$0xf0] %v3522_v5  ;;  %v12940_v35 = vsel %vm10446_vm3, 4294967295, %v12939_v35  ;;  %12945 = vst [vmem:[#allocation80_spill] sm:$0xff] %v12944_v6  ;;  %v10473_v0 = vadd.s32 208, %v9762_v30  ;;  %vm12950_vm5 = vcmp.lt.s32.totalorder %v10386_v62, 0 }
 0x382   : > { %12941 = vst [vmem:[#allocation79_spill] sm:$0xff] %v12940_v35  ;;  %v3340_v44 = vmax.f32 %v3206_v55, 0.0  ;;  %vm10486_vm14 = vmand %vm12950_vm5, %vm864_vm7  ;;  %v718_v15 = vmul.u32 18, %v717_v41  ;;  %v10495_v21 = vadd.s32 18, %v10386_v62  ;;  %vm12953_vm4 = vcmp.ne.s32.totalorder %v10398_v14, 0  ;;  %v12983_v35 = vld [vmem:[#allocation21_spill] sm:$0xff] }
 0x383   : > { %v3033_v12 = vpop.f32.mrb[8].mxu0  ;;  %vm12954_vm13 = vcmp.lt.s32.totalorder %v10398_v14, 0  ;;  %v10506_v55 = vadd.s32 18, %v10398_v14  ;;  %v10509_v41 = vadd.s32 18, %v10403_v1  ;;  %v3447_v24 = vsel %vm10359_vm0, %v3339_v25, 0.0 }
 0x384   : > { %vm10501_vm1 = vmand %vm12954_vm13, %vm12953_vm4  ;;  %v3448_v31 = vsel %vm10368_vm6, %v3340_v44, 0.0  ;;  %v7957_v38 = vadd.f32 %v10250_v61, %v3033_v12  ;;  %v3035_v43 = vpop.f32.mrb[9].mxu0  ;;  %vm12959_vm13 = vcmp.ne.s32.totalorder %v10403_v1, 0  ;;  %vm12960_vm5 = vcmp.lt.s32.totalorder %v10403_v1, 0 }
 0x385   : > { %12957 = vst [vmem:[#allocation81_spill] sm:$0xff] %v10506_v55  ;;  %12958 = vst [vmem:[#allocation82_spill] sm:$0xff] %v10509_v41  ;;  %v728_v20 = vshrl.u32 %v10390_v50, 4  ;;  %v3486_v40 = vpack.c.bf16 %v3448_v31, %v3447_v24  ;;  %v3036_v19 = vpop.f32.mrb[10].mxu0  ;;  %v10530_v44 = vmul.u32.u64.low 3817748708, %v10473_v0  ;;  %v10531_v43 = vmul.u32.u64.high 3817748708, %v10473_v0, %v10530_v44 }
 0x386   : > { %vm10520_vm4 = vmand %vm12960_vm5, %vm12959_vm13  ;;  %v3211_v12 = vadd.f32 %v7957_v38, %v9725_v51  ;;  %v7958_v4 = vadd.f32 %v10250_v61, %v3036_v19  ;;  %v3038_v49 = vpop.f32.mrb[11].mxu0  ;;  %v10540_v24 = vsub.s32 %v10287_v28, %v718_v15  ;;  %v12967_v38 = vmov 0 }
 0x387   : > { %v12962_v17 = vsel %vm10520_vm4, 4294967295, %v12961_v17  ;;  %v3523_v31 = vrot.slane %v3486_v40, 4  ;;  %v12965_v40 = vld [vmem:[#allocation40_spill] sm:$0xff]  ;;  %v729_v25 = vmul.u32 18, %v728_v20  ;;  %v10565_v51 = vadd.s32 216, %v9762_v30  ;;  %v12971_v49 = vld [vmem:[#allocation50_spill] sm:$0xff] }
 0x388   : > { %12963 = vst [vmem:[#allocation83_spill] sm:$0xff] %v12962_v17  ;;  %12964 = vst [vmem:[#allocation84_spill] sm:$0xff] %v10540_v24  ;;  %v3341_v19 = vmax.f32 %v3211_v12, 0.0  ;;  %v3214_v28 = vadd.f32 %v7958_v4, %v9730_v52  ;;  %v12966_v15 = vsel %vm10006_vm9, %v9996_v33, %v12965_v40  ;;  %v3822_v44 = vld [vmem:[#allocation2 + $0x8] sm:$0xff]  ;;  %vm12970_vm5 = vcmask 1043456   ;;  %v12973_v52 = vld [vmem:[#allocation49_spill] sm:$0xff] }
 0x389   : > { %vm10560_vm13 = vcmp.lt.s32.totalorder %v12966_v15, 16  ;;  %v10568_v50 = vsel %vm12970_vm5, %v3522_v5, %v3523_v31  ;;  %v3861_v12 = vrot.slane %v3822_v44, 3  ;;  %vm12972_vm7 = vnez %v12971_v49  ;;  %v12979_v49 = vld [vmem:[#allocation48_spill] sm:$0xff] }
 0x38a   : > { %v12968_v38 = vsel %vm10560_vm13, 4294967295, %v12967_v38  ;;  %v12975_v4 = vsel %vm12972_vm7, %v12973_v52, %v12974_v8  ;;  %v12976_v33 = vmov 0  ;;  %v3624_v40 = vshrl.u32 %v3822_v44, 16  ;;  %3577 = vst [vmem:[#allocation2 + $0x10] sm:$0xff] %v10568_v50 }
 0x38b   : > { %12969 = vst [vmem:[#allocation40_spill] sm:$0xff] %v12968_v38  ;;  %vm10575_vm6 = vcmp.lt.s32.totalorder %v12975_v4, 16  ;;  %v3627_v15 = vshll.u32 %v3822_v44, 16  ;;  %v3342_v20 = vmax.f32 %v3214_v28, 0.0  ;;  %v3633_v2 = vshrl.u32 %v10568_v50, 16  ;;  %v3041_v5 = vpop.f32.mrb[12].mxu0 }
 0x38c   : > { %v12977_v33 = vsel %vm10575_vm6, 4294967295, %v12976_v33  ;;  %vm867_vm9 = vcmp.ne.s32.totalorder %v10540_v24, 0  ;;  %vm903_vm5 = vcmp.lt.s32.totalorder %v10540_v24, 0  ;;  %v12980_v10 = vrot.slane %v12979_v49, 3  ;;  %v3043_v1 = vpop.f32.mrb[13].mxu0  ;;  %v8728_v38 = vld [vmem:[#allocation9 + $0x90] sm:$0xff]  }
 0x38d   : > { %12978 = vst [vmem:[#allocation50_spill] sm:$0xff] %v12977_v33  ;;  %vm12981_vm0 = vcmask 1044480   ;;  %v3626_v8 = vrot.slane %v3624_v40, 2  ;;  %v3629_v4 = vrot.slane %v3627_v15, 3  ;;  %v3636_v42 = vshll.u32 %v10568_v50, 16  ;;  %v3044_v49 = vpop.f32.mrb[14].mxu0 }
 0x38e   : > { %v3862_v52 = vsel %vm12981_vm0, %v12980_v10, %v3861_v12  ;;  %v3449_v44 = vsel %vm10446_vm3, %v3341_v19, 0.0  ;;  %v3450_v28 = vsel %vm10455_vm10, %v3342_v20, 0.0  ;;  %v7959_v46 = vadd.f32 %v10250_v61, %v3041_v5  ;;  %v8722_v10 = vld [vmem:[#allocation9 + $0x80] sm:$0xff]   ;;  %v3046_v20 = vpop.f32.mrb[15].mxu0  ;;  %vm10603_vm0 = vmand %vm903_vm5, %vm867_vm9 }
 0x38f   : > { %6061 = vmatprep.mubr.bf16.mxu1 %v3862_v52  ;;  %v3863_v41 = vrot.slane %v10568_v50, 3  ;;  %v3487_v17 = vpack.c.bf16 %v3450_v28, %v3449_v44  ;;  %v3630_v14 = vor.u32 %v3629_v4, %v3626_v8  ;;  %v10594_v40 = vadd.s32 18, %v10540_v24  ;;  %v12987_v52 = vld [vmem:[#allocation47_spill] sm:$0xff]  ;;  %v12988_v8 = vld [vmem:[#allocation46_spill] sm:$0xff]  ;;  %v13006_v24 = vld [vmem:[#allocation24_spill] sm:$0xff] }
 0x390   : > { %v739_v15 = vshrl.u32 %v10531_v43, 4  ;;  %v3219_v19 = vadd.f32 %v7959_v46, %v12983_v35  ;;  %v7960_v6 = vadd.f32 %v10250_v61, %v3044_v49  ;;  %v3635_v55 = vrot.slane %v3633_v2, 2 }
 0x391   : > { %12982 = vst [vmem:[#allocation49_spill] sm:$0xff] %v10594_v40  ;;  %v3638_v5 = vrot.slane %v3636_v42, 3  ;;  %v12984_v1 = vmov 0  ;;  %v3525_v50 = vrot.slane %v3487_v17, 4  ;;  %v12989_v4 = vor.u32 %v12987_v52, %v12988_v8  ;;  %v12991_v42 = vld [vmem:[#allocation22_spill] sm:$0xff] }
 0x392   : > { %v12985_v1 = vsel %vm10603_vm0, 4294967295, %v12984_v1  ;;  %vm12990_vm7 = vsmask.f32 5376  ;;  %v10612_v46 = vmul.u32.u64.low 3817748708, %v10565_v51  ;;  %v10613_v35 = vmul.u32.u64.high 3817748708, %v10565_v51, %v10612_v46 }
 0x393   : > { %12986 = vst [vmem:[#allocation41_spill] sm:$0xff] %v12985_v1  ;;  %v3631_v43 = vsel %vm12990_vm7, %v12989_v4, %v3630_v14  ;;  %v3343_v2 = vmax.f32 %v3219_v19, 0.0  ;;  %v3222_v44 = vadd.f32 %v7960_v6, %v12991_v42  ;;  %vm12992_vm3 = vcmask 1044480   ;;  %v12999_v6 = vld [vmem:[#allocation51_spill] sm:$0xff]  ;;  %v10661_v1 = vld [vmem:[#allocation2] sm:$0xff] }
 0x394   : > { %6062 = vmatmul.mubr.bf16.vlgmr.msra.gmra.mrb[36].mxu1 %v3631_v43  ;;  %v3864_v28 = vsel %vm12992_vm3, %v3861_v12, %v3863_v41  ;;  %v10618_v49 = vsub.s32 %v10343_v34, %v729_v25  ;;  %vm12993_vm9 = vcmask 1043456   ;;  %v12994_v20 = vsel %vm10144_vm2, %v10075_v11, %v10037_v60  ;;  %v8725_v25 = vld [vmem:[#allocation9 + $0x88] sm:$0xff]   ;;  %v3049_v43 = vpop.f32.mrb[16].mxu0 }
 0x395   : > { %v10621_v17 = vsel %vm12993_vm9, %v3523_v31, %v3525_v50  ;;  %6207 = vmatpush1.bf16.msra.mxu1 %v8722_v10  ;;  %vm10628_vm5 = vcmp.lt.s32.totalorder %v12994_v20, 16  ;;  %v12995_v52 = vmov 0  ;;  %vm12998_vm7 = vnez %v12875_v39  ;;  %6069 = vmatprep.mubr.bf16.mxu1 %v3864_v28  ;;  %v5058_v31 = vld [vmem:[#allocation2 + $0x10] sm:$0xe0]  ;;  %v13004_v10 = vld [vmem:[#allocation20_spill] sm:$0xff] }
 0x396   : > { %v12996_v52 = vsel %vm10628_vm5, 4294967295, %v12995_v52  ;;  %v13000_v12 = vsel %vm12998_vm7, %v10081_v16, %v12999_v6  ;;  %v13001_v34 = vmov 0  ;;  %v740_v11 = vmul.u32 18, %v739_v15  ;;  %3578 = vst [vmem:[#allocation2 + $0x18] sm:$0xff] %v10621_v17  ;;  %6208 = vmatprep.subr.bf16.mxu1 %v13004_v10 }
 0x397   : > { %12997 = vst [vmem:[#allocation48_spill] sm:$0xff] %v12996_v52  ;;  %vm10637_vm3 = vcmp.lt.s32.totalorder %v13000_v12, 16  ;;  %v3344_v39 = vmax.f32 %v3222_v44, 0.0  ;;  %v3639_v16 = vor.u32 %v3638_v5, %v3635_v55  ;;  %v3865_v19 = vrot.slane %v10621_v17, 3  ;;  %v3051_v55 = vpop.f32.mrb[17].mxu0 }
 0x398   : > { %v13002_v34 = vsel %vm10637_vm3, 4294967295, %v13001_v34  ;;  %v3642_v8 = vshrl.u32 %v10621_v17, 16  ;;  %v3451_v4 = vsel %vm10560_vm13, %v3343_v2, 0.0  ;;  %v3645_v46 = vshll.u32 %v10621_v17, 16  ;;  %v3052_v12 = vpop.f32.mrb[18].mxu0 }
 0x399   : > { %13003 = vst [vmem:[#allocation21_spill] sm:$0xff] %v13002_v34  ;;  %v5079_v15 = vshrl.u32 %v5058_v31, 16  ;;  %v5082_v42 = vshll.u32 %v5058_v31, 16  ;;  %v3452_v28 = vsel %vm10575_vm6, %v3344_v39, 0.0  ;;  %v7961_v44 = vadd.f32 %v10250_v61, %v3049_v43  ;;  %6209 = vmatpush1.bf16.msra.mxu1 %v8725_v25  ;;  %v3054_v40 = vpop.f32.mrb[19].mxu0 }
 0x39a   : > { %vm13005_vm2 = vcmask 1044480   ;;  %v3644_v20 = vrot.slane %v3642_v8, 2  ;;  %v3488_v6 = vpack.c.bf16 %v3452_v28, %v3451_v4  ;;  %v3647_v10 = vrot.slane %v3645_v46, 3  ;;  %6210 = vmatprep.subr.bf16.mxu1 %v10661_v1  ;;  %v13011_v40 = vld [vmem:[#allocation52_spill] sm:$0xff] }
 0x39b   : > { %v3866_v5 = vsel %vm13005_vm2, %v3863_v41, %v3865_v19  ;;  %v5081_v60 = vrot.slane %v5079_v15, 5  ;;  %v5084_v2 = vrot.slane %v5082_v42, 6  ;;  %v3227_v17 = vadd.f32 %v7961_v44, %v13006_v24  ;;  %v13008_v15 = vld [vmem:[#allocation26_spill] sm:$0xff] }
 0x39c   : > { %v7962_v31 = vadd.f32 %v10250_v61, %v3052_v12  ;;  %v5089_v33 = vrot.slane %v3642_v8, 5  ;;  %v5092_v39 = vrot.slane %v3645_v46, 6  ;;  %v3527_v41 = vrot.slane %v3488_v6, 4  ;;  %v13018_v46 = vld [vmem:[#allocation60_spill] sm:$0xff] }
 0x39d   : > { %vm13007_vm9 = vsmask.f32 5376  ;;  %v3648_v43 = vor.u32 %v3647_v10, %v3644_v20  ;;  %v5085_v25 = vor.u32 %v5084_v2, %v5081_v60  ;;  %v3345_v28 = vmax.f32 %v3227_v17, 0.0  ;;  %v13016_v60 = vld [vmem:[#allocation62_spill] sm:$0xff]  ;;  %6211 = vmatpush1.bf16.msra.mxu1 %v8728_v38 }
 0x39e   : > { %v3640_v4 = vsel %vm13007_vm9, %v3630_v14, %v3639_v16  ;;  %v3230_v42 = vadd.f32 %v7962_v31, %v13008_v15  ;;  %v5093_v55 = vor.u32 %v5092_v39, %v5089_v33  ;;  %vm13009_vm10 = vcmask 1043456   ;;  %v13019_v33 = vld [vmem:[#allocation53_spill] sm:$0xff]  ;;  %6212 = vmatprep.subr.bf16.mxu1 %v10661_v1 }
 0x39f   : > { %6070 = vmatmul.mubr.bf16.gmra.mrb[40].mxu1 %v3640_v4  ;;  %v10669_v24 = vsel %vm13009_vm10, %v3525_v50, %v3527_v41  ;;  %vm13010_vm6 = vnez %v12878_v59  ;;  %v13013_v14 = vmov 0  ;;  %vm13017_vm13 = vnez %v13016_v60  ;;  %v8730_v59 = vld [vmem:[#allocation9 + $0x98] sm:$0xff]  }
 0x3a0   : > { %v13012_v8 = vsel %vm13010_vm6, %v10122_v63, %v13011_v40  ;;  %v13020_v44 = vsel %vm13017_vm13, %v13018_v46, %v13019_v33  ;;  %v13021_v20 = vmov 0  ;;  %6077 = vmatprep.mubr.bf16.mxu1 %v3866_v5  ;;  %vm13024_vm10 = vsmask.f32 5376  ;;  %3579 = vst [vmem:[#allocation2 + $0x20] sm:$0xff] %v10669_v24  ;;  %v3057_v5 = vpop.f32.mrb[20].mxu0  ;;  %vm13026_vm13 = vmmov %vm13005_vm2  ;;  %v8731_v46 = vld [vmem:[#allocation9 + $0xa0] sm:$0xff]  }
 0x3a1   : > { %vm10676_vm9 = vcmp.lt.s32.totalorder %v13012_v8, 16  ;;  %vm10685_vm7 = vcmp.lt.s32.totalorder %v13020_v44, 16  ;;  %v3649_v50 = vsel %vm13024_vm10, %v3639_v16, %v3648_v43  ;;  %v3346_v12 = vmax.f32 %v3230_v42, 0.0  ;;  %v3059_v15 = vpop.f32.mrb[21].mxu0  ;;  %6213 = vmatpush1.bf16.msra.mxu1 %v8730_v59  ;;  %v13027_v33 = vld [vmem:[#allocation23_spill] sm:$0xff] }
 0x3a2   : > { %v13014_v14 = vsel %vm10676_vm9, 4294967295, %v13013_v14  ;;  %v13022_v20 = vsel %vm10685_vm7, 4294967295, %v13021_v20  ;;  %v10691_v63 = vmul.u32.u64.low 3817748708, %v10646_v3  ;;  %v10692_v6 = vmul.u32.u64.high 3817748708, %v10646_v3, %v10691_v63  ;;  %v3060_v8 = vpop.f32.mrb[22].mxu0  ;;  %6214 = vmatprep.subr.bf16.mxu1 %v10661_v1 }
 0x3a3   : > { %13015 = vst [vmem:[#allocation47_spill] sm:$0xff] %v13014_v14  ;;  %13023 = vst [vmem:[#allocation46_spill] sm:$0xff] %v13022_v20  ;;  %vm13025_vm6 = vsmask.f32 2304  ;;  %v12706_v2 = vrot.slane %v10669_v24, 3  ;;  %v750_v17 = vshrl.u32 %v10613_v35, 4  ;;  %v10702_v31 = vsub.s32 %v10473_v0, %v740_v11 }
 0x3a4   : > { %v5094_v10 = vsel %vm13025_vm6, %v5085_v25, %v5093_v55  ;;  %v3651_v38 = vshrl.u32 %v10669_v24, 16  ;;  %v3654_v16 = vshll.u32 %v10669_v24, 16  ;;  %v10705_v39 = vadd.s32 232, %v9762_v30  ;;  %v3062_v63 = vpop.f32.mrb[23].mxu0  ;;  %v8733_v14 = vld [vmem:[#allocation9 + $0xb0] sm:$0xff]  }
 0x3a5   : > { %7799 = vmatprep.mubr.bf16.mxu0 %v5094_v10  ;;  %v3453_v4 = vsel %vm10628_vm5, %v3345_v28, 0.0  ;;  %v3454_v25 = vsel %vm10637_vm3, %v3346_v12, 0.0  ;;  %v7963_v35 = vadd.f32 %v10250_v61, %v3057_v5  ;;  %v3868_v42 = vsel %vm13026_vm13, %v3865_v19, %v12706_v2  ;;  %6215 = vmatpush1.bf16.msra.mxu1 %v8731_v46  ;;  %v8732_v63 = vld [vmem:[#allocation9 + $0xa8] sm:$0xff]  }
 0x3a6   : > { %v3489_v40 = vpack.c.bf16 %v3454_v25, %v3453_v4  ;;  %v3653_v0 = vrot.slane %v3651_v38, 2  ;;  %v3656_v11 = vrot.slane %v3654_v16, 3  ;;  %v5098_v60 = vrot.slane %v3651_v38, 5  ;;  %v13028_v38 = vld [vmem:[#allocation25_spill] sm:$0xff]  ;;  %6216 = vmatprep.subr.bf16.mxu1 %v10661_v1 }
 0x3a7   : > { %v3235_v44 = vadd.f32 %v7963_v35, %v13027_v33  ;;  %v7964_v28 = vadd.f32 %v10250_v61, %v3060_v8  ;;  %v5101_v12 = vrot.slane %v3654_v16, 6  ;;  %v751_v10 = vmul.u32 18, %v750_v17  ;;  %6078 = vmatmul.mubr.bf16.gmra.mrb[44].mxu1 %v3649_v50  ;;  %v13030_v17 = vld [vmem:[#allocation64_spill] sm:$0xff]  ;;  %v13033_v8 = vld [vmem:[#allocation54_spill] sm:$0xff]  ;;  %v13040_v50 = vld [vmem:[#allocation65_spill] sm:$0xff] }
 0x3a8   : > { %v3529_v5 = vrot.slane %v3489_v40, 4  ;;  %v10718_v15 = vor.u32 %v3656_v11, %v3653_v0  ;;  %v10721_v19 = vmul.u32.u64.low 3817748708, %v10705_v39  ;;  %v10722_v4 = vmul.u32.u64.high 3817748708, %v10705_v39, %v10721_v19  ;;  %v13032_v40 = vld [vmem:[#allocation63_spill] sm:$0xff]  ;;  %v13038_v33 = vld [vmem:[#allocation66_spill] sm:$0xff]  ;;  %6085 = vmatprep.mubr.bf16.mxu1 %v3868_v42 }
 0x3a9   : > { %v3347_v25 = vmax.f32 %v3235_v44, 0.0  ;;  %v3238_v59 = vadd.f32 %v7964_v28, %v13028_v38  ;;  %v10725_v2 = vor.u32 %v5101_v12, %v5098_v60  ;;  %v10728_v35 = vadd.s32 18, %v10618_v49  ;;  %v13041_v60 = vld [vmem:[#allocation56_spill] sm:$0xff]  ;;  %6217 = vmatpush1.bf16.msra.mxu1 %v8732_v63 }
 0x3aa   : > { %vm13029_vm10 = vcmask 1043456   ;;  %vm13031_vm6 = vnez %v13030_v17  ;;  %v13035_v11 = vmov 0  ;;  %vm13039_vm2 = vnez %v13038_v33  ;;  %6218 = vmatprep.subr.bf16.mxu1 %v10661_v1 }
 0x3ab   : > { %v10731_v16 = vsel %vm13029_vm10, %v3527_v41, %v3529_v5  ;;  %v13034_v0 = vsel %vm13031_vm6, %v13032_v40, %v13033_v8  ;;  %v13042_v44 = vsel %vm13039_vm2, %v13040_v50, %v13041_v60  ;;  %v13043_v28 = vmov 0 }
 0x3ac   : > { %vm10738_vm13 = vcmp.lt.s32.totalorder %v13034_v0, 16  ;;  %vm10747_vm3 = vcmp.lt.s32.totalorder %v13042_v44, 16  ;;  %vm13046_vm10 = vsmask.f32 5376  ;;  %vm869_vm6 = vcmp.ne.s32.totalorder %v10702_v31, 0  ;;  %3580 = vst [vmem:[#allocation2 + $0x28] sm:$0xff] %v10731_v16 }
 0x3ad   : > { %v13036_v11 = vsel %vm10738_vm13, 4294967295, %v13035_v11  ;;  %v13044_v28 = vsel %vm10747_vm3, 4294967295, %v13043_v28  ;;  %v3658_v41 = vsel %vm13046_vm10, %v3648_v43, %v10718_v15  ;;  %v3348_v12 = vmax.f32 %v3238_v59, 0.0  ;;  %v3065_v43 = vpop.f32.mrb[24].mxu0  ;;  %6219 = vmatpush1.bf16.msra.mxu1 %v8733_v14 }
 0x3ae   : > { %13037 = vst [vmem:[#allocation22_spill] sm:$0xff] %v13036_v11  ;;  %13045 = vst [vmem:[#allocation51_spill] sm:$0xff] %v13044_v28  ;;  %vm13047_vm0 = vsmask.f32 2304  ;;  %v12716_v38 = vrot.slane %v10731_v16, 3  ;;  %v10761_v42 = vadd.s32 18, %v10702_v31  ;;  %v7965_v33 = vadd.f32 %v10250_v61, %v3065_v43  ;;  %6220 = vmatprep.subr.bf16.mxu1 %v10661_v1 }
 0x3af   : > { %v5103_v19 = vsel %vm13047_vm0, %v5093_v55, %v10725_v2  ;;  %v3660_v46 = vshrl.u32 %v10731_v16, 16  ;;  %v3663_v17 = vshll.u32 %v10731_v16, 16  ;;  %vm13048_vm2 = vcmp.ne.s32.totalorder %v10618_v49, 0  ;;  %v3067_v50 = vpop.f32.mrb[25].mxu0  ;;  %6086 = vmatmul.mubr.bf16.gmra.mrb[48].mxu1 %v3658_v41 }
 0x3b0   : > { %7800 = vmatmul.mubr.bf16.vlgmr.msra.gmra.mrb[72].mxu0 %v5103_v19  ;;  %vm13049_vm10 = vcmp.lt.s32.totalorder %v10618_v49, 0  ;;  %v13050_v59 = vmov 0  ;;  %v10774_v55 = vsub.s32 %v10565_v51, %v751_v10  ;;  %v761_v40 = vshrl.u32 %v10692_v6, 4  ;;  %v3068_v51 = vpop.f32.mrb[26].mxu0 }
 0x3b1   : > { %vm10769_vm5 = vmand %vm13049_vm10, %vm13048_vm2  ;;  %v3455_v8 = vsel %vm10676_vm9, %v3347_v25, 0.0  ;;  %v3456_v0 = vsel %vm10685_vm7, %v3348_v12, 0.0  ;;  %v13052_v60 = vrot.slane %v10669_v24, 3  ;;  %vm13053_vm0 = vcmask 1044480   ;;  %v13054_v25 = vld [vmem:[#allocation28_spill] sm:$0xff]  ;;  %v3070_v20 = vpop.f32.mrb[27].mxu0 }
 0x3b2   : > { %v13051_v59 = vsel %vm10769_vm5, 4294967295, %v13050_v59  ;;  %v3490_v19 = vpack.c.bf16 %v3456_v0, %v3455_v8  ;;  %v3662_v10 = vrot.slane %v3660_v46, 2  ;;  %v3665_v34 = vrot.slane %v3663_v17, 3  ;;  %v13058_v0 = vld [vmem:[#allocation30_spill] sm:$0xff]  ;;  %v13063_v24 = vld [vmem:[#allocation61_spill] sm:$0xff] }
 0x3b3   : > { %v3870_v44 = vsel %vm13053_vm0, %v13052_v60, %v12716_v38  ;;  %v5107_v6 = vrot.slane %v3660_v46, 5  ;;  %v3243_v52 = vadd.f32 %v7965_v33, %v13054_v25  ;;  %v7966_v12 = vadd.f32 %v10250_v61, %v3068_v51  ;;  %v13060_v51 = vld [vmem:[#allocation70_spill] sm:$0xff]  ;;  %v13062_v25 = vld [vmem:[#allocation67_spill] sm:$0xff] }
 0x3b4   : > { %v5110_v43 = vrot.slane %v3663_v17, 6  ;;  %vm13055_vm2 = vcmp.lt.s32.totalorder %v10702_v31, 0  ;;  %v3531_v46 = vrot.slane %v3490_v19, 4  ;;  %v3666_v8 = vor.u32 %v3665_v34, %v3662_v10  ;;  %6093 = vmatprep.mubr.bf16.mxu1 %v3870_v44 }
 0x3b5   : > { %vm10798_vm10 = vmand %vm13055_vm2, %vm869_vm6  ;;  %v762_v20 = vmul.u32 18, %v761_v40  ;;  %v3349_v17 = vmax.f32 %v3243_v52, 0.0  ;;  %v3246_v33 = vadd.f32 %v7966_v12, %v13058_v0  ;;  %vm906_vm7 = vcmp.lt.s32.totalorder %v10774_v55, 0  ;;  %v8734_v40 = vld [vmem:[#allocation9 + $0xb8] sm:$0xff]  }
 0x3b6   : > { %v5111_v50 = vor.u32 %v5110_v43, %v5107_v6  ;;  %vm13059_vm9 = vcmask 1043456   ;;  %vm13061_vm6 = vnez %v13060_v51  ;;  %v13065_v34 = vmov 0  ;;  %6221 = vmatpush1.bf16.msra.mxu1 %v8734_v40 }
 0x3b7   : > { %v10806_v60 = vsel %vm13059_vm9, %v3529_v5, %v3531_v46  ;;  %v13064_v38 = vsel %vm13061_vm6, %v13062_v25, %v13063_v24  ;;  %vm13068_vm0 = vnez %v12911_v23  ;;  %v13070_v41 = vmov 0  ;;  %6222 = vmatprep.subr.bf16.mxu1 %v10661_v1 }
 0x3b8   : > { %vm10813_vm2 = vcmp.lt.s32.totalorder %v13064_v38, 16  ;;  %v13069_v52 = vsel %vm13068_vm0, %v10294_v22, %v10179_v57  ;;  %vm13073_vm9 = vsmask.f32 5376  ;;  %v10833_v23 = vadd.s32 18, %v10774_v55  ;;  %3581 = vst [vmem:[#allocation2 + $0x30] sm:$0xff] %v10806_v60  ;;  %v13080_v38 = vld [vmem:[#allocation27_spill] sm:$0xff] }
 0x3b9   : > { %v13066_v34 = vsel %vm10813_vm2, 4294967295, %v13065_v34  ;;  %vm10822_vm5 = vcmp.lt.s32.totalorder %v13069_v52, 16  ;;  %v3667_v5 = vsel %vm13073_vm9, %v10718_v15, %v3666_v8  ;;  %v3350_v57 = vmax.f32 %v3246_v33, 0.0  ;;  %v3073_v15 = vpop.f32.mrb[28].mxu0 }
 0x3ba   : > { %13067 = vst [vmem:[#allocation20_spill] sm:$0xff] %v13066_v34  ;;  %v13071_v41 = vsel %vm10822_vm5, 4294967295, %v13070_v41  ;;  %vm13074_vm0 = vsmask.f32 2304  ;;  %v3871_v44 = vrot.slane %v10806_v60, 3  ;;  %v772_v14 = vshrl.u32 %v10722_v4, 4  ;;  %6094 = vmatmul.mubr.bf16.gmra.mrb[52].mxu1 %v3667_v5 }
 0x3bb   : > { %13072 = vst [vmem:[#allocation24_spill] sm:$0xff] %v13071_v41  ;;  %v5112_v22 = vsel %vm13074_vm0, %v10725_v2, %v5111_v50  ;;  %v3669_v19 = vshrl.u32 %v10806_v60, 16  ;;  %v3672_v10 = vshll.u32 %v10806_v60, 16  ;;  %vm13075_vm6 = vcmp.ne.s32.totalorder %v10774_v55, 0  ;;  %v3075_v0 = vpop.f32.mrb[29].mxu0 }
 0x3bc   : > { %7803 = vmatprep.mubr.bf16.mxu0 %v5112_v22  ;;  %vm10847_vm9 = vmand %vm906_vm7, %vm13075_vm6  ;;  %v10852_v2 = vsub.s32 %v10646_v3, %v762_v20  ;;  %v10855_v12 = vadd.s32 240, %v9762_v30  ;;  %v3457_v4 = vsel %vm10738_vm13, %v3349_v17, 0.0  ;;  %v3458_v43 = vsel %vm10747_vm3, %v3350_v57, 0.0  ;;  %v3076_v25 = vpop.f32.mrb[30].mxu0  ;;  %v8735_v22 = vld [vmem:[#allocation9 + $0xc0] sm:$0xff]   ;;  %v13081_v0 = vld [vmem:[#allocation29_spill] sm:$0xff] }
 0x3bd   : > { %v7967_v24 = vadd.f32 %v10250_v61, %v3073_v15  ;;  %v13078_v33 = vrot.slane %v10731_v16, 3  ;;  %vm13079_vm7 = vcmask 1044480   ;;  %v3491_v51 = vpack.c.bf16 %v3458_v43, %v3457_v4  ;;  %v3078_v28 = vpop.f32.mrb[31].mxu0  ;;  %6223 = vmatpush1.bf16.msra.mxu1 %v8735_v22  ;;  %v4495_v34 = vld [vmem:[#allocation2 + $0x8] sm:$0xf0] }
 0x3be   : > { %v3671_v3 = vrot.slane %v3669_v19, 2  ;;  %v3674_v20 = vrot.slane %v3672_v10, 3  ;;  %v5116_v52 = vrot.slane %v3669_v19, 5  ;;  %v7968_v17 = vadd.f32 %v10250_v61, %v3076_v25  ;;  %6224 = vmatprep.subr.bf16.mxu1 %v10661_v1 }
 0x3bf   : > { %v3872_v60 = vsel %vm13079_vm7, %v13078_v33, %v3871_v44  ;;  %v3251_v11 = vadd.f32 %v7967_v24, %v13080_v38  ;;  %v5119_v57 = vrot.slane %v3672_v10, 6  ;;  %v3533_v15 = vrot.slane %v3491_v51, 4 }
 0x3c0   : > { %v3675_v4 = vor.u32 %v3674_v20, %v3671_v3  ;;  %v10873_v43 = vmul.u32.u64.low 3817748708, %v10855_v12  ;;  %v10874_v19 = vmul.u32.u64.high 3817748708, %v10855_v12, %v10873_v43  ;;  %v3254_v38 = vadd.f32 %v7968_v17, %v13081_v0  ;;  %6101 = vmatprep.mubr.bf16.mxu1 %v3872_v60 }
 0x3c1   : > { %v3351_v40 = vmax.f32 %v3251_v11, 0.0  ;;  %v5120_v24 = vor.u32 %v5119_v57, %v5116_v52  ;;  %v773_v28 = vmul.u32 18, %v772_v14  ;;  %vm13082_vm0 = vcmask 1043456  }
 0x3c2   : > { %v10878_v10 = vsel %vm13082_vm0, %v3531_v46, %v3533_v15  ;;  %vm13083_vm6 = vnez %v12913_v58  ;;  %v13085_v51 = vmov 0  ;;  %v13088_v11 = vsel %vm10411_vm11, %v10380_v37, %v10321_v13  ;;  %v3081_v37 = vpop.f32.mrb[32].mxu0 }
 0x3c3   : > { %v13084_v33 = vsel %vm13083_vm6, %v10311_v56, %v10205_v27  ;;  %vm10894_vm3 = vcmp.lt.s32.totalorder %v13088_v11, 16  ;;  %v13089_v5 = vmov 0  ;;  %vm13092_vm0 = vsmask.f32 5376  ;;  %v8736_v27 = vld [vmem:[#allocation9 + $0xc8] sm:$0xff]   ;;  %3582 = vst [vmem:[#allocation2 + $0x38] sm:$0xff] %v10878_v10 }
 0x3c4   : > { %vm10885_vm7 = vcmp.lt.s32.totalorder %v13084_v33, 16  ;;  %v13090_v5 = vsel %vm10894_vm3, 4294967295, %v13089_v5  ;;  %v3676_v46 = vsel %vm13092_vm0, %v3666_v8, %v3675_v4  ;;  %vm871_vm13 = vcmp.ne.s32.totalorder %v10852_v2, 0  ;;  %v3083_v52 = vpop.f32.mrb[33].mxu0  ;;  %6225 = vmatpush1.bf16.msra.mxu1 %v8736_v27  ;;  %v8737_v33 = vld [vmem:[#allocation9 + $0xd0] sm:$0xff]   ;;  %v13097_v11 = vld [vmem:[#allocation33_spill] sm:$0xff] }
 0x3c5   : > { %v13086_v51 = vsel %vm10885_vm7, 4294967295, %v13085_v51  ;;  %13091 = vst [vmem:[#allocation52_spill] sm:$0xff] %v13090_v5  ;;  %v10901_v56 = vadd.s32 248, %v9762_v30  ;;  %v3352_v58 = vmax.f32 %v3254_v38, 0.0  ;;  %vm13093_vm6 = vsmask.f32 2304  ;;  %6226 = vmatprep.subr.bf16.mxu1 %v10661_v1  ;;  %6102 = vmatmul.mubr.bf16.gmra.mrb[56].mxu1 %v3676_v46 }
 0x3c6   : > { %13087 = vst [vmem:[#allocation26_spill] sm:$0xff] %v13086_v51  ;;  %v5121_v26 = vsel %vm13093_vm6, %v5111_v50, %v5120_v24  ;;  %v12722_v13 = vrot.slane %v10878_v10, 3  ;;  %vm907_vm11 = vcmp.lt.s32.totalorder %v10852_v2, 0  ;;  %v3678_v8 = vshrl.u32 %v10878_v10, 16  ;;  %v3084_v57 = vpop.f32.mrb[34].mxu0  ;;  %v13113_v5 = vld [vmem:[#allocation34_spill] sm:$0xff] }
 0x3c7   : > { %7804 = vmatmul.mubr.bf16.gmra.mrb[76].mxu0 %v5121_v26  ;;  %v3681_v14 = vshll.u32 %v10878_v10, 16  ;;  %v10911_v60 = vadd.s32 18, %v10852_v2  ;;  %v10914_v25 = vadd.s32 256, %v9762_v30  ;;  %v3459_v50 = vsel %vm10813_vm2, %v3351_v40, 0.0  ;;  %vm10928_vm6 = vmand %vm907_vm11, %vm871_vm13 }
 0x3c8   : > { %v3460_v3 = vsel %vm10822_vm5, %v3352_v58, 0.0  ;;  %v7969_v20 = vadd.f32 %v10250_v61, %v3081_v37  ;;  %vm13094_vm0 = vcmask 1044480   ;;  %v3680_v43 = vrot.slane %v3678_v8, 2  ;;  %6227 = vmatpush1.bf16.msra.mxu1 %v8737_v33 }
 0x3c9   : > { %v3874_v22 = vsel %vm13094_vm0, %v3871_v44, %v12722_v13  ;;  %v3492_v17 = vpack.c.bf16 %v3460_v3, %v3459_v50  ;;  %v3683_v0 = vrot.slane %v3681_v14, 3  ;;  %v5125_v38 = vrot.slane %v3678_v8, 5  ;;  %v3086_v44 = vpop.f32.mrb[35].mxu0  ;;  %v13098_v13 = vld [vmem:[#allocation35_spill] sm:$0xff]  ;;  %6228 = vmatprep.subr.bf16.mxu1 %v10661_v1 }
 0x3ca   : > { %v3259_v58 = vadd.f32 %v7969_v20, %v13097_v11  ;;  %v7970_v26 = vadd.f32 %v10250_v61, %v3084_v57  ;;  %v5128_v37 = vrot.slane %v3681_v14, 6  ;;  %v10935_v50 = vsub.s32 %v10705_v39, %v773_v28  ;;  %6109 = vmatprep.mubr.bf16.mxu1 %v3874_v22 }
 0x3cb   : > { %v3535_v8 = vrot.slane %v3492_v17, 4  ;;  %v10938_v3 = vor.u32 %v3683_v0, %v3680_v43  ;;  %v10941_v52 = vmul.u32.u64.low 3817748708, %v10901_v56  ;;  %v10942_v16 = vmul.u32.u64.high 3817748708, %v10901_v56, %v10941_v52 }
 0x3cc   : > { %v3353_v27 = vmax.f32 %v3259_v58, 0.0  ;;  %v3262_v41 = vadd.f32 %v7970_v26, %v13098_v13  ;;  %v10945_v20 = vor.u32 %v5128_v37, %v5125_v38  ;;  %vm13099_vm13 = vcmask 1043456   ;;  %v11005_v26 = vld [vmem:[#allocation2 + $0x10] sm:$0xff] }
 0x3cd   : > { %v10952_v28 = vsel %vm13099_vm13, %v3533_v15, %v3535_v8  ;;  %v13100_v14 = vsel %vm10421_vm12, %v10426_v9, %v10324_v47  ;;  %v13101_v17 = vmov 0  ;;  %v13104_v46 = vsel %vm10435_vm15, %v10460_v29, %v10340_v18  ;;  %v8738_v15 = vld [vmem:[#allocation9 + $0xd8] sm:$0xff]  }
 0x3ce   : > { %vm10959_vm11 = vcmp.lt.s32.totalorder %v13100_v14, 16  ;;  %vm10968_vm0 = vcmp.lt.s32.totalorder %v13104_v46, 16  ;;  %v13105_v13 = vmov 0  ;;  %vm13108_vm13 = vsmask.f32 5376  ;;  %3583 = vst [vmem:[#allocation2 + $0x40] sm:$0xff] %v10952_v28  ;;  %6229 = vmatpush1.bf16.msra.mxu1 %v8738_v15 }
 0x3cf   : > { %v13102_v17 = vsel %vm10959_vm11, 4294967295, %v13101_v17  ;;  %v13106_v13 = vsel %vm10968_vm0, 4294967295, %v13105_v13  ;;  %v3685_v32 = vsel %vm13108_vm13, %v3675_v4, %v10938_v3  ;;  %v3354_v36 = vmax.f32 %v3262_v41, 0.0  ;;  %v3089_v4 = vpop.f32.mrb[36].mxu0  ;;  %6230 = vmatprep.subr.bf16.mxu1 %v10661_v1 }
 0x3d0   : > { %13103 = vst [vmem:[#allocation62_spill] sm:$0xff] %v13102_v17  ;;  %13107 = vst [vmem:[#allocation60_spill] sm:$0xff] %v13106_v13  ;;  %v10975_v47 = vmul.u32.u64.low 3817748708, %v10914_v25  ;;  %v10976_v9 = vmul.u32.u64.high 3817748708, %v10914_v25, %v10975_v47  ;;  %vm13109_vm15 = vsmask.f32 2304  ;;  %v7971_v38 = vadd.f32 %v10250_v61, %v3089_v4  ;;  %6110 = vmatmul.mubr.bf16.gmra.mrb[60].mxu1 %v3685_v32 }
 0x3d1   : > { %v5130_v18 = vsel %vm13109_vm15, %v5120_v24, %v10945_v20  ;;  %v12724_v29 = vrot.slane %v10952_v28, 3  ;;  %v783_v22 = vshrl.u32 %v10874_v19, 4  ;;  %v3687_v57 = vshrl.u32 %v10952_v28, 16  ;;  %v3091_v33 = vpop.f32.mrb[37].mxu0  ;;  %v13112_v47 = vld [vmem:[#allocation32_spill] sm:$0xff] }
 0x3d2   : > { %7807 = vmatprep.mubr.bf16.mxu0 %v5130_v18  ;;  %v3690_v43 = vshll.u32 %v10952_v28, 16  ;;  %v10990_v41 = vadd.s32 18, %v10935_v50  ;;  %v10993_v24 = vadd.s32 264, %v9762_v30  ;;  %v3461_v19 = vsel %vm10885_vm7, %v3353_v27, 0.0  ;;  %v3092_v37 = vpop.f32.mrb[38].mxu0  ;;  %v8739_v27 = vld [vmem:[#allocation9 + $0xe0] sm:$0xff]  }
 0x3d3   : > { %v3462_v0 = vsel %vm10894_vm3, %v3354_v36, 0.0  ;;  %v13110_v11 = vrot.slane %v10878_v10, 3  ;;  %vm13111_vm15 = vcmask 1044480   ;;  %v3689_v52 = vrot.slane %v3687_v57, 2  ;;  %v3094_v4 = vpop.f32.mrb[39].mxu0  ;;  %6231 = vmatpush1.bf16.msra.mxu1 %v8739_v27 }
 0x3d4   : > { %v3493_v44 = vpack.c.bf16 %v3462_v0, %v3461_v19  ;;  %v3692_v14 = vrot.slane %v3690_v43, 3  ;;  %v5134_v46 = vrot.slane %v3687_v57, 5  ;;  %v3267_v36 = vadd.f32 %v7971_v38, %v13112_v47  ;;  %6232 = vmatprep.subr.bf16.mxu1 %v10661_v1 }
 0x3d5   : > { %v3876_v58 = vsel %vm13111_vm15, %v13110_v11, %v12724_v29  ;;  %v7972_v18 = vadd.f32 %v10250_v61, %v3092_v37  ;;  %v5137_v33 = vrot.slane %v3690_v43, 6  ;;  %v784_v39 = vmul.u32 18, %v783_v22 }
 0x3d6   : > { %v3537_v10 = vrot.slane %v3493_v44, 4  ;;  %v3693_v11 = vor.u32 %v3692_v14, %v3689_v52  ;;  %v12729_v29 = vshrl.u32 %v11005_v26, 16  ;;  %v12728_v19 = vshll.u32 %v11005_v26, 16  ;;  %6117 = vmatprep.mubr.bf16.mxu1 %v3876_v58 }
 0x3d7   : > { %v3355_v0 = vmax.f32 %v3267_v36, 0.0  ;;  %v3270_v57 = vadd.f32 %v7972_v18, %v13113_v5  ;;  %v11013_v15 = vor.u32 %v5137_v33, %v5134_v46  ;;  %v794_v38 = vshrl.u32 %v10942_v16, 4 }
 0x3d8   : > { %vm13114_vm15 = vcmask 1043456   ;;  %v13115_v22 = vsel %vm10466_vm8, %v10480_v54, %v10375_v45  ;;  %v13116_v43 = vmov 0  ;;  %v13119_v5 = vsel %vm10486_vm14, %v10495_v21, %v10386_v62  ;;  %v8740_v54 = vld [vmem:[#allocation9 + $0xe8] sm:$0xff]  }
 0x3d9   : > { %v11017_v37 = vsel %vm13114_vm15, %v3535_v8, %v3537_v10  ;;  %vm11024_vm13 = vcmp.lt.s32.totalorder %v13115_v22, 16  ;;  %vm11033_vm12 = vcmp.lt.s32.totalorder %v13119_v5, 16  ;;  %v13120_v32 = vmov 0  ;;  %6233 = vmatpush1.bf16.msra.mxu1 %v8740_v54  ;;  %v8741_v22 = vld [vmem:[#allocation9 + $0xf0] sm:$0xff]  }
 0x3da   : > { %v13117_v43 = vsel %vm11024_vm13, 4294967295, %v13116_v43  ;;  %v13121_v32 = vsel %vm11033_vm12, 4294967295, %v13120_v32  ;;  %vm13123_vm15 = vsmask.f32 5376  ;;  %3584 = vst [vmem:[#allocation2 + $0x48] sm:$0xff] %v11017_v37  ;;  %v3356_v53 = vmax.f32 %v3270_v57, 0.0  ;;  %6234 = vmatprep.subr.bf16.mxu1 %v10661_v1 }
 0x3db   : > { %13118 = vst [vmem:[#allocation53_spill] sm:$0xff] %v13117_v43  ;;  %13122 = vst [vmem:[#allocation23_spill] sm:$0xff] %v13121_v32  ;;  %v3694_v48 = vsel %vm13123_vm15, %v10938_v3, %v3693_v11  ;;  %v11040_v16 = vmul.u32.u64.low 3817748708, %v10993_v24  ;;  %v11041_v45 = vmul.u32.u64.high 3817748708, %v10993_v24, %v11040_v16  ;;  %vm13124_vm8 = vsmask.f32 2304 }
 0x3dc   : > { %v5139_v62 = vsel %vm13124_vm8, %v10945_v20, %v11013_v15  ;;  %v3877_v21 = vrot.slane %v11017_v37, 3  ;;  %v11050_v8 = vsub.s32 %v10855_v12, %v784_v39  ;;  %v3097_v3 = vpop.f32.mrb[40].mxu0  ;;  %v3696_v58 = vshrl.u32 %v11017_v37, 16  ;;  %6118 = vmatmul.mubr.bf16.gmra.mrb[64].mxu1 %v3694_v48 }
 0x3dd   : > { %7808 = vmatmul.mubr.bf16.gmra.mrb[80].mxu0 %v5139_v62  ;;  %v3699_v44 = vshll.u32 %v11017_v37, 16  ;;  %v4526_v52 = vrot.slane %v12729_v29, 4  ;;  %v4529_v14 = vrot.slane %v12728_v19, 5  ;;  %v3463_v20 = vsel %vm10959_vm11, %v3355_v0, 0.0  ;;  %v3099_v46 = vpop.f32.mrb[41].mxu0  ;;  %v13127_v0 = vld [vmem:[#allocation37_spill] sm:$0xff]  ;;  %6235 = vmatpush1.bf16.msra.mxu1 %v8741_v22 }
 0x3de   : > { %v3464_v12 = vsel %vm10968_vm0, %v3356_v53, 0.0  ;;  %v7973_v39 = vadd.f32 %v10250_v61, %v3097_v3  ;;  %v13125_v27 = vrot.slane %v10952_v28, 3  ;;  %vm13126_vm14 = vcmask 1044480   ;;  %v3100_v18 = vpop.f32.mrb[42].mxu0  ;;  %6236 = vmatprep.subr.bf16.mxu1 %v10661_v1 }
 0x3df   : > { %v3494_v36 = vpack.c.bf16 %v3464_v12, %v3463_v20  ;;  %v3698_v4 = vrot.slane %v3696_v58, 2  ;;  %v3701_v33 = vrot.slane %v3699_v44, 3  ;;  %v5143_v57 = vrot.slane %v3696_v58, 5  ;;  %v3102_v53 = vpop.f32.mrb[43].mxu0 }
 0x3e0   : > { %v3878_v47 = vsel %vm13126_vm14, %v13125_v27, %v3877_v21  ;;  %v3275_v5 = vadd.f32 %v7973_v39, %v13127_v0  ;;  %v7974_v16 = vadd.f32 %v10250_v61, %v3100_v18  ;;  %v5146_v62 = vrot.slane %v3699_v44, 6  ;;  %v13132_v44 = vld [vmem:[#allocation39_spill] sm:$0xff]  ;;  %v13135_v27 = vld [vmem:[#allocation77_spill] sm:$0xff]  ;;  %v13142_v0 = vld [vmem:[#allocation78_spill] sm:$0xff]  ;;  %v3105_v53 = vpop.f32.mrb[44].mxu0 }
 0x3e1   : > { %vm13128_vm15 = vcmp.ne.s32.totalorder %v10935_v50, 0  ;;  %vm13129_vm8 = vcmp.lt.s32.totalorder %v10935_v50, 0  ;;  %v795_v3 = vmul.u32 18, %v794_v38  ;;  %v3539_v58 = vrot.slane %v3494_v36, 4  ;;  %v13134_v38 = vld [vmem:[#allocation81_spill] sm:$0xff]  ;;  %6125 = vmatprep.mubr.bf16.mxu1 %v3878_v47 }
 0x3e2   : > { %vm11075_vm0 = vmand %vm13129_vm8, %vm13128_vm15  ;;  %v11080_v54 = vor.u32 %v3701_v33, %v3698_v4  ;;  %vm873_vm14 = vcmp.ne.s32.totalorder %v11050_v8, 0  ;;  %v3357_v61 = vmax.f32 %v3275_v5, 0.0  ;;  %v3278_v20 = vadd.f32 %v7974_v16, %v13132_v44  ;;  %v13141_v33 = vld [vmem:[#allocation82_spill] sm:$0xff] }
 0x3e3   : > { %v5147_v12 = vor.u32 %v5146_v62, %v5143_v57  ;;  %v11085_v39 = vor.u32 %v4529_v14, %v4526_v52  ;;  %vm13133_vm15 = vcmask 1043456   ;;  %v13136_v36 = vsel %vm10501_vm1, %v13134_v38, %v13135_v27  ;;  %v8742_v57 = vld [vmem:[#allocation9 + $0xf8] sm:$0xff]   ;;  %v3107_v27 = vpop.f32.mrb[45].mxu0 }
 0x3e4   : > { %v11088_v46 = vsel %vm13133_vm15, %v3537_v10, %v3539_v58  ;;  %vm11095_vm8 = vcmp.lt.s32.totalorder %v13136_v36, 16  ;;  %v13137_v18 = vmov 0  ;;  %v13143_v48 = vsel %vm10520_vm4, %v13141_v33, %v13142_v0  ;;  %v3108_v4 = vpop.f32.mrb[46].mxu0  ;;  %6237 = vmatpush1.bf16.msra.mxu1 %v8742_v57  ;;  %v13159_v27 = vld [vmem:[#allocation84_spill] sm:$0xff] }
 0x3e5   : > { %v13138_v18 = vsel %vm11095_vm8, 4294967295, %v13137_v18  ;;  %vm11104_vm11 = vcmp.lt.s32.totalorder %v13143_v48, 16  ;;  %v13144_v52 = vmov 0  ;;  %vm13147_vm15 = vsmask.f32 5376  ;;  %3585 = vst [vmem:[#allocation2 + $0x50] sm:$0xff] %v11088_v46  ;;  %6383 = vmatprep.subr.bf16.mxu1 %v10661_v1 }
 0x3e6   : > { %13139 = vst [vmem:[#allocation25_spill] sm:$0xff] %v13138_v18  ;;  %v13145_v52 = vsel %vm11104_vm11, 4294967295, %v13144_v52  ;;  %v3703_v7 = vsel %vm13147_vm15, %v3693_v11, %v11080_v54  ;;  %v11115_v14 = vadd.s32 18, %v11050_v8  ;;  %v3358_v5 = vmax.f32 %v3278_v20, 0.0  ;;  %v13153_v48 = vld [vmem:[#allocation36_spill] sm:$0xff]  ;;  %v3110_v19 = vpop.f32.mrb[47].mxu0 }
 0x3e7   : > { %13146 = vst [vmem:[#allocation64_spill] sm:$0xff] %v13145_v52  ;;  %vm13148_vm1 = vsmask.f32 2304  ;;  %v3879_v47 = vrot.slane %v11088_v46, 3  ;;  %v11122_v11 = vsub.s32 %v10901_v56, %v795_v3  ;;  %v3705_v62 = vshrl.u32 %v11088_v46, 16  ;;  %6126 = vmatmul.mubr.bf16.gmra.mrb[68].mxu1 %v3703_v7  ;;  %v13158_v1 = vld [vmem:[#allocation49_spill] sm:$0xff] }
 0x3e8   : > { %v5148_v16 = vsel %vm13148_vm1, %v11013_v15, %v5147_v12  ;;  %v3708_v22 = vshll.u32 %v11088_v46, 16  ;;  %vm13149_vm4 = vcmp.lt.s32.totalorder %v11050_v8, 0  ;;  %v805_v15 = vshrl.u32 %v10976_v9, 4  ;;  %v11146_v46 = vld [vmem:[%s12633_s2] ss:$0 sm:$0xff] }
 0x3e9   : > { %7811 = vmatprep.mubr.bf16.mxu0 %v5148_v16  ;;  %vm11131_vm15 = vmand %vm13149_vm4, %vm873_vm14  ;;  %v11137_v56 = vadd.s32 272, %v9762_v30  ;;  %v3465_v3 = vsel %vm11024_vm13, %v3357_v61, 0.0  ;;  %v3466_v20 = vsel %vm11033_vm12, %v3358_v5, 0.0  ;;  %v7975_v38 = vadd.f32 %v11146_v46, %v3105_v53  ;;  %v13177_v52 = vld [vmem:[#allocation45_spill] sm:$0xff] }
 0x3ea   : > { %vm13152_vm14 = vcmask 1044480   ;;  %v3495_v36 = vpack.c.bf16 %v3466_v20, %v3465_v3  ;;  %v3707_v33 = vrot.slane %v3705_v62, 2  ;;  %v3710_v0 = vrot.slane %v3708_v22, 3 }
 0x3eb   : > { %v3880_v9 = vsel %vm13152_vm14, %v3877_v21, %v3879_v47  ;;  %v5152_v61 = vrot.slane %v3705_v62, 5  ;;  %v3283_v5 = vadd.f32 %v7975_v38, %v13153_v48  ;;  %v7976_v16 = vadd.f32 %v11146_v46, %v3108_v4  ;;  %v13154_v62 = vld [vmem:[#allocation38_spill] sm:$0xff]  ;;  %v13156_v38 = vld [vmem:[#allocation41_spill] sm:$0xff]  ;;  %v3113_v48 = vpop.f32.mrb[48].mxu0 }
 0x3ec   : > { %v5155_v29 = vrot.slane %v3708_v22, 6  ;;  %v3541_v37 = vrot.slane %v3495_v36, 4  ;;  %v3711_v21 = vor.u32 %v3710_v0, %v3707_v33  ;;  %v11163_v19 = vadd.s32 18, %v11122_v11  ;;  %6133 = vmatprep.mubr.bf16.mxu1 %v3880_v9 }
 0x3ed   : > { %v3359_v57 = vmax.f32 %v3283_v5, 0.0  ;;  %v3286_v3 = vadd.f32 %v7976_v16, %v13154_v62  ;;  %vm13155_vm14 = vcmask 1043456   ;;  %vm13157_vm12 = vnez %v13156_v38  ;;  %v11202_v62 = vld [vmem:[#allocation2 + $0x18] sm:$0xff]  ;;  %v3115_v38 = vpop.f32.mrb[49].mxu0 }
 0x3ee   : > { %v5156_v20 = vor.u32 %v5155_v29, %v5152_v61  ;;  %v11166_v22 = vsel %vm13155_vm14, %v3539_v58, %v3541_v37  ;;  %v13160_v36 = vsel %vm13157_vm12, %v13158_v1, %v13159_v27  ;;  %v13161_v4 = vmov 0 }
 0x3ef   : > { %vm11173_vm13 = vcmp.lt.s32.totalorder %v13160_v36, 16  ;;  %vm13164_vm4 = vnez %v13051_v59  ;;  %v13166_v7 = vmov 0  ;;  %vm13169_vm14 = vsmask.f32 5376  ;;  %3586 = vst [vmem:[#allocation2 + $0x58] sm:$0xff] %v11166_v22  ;;  %v3116_v36 = vpop.f32.mrb[50].mxu0 }
 0x3f0   : > { %v13162_v4 = vsel %vm11173_vm13, 4294967295, %v13161_v4  ;;  %v13165_v29 = vsel %vm13164_vm4, %v10728_v35, %v10618_v49  ;;  %v3712_v58 = vsel %vm13169_vm14, %v11080_v54, %v3711_v21  ;;  %v3360_v61 = vmax.f32 %v3286_v3, 0.0  ;;  %v3118_v38 = vpop.f32.mrb[51].mxu0 }
 0x3f1   : > { %13163 = vst [vmem:[#allocation63_spill] sm:$0xff] %v13162_v4  ;;  %vm11182_vm1 = vcmp.lt.s32.totalorder %v13165_v29, 16  ;;  %v11189_v33 = vmul.u32.u64.low 3817748708, %v11137_v56  ;;  %v11190_v0 = vmul.u32.u64.high 3817748708, %v11137_v56, %v11189_v33  ;;  %vm13170_vm12 = vsmask.f32 2304  ;;  %6134 = vmatmul.mubr.bf16.gmra.mrb[72].mxu1 %v3712_v58 }
 0x3f2   : > { %v13167_v7 = vsel %vm11182_vm1, 4294967295, %v13166_v7  ;;  %v5157_v59 = vsel %vm13170_vm12, %v5147_v12, %v5156_v20  ;;  %v3881_v49 = vrot.slane %v11166_v22, 3  ;;  %v806_v35 = vmul.u32 18, %v805_v15 }
 0x3f3   : > { %13168 = vst [vmem:[#allocation54_spill] sm:$0xff] %v13167_v7  ;;  %7812 = vmatmul.mubr.bf16.gmra.mrb[84].mxu0 %v5157_v59  ;;  %v3714_v9 = vshrl.u32 %v11166_v22, 16  ;;  %v3717_v5 = vshll.u32 %v11166_v22, 16  ;;  %v11200_v16 = vadd.s32 280, %v9762_v30  ;;  %v3467_v3 = vsel %vm11095_vm8, %v3359_v57, 0.0  ;;  %v13176_v59 = vld [vmem:[#allocation43_spill] sm:$0xff] }
 0x3f4   : > { %v3468_v12 = vsel %vm11104_vm11, %v3360_v61, 0.0  ;;  %v7977_v15 = vadd.f32 %v11146_v46, %v3113_v48  ;;  %vm13171_vm4 = vcmask 1044480   ;;  %vm13172_vm14 = vcmp.ne.s32.totalorder %v11122_v11, 0 }
 0x3f5   : > { %v3882_v1 = vsel %vm13171_vm4, %v3879_v47, %v3881_v49  ;;  %vm13173_vm12 = vcmp.lt.s32.totalorder %v11122_v11, 0  ;;  %v3496_v27 = vpack.c.bf16 %v3468_v12, %v3467_v3  ;;  %v3716_v29 = vrot.slane %v3714_v9, 2 }
 0x3f6   : > { %vm11214_vm3 = vmand %vm13173_vm12, %vm13172_vm14  ;;  %v3719_v57 = vrot.slane %v3717_v5, 3  ;;  %v5161_v33 = vrot.slane %v3714_v9, 5  ;;  %v3291_v61 = vadd.f32 %v7977_v15, %v13176_v59  ;;  %v7978_v48 = vadd.f32 %v11146_v46, %v3116_v36  ;;  %6141 = vmatprep.mubr.bf16.mxu1 %v3882_v1 }
 0x3f7   : > { %v5164_v53 = vrot.slane %v3717_v5, 6  ;;  %v12737_v47 = vshrl.u32 %v11202_v62, 16  ;;  %v3543_v10 = vrot.slane %v3496_v27, 4  ;;  %v12736_v3 = vshll.u32 %v11202_v62, 16 }
 0x3f8   : > { %v3720_v54 = vor.u32 %v3719_v57, %v3716_v29  ;;  %v3361_v12 = vmax.f32 %v3291_v61, 0.0  ;;  %v3294_v9 = vadd.f32 %v7978_v48, %v13177_v52  ;;  %v11228_v36 = vsub.s32 %v10914_v25, %v806_v35 }
 0x3f9   : > { %v5165_v15 = vor.u32 %v5164_v53, %v5161_v33  ;;  %vm13178_vm14 = vcmask 1043456   ;;  %v13179_v27 = vsel %vm10798_vm10, %v10761_v42, %v10702_v31  ;;  %v13180_v29 = vmov 0 }
 0x3fa   : > { %v11231_v5 = vsel %vm13178_vm14, %v3541_v37, %v3543_v10  ;;  %vm11238_vm12 = vcmp.lt.s32.totalorder %v13179_v27, 16  ;;  %v13183_v52 = vsel %vm10847_vm9, %v10833_v23, %v10774_v55  ;;  %v13184_v25 = vmov 0  ;;  %v3121_v23 = vpop.f32.mrb[52].mxu0  ;;  %vm13189_vm9 = vmmov %vm13171_vm4 }
 0x3fb   : > { %v13181_v29 = vsel %vm11238_vm12, 4294967295, %v13180_v29  ;;  %vm11247_vm11 = vcmp.lt.s32.totalorder %v13183_v52, 16  ;;  %vm13187_vm14 = vsmask.f32 5376  ;;  %3587 = vst [vmem:[#allocation2 + $0x60] sm:$0xff] %v11231_v5  ;;  %v3362_v31 = vmax.f32 %v3294_v9, 0.0 }
 0x3fc   : > { %13182 = vst [vmem:[#allocation66_spill] sm:$0xff] %v13181_v29  ;;  %v13185_v25 = vsel %vm11247_vm11, 4294967295, %v13184_v25  ;;  %v3721_v53 = vsel %vm13187_vm14, %v3711_v21, %v3720_v54  ;;  %v11253_v63 = vmul.u32.u64.low 3817748708, %v11200_v16  ;;  %v11254_v37 = vmul.u32.u64.high 3817748708, %v11200_v16, %v11253_v63  ;;  %v3123_v59 = vpop.f32.mrb[53].mxu0  ;;  %v13190_v52 = vld [vmem:[#allocation42_spill] sm:$0xff] }
 0x3fd   : > { %13186 = vst [vmem:[#allocation65_spill] sm:$0xff] %v13185_v25  ;;  %vm13188_vm10 = vsmask.f32 2304  ;;  %v3883_v6 = vrot.slane %v11231_v5, 3  ;;  %v4535_v55 = vrot.slane %v12737_v47, 4  ;;  %v3723_v58 = vshrl.u32 %v11231_v5, 16  ;;  %6142 = vmatmul.mubr.bf16.gmra.mrb[76].mxu1 %v3721_v53 }
 0x3fe   : > { %v5166_v42 = vsel %vm13188_vm10, %v5156_v20, %v5165_v15  ;;  %v3726_v21 = vshll.u32 %v11231_v5, 16  ;;  %v4538_v35 = vrot.slane %v12736_v3, 5  ;;  %v3469_v57 = vsel %vm11173_vm13, %v3361_v12, 0.0  ;;  %v3124_v38 = vpop.f32.mrb[54].mxu0  ;;  %v8754_v29 = vld [vmem:[#allocation9 + $0x158] sm:$0xff]  }
 0x3ff   : > { %7815 = vmatprep.mubr.bf16.mxu0 %v5166_v42  ;;  %v3470_v20 = vsel %vm11182_vm1, %v3362_v31, 0.0  ;;  %v7979_v33 = vadd.f32 %v11146_v46, %v3121_v23  ;;  %v3884_v61 = vsel %vm13189_vm9, %v3881_v49, %v3883_v6  ;;  %v3725_v9 = vrot.slane %v3723_v58, 2  ;;  %v3126_v3 = vpop.f32.mrb[55].mxu0 }
 0x400   : > { %v3497_v48 = vpack.c.bf16 %v3470_v20, %v3469_v57  ;;  %v3728_v5 = vrot.slane %v3726_v21, 3  ;;  %v5170_v27 = vrot.slane %v3723_v58, 5  ;;  %v7980_v42 = vadd.f32 %v11146_v46, %v3124_v38  ;;  %v13192_v57 = vld [vmem:[#allocation44_spill] sm:$0xff]  ;;  %6149 = vmatprep.mubr.bf16.mxu1 %v3884_v61 }
 0x401   : > { %v3299_v63 = vadd.f32 %v7979_v33, %v13190_v52  ;;  %v5173_v47 = vrot.slane %v3726_v21, 6  ;;  %v12739_v12 = vrot.slane %v11005_v26, 4  ;;  %v13191_v23 = vshrl.u32 %v11041_v45, 4 }
 0x402   : > { %v3545_v30 = vrot.slane %v3497_v48, 4  ;;  %v3729_v31 = vor.u32 %v3728_v5, %v3725_v9  ;;  %v11278_v1 = vor.u32 %v4538_v35, %v4535_v55  ;;  %v3302_v20 = vadd.f32 %v7980_v42, %v13192_v57 }
 0x403   : > { %v817_v59 = vmul.u32 18, %v13191_v23  ;;  %v3363_v49 = vmax.f32 %v3299_v63, 0.0  ;;  %v5174_v58 = vor.u32 %v5173_v47, %v5170_v27  ;;  %v13193_v33 = vrot.slane %v11202_v62, 4  ;;  %v11334_v27 = vld [vmem:[#allocation2 + $0x20] sm:$0xff] }
 0x404   : > { %vm13194_vm14 = vcmask 1043456   ;;  %v13196_v45 = vsel %vm10928_vm6, %v10911_v60, %v10852_v2  ;;  %v13197_v55 = vmov 0  ;;  %v13200_v47 = vsel %vm11075_vm0, %v10990_v41, %v10935_v50  ;;  %v3129_v41 = vpop.f32.mrb[56].mxu0 }
 0x405   : > { %v11286_v3 = vsel %vm13194_vm14, %v12739_v12, %v13193_v33  ;;  %vm13195_vm10 = vmmov %vm13194_vm14  ;;  %vm11296_vm9 = vcmp.lt.s32.totalorder %v13196_v45, 16  ;;  %vm11305_vm4 = vcmp.lt.s32.totalorder %v13200_v47, 16  ;;  %v13201_v53 = vmov 0  ;;  %v3131_v9 = vpop.f32.mrb[57].mxu0 }
 0x406   : > { %v11289_v21 = vsel %vm13195_vm10, %v3543_v10, %v3545_v30  ;;  %v13198_v55 = vsel %vm11296_vm9, 4294967295, %v13197_v55  ;;  %v13202_v53 = vsel %vm11305_vm4, 4294967295, %v13201_v53  ;;  %vm13204_vm14 = vsmask.f32 5376  ;;  %v3132_v63 = vpop.f32.mrb[58].mxu0 }
 0x407   : > { %13199 = vst [vmem:[#allocation56_spill] sm:$0xff] %v13198_v55  ;;  %13203 = vst [vmem:[#allocation28_spill] sm:$0xff] %v13202_v53  ;;  %v3730_v10 = vsel %vm13204_vm14, %v3720_v54, %v3729_v31  ;;  %vm875_vm10 = vcmp.ne.s32.totalorder %v11228_v36, 0  ;;  %vm13205_vm6 = vsmask.f32 3328  ;;  %v3364_v60 = vmax.f32 %v3302_v20, 0.0 }
 0x408   : > { %v11314_v2 = vsel %vm13205_vm6, %v11085_v39, %v11278_v1  ;;  %3588 = vst [vmem:[#allocation2 + $0x68] sm:$0xff] %v11289_v21  ;;  %vm13206_vm1 = vsmask.f32 2304  ;;  %v3885_v50 = vrot.slane %v11289_v21, 3  ;;  %vm911_vm0 = vcmp.lt.s32.totalorder %v11228_v36, 0  ;;  %6150 = vmatmul.mubr.bf16.gmra.mrb[80].mxu1 %v3730_v10 }
 0x409   : > { %v5175_v40 = vsel %vm13206_vm1, %v5165_v15, %v5174_v58  ;;  %v3732_v28 = vshrl.u32 %v11289_v21, 16  ;;  %v3735_v54 = vshll.u32 %v11289_v21, 16  ;;  %v11323_v35 = vadd.s32 18, %v11228_v36  ;;  %vm11340_vm14 = vmand %vm911_vm0, %vm875_vm10 }
 0x40a   : > { %7816 = vmatmul.mubr.bf16.gmra.mrb[88].mxu0 %v5175_v40  ;;  %v11326_v61 = vsub.s32 %v10993_v24, %v817_v59  ;;  %v3471_v48 = vsel %vm11238_vm12, %v3363_v49, 0.0  ;;  %v3472_v15 = vsel %vm11247_vm11, %v3364_v60, 0.0  ;;  %v7981_v38 = vadd.f32 %v11146_v46, %v3129_v41  ;;  %v13210_v59 = vld [vmem:[#allocation57_spill] sm:$0xff] }
 0x40b   : > { %vm13207_vm1 = vcmask 1044480   ;;  %v3498_v52 = vpack.c.bf16 %v3472_v15, %v3471_v48  ;;  %v3734_v42 = vrot.slane %v3732_v28, 2  ;;  %v3737_v23 = vrot.slane %v3735_v54, 3 }
 0x40c   : > { %v3886_v5 = vsel %vm13207_vm1, %v3883_v6, %v3885_v50  ;;  %v5179_v57 = vrot.slane %v3732_v28, 5  ;;  %v3307_v49 = vadd.f32 %v7981_v38, %v13210_v59  ;;  %v7982_v20 = vadd.f32 %v11146_v46, %v3132_v63  ;;  %v3134_v6 = vpop.f32.mrb[59].mxu0  ;;  %v13211_v28 = vld [vmem:[#allocation59_spill] sm:$0xff] }
 0x40d   : > { %v5182_v33 = vrot.slane %v3735_v54, 6  ;;  %v827_v21 = vshrl.u32 %v11190_v0, 4  ;;  %v3547_v45 = vrot.slane %v3498_v52, 4  ;;  %v3738_v47 = vor.u32 %v3737_v23, %v3734_v42  ;;  %6157 = vmatprep.mubr.bf16.mxu1 %v3886_v5 }
 0x40e   : > { %v12744_v60 = vshrl.u32 %v11334_v27, 16  ;;  %v12743_v40 = vshll.u32 %v11334_v27, 16  ;;  %v3365_v41 = vmax.f32 %v3307_v49, 0.0  ;;  %v3310_v48 = vadd.f32 %v7982_v20, %v13211_v28  ;;  %v13224_v28 = vld [vmem:[#allocation55_spill] sm:$0xff] }
 0x40f   : > { %v5183_v15 = vor.u32 %v5182_v33, %v5179_v57  ;;  %v1019_v38 = vsel %vm11340_vm14, %v11323_v35, %v11228_v36  ;;  %vm13212_vm10 = vcmask 1043456   ;;  %v13213_v0 = vsel %vm11131_vm15, %v11115_v14, %v11050_v8 }
 0x410   : > { %v11355_v54 = vsel %vm13212_vm10, %v3545_v30, %v3547_v45  ;;  %vm11362_vm6 = vcmp.lt.s32.totalorder %v13213_v0, 16  ;;  %v13214_v9 = vmov 0  ;;  %v13217_v10 = vsel %vm11214_vm3, %v11163_v19, %v11122_v11  ;;  %v3137_v11 = vpop.f32.mrb[60].mxu0 }
 0x411   : > { %v13215_v9 = vsel %vm11362_vm6, 4294967295, %v13214_v9  ;;  %vm11371_vm0 = vcmp.lt.s32.totalorder %v13217_v10, 16  ;;  %v13218_v52 = vmov 0  ;;  %vm13221_vm1 = vsmask.f32 5376  ;;  %3589 = vst [vmem:[#allocation2 + $0x70] sm:$0xff] %v11355_v54 }
 0x412   : > { %13216 = vst [vmem:[#allocation30_spill] sm:$0xff] %v13215_v9  ;;  %v13219_v52 = vsel %vm11371_vm0, 4294967295, %v13218_v52  ;;  %v3739_v30 = vsel %vm13221_vm1, %v3729_v31, %v3738_v47  ;;  %v838_v8 = vshrl.u32 %v11254_v37, 4  ;;  %v3366_v14 = vmax.f32 %v3310_v48, 0.0  ;;  %v3139_v57 = vpop.f32.mrb[61].mxu0 }
 0x413   : > { %13220 = vst [vmem:[#allocation70_spill] sm:$0xff] %v13219_v52  ;;  %vm13222_vm15 = vsmask.f32 2304  ;;  %v3887_v22 = vrot.slane %v11355_v54, 3  ;;  %v828_v63 = vmul.u32 18, %v827_v21  ;;  %v3741_v19 = vshrl.u32 %v11355_v54, 16  ;;  %6158 = vmatmul.mubr.bf16.gmra.mrb[84].mxu1 %v3739_v30 }
 0x414   : > { %v5184_v44 = vsel %vm13222_vm15, %v5174_v58, %v5183_v15  ;;  %v3744_v5 = vshll.u32 %v11355_v54, 16  ;;  %v4544_v31 = vrot.slane %v12744_v60, 4  ;;  %v4547_v37 = vrot.slane %v12743_v40, 5  ;;  %v3140_v20 = vpop.f32.mrb[62].mxu0  ;;  %vm13226_vm15 = vmmov %vm13212_vm10 }
 0x415   : > { %7819 = vmatprep.mubr.bf16.mxu0 %v5184_v44  ;;  %v3473_v42 = vsel %vm11296_vm9, %v3365_v41, 0.0  ;;  %v3474_v58 = vsel %vm11305_vm4, %v3366_v14, 0.0  ;;  %v7983_v23 = vadd.f32 %v11146_v46, %v3137_v11  ;;  %vm13223_vm3 = vcmask 1044480   ;;  %v3142_v0 = vpop.f32.mrb[63].mxu0 }
 0x416   : > { %v3888_v59 = vsel %vm13223_vm3, %v3885_v50, %v3887_v22  ;;  %v3499_v49 = vpack.c.bf16 %v3474_v58, %v3473_v42  ;;  %v3743_v6 = vrot.slane %v3741_v19, 2  ;;  %v3746_v33 = vrot.slane %v3744_v5, 3  ;;  %v13225_v42 = vld [vmem:[#allocation58_spill] sm:$0xff] }
 0x417   : > { %v5188_v21 = vrot.slane %v3741_v19, 5  ;;  %v3315_v48 = vadd.f32 %v7983_v23, %v13224_v28  ;;  %v7984_v54 = vadd.f32 %v11146_v46, %v3140_v20  ;;  %v5191_v10 = vrot.slane %v3744_v5, 6  ;;  %6165 = vmatprep.mubr.bf16.mxu1 %v3888_v59 }
 0x418   : > { %v839_v41 = vmul.u32 18, %v838_v8  ;;  %v3549_v44 = vrot.slane %v3499_v49, 4  ;;  %v3747_v12 = vor.u32 %v3746_v33, %v3743_v6  ;;  %v11396_v14 = vsub.s32 %v11137_v56, %v828_v63 }
 0x419   : > { %v11398_v11 = vor.u32 %v4547_v37, %v4544_v31  ;;  %v3367_v50 = vmax.f32 %v3315_v48, 0.0  ;;  %v3318_v58 = vadd.f32 %v7984_v54, %v13225_v42  ;;  %vm912_vm1 = vcmp.lt.s32.totalorder %v11326_v61, 0  ;;  %v3145_v37 = vpop.f32.mrb[64].mxu0  ;;  %v13234_v54 = vld [vmem:[#allocation72_spill] sm:$0xff] }
 0x41a   : > { %v5192_v19 = vor.u32 %v5191_v10, %v5188_v21  ;;  %v11403_v23 = vsel %vm13226_vm15, %v3547_v45, %v3549_v44  ;;  %v984_v5 = vadd.s32 18, %v11326_v61  ;;  %vm13227_vm3 = vsmask.f32 5376  ;;  %v3147_v49 = vpop.f32.mrb[65].mxu0 }
 0x41b   : > { %v3748_v8 = vsel %vm13227_vm3, %v3738_v47, %v3747_v12  ;;  %vm13228_vm10 = vsmask.f32 3328  ;;  %3590 = vst [vmem:[#allocation2 + $0x78] sm:$0xff] %v11403_v23  ;;  %v3368_v63 = vmax.f32 %v3318_v58, 0.0  ;;  %vm13229_vm4 = vsmask.f32 2304 }
 0x41c   : > { %v11410_v56 = vsel %vm13228_vm10, %v11278_v1, %v11398_v11  ;;  %v5193_v30 = vsel %vm13229_vm4, %v5183_v15, %v5192_v19  ;;  %v11415_v31 = vsub.s32 %v11200_v16, %v839_v41  ;;  %v3889_v45 = vrot.slane %v11403_v23, 3  ;;  %v3148_v33 = vpop.f32.mrb[66].mxu0  ;;  %6166 = vmatmul.mubr.bf16.gmra.mrb[88].mxu1 %v3748_v8 }
 0x41d   : > { %vm13230_vm15 = vcmp.ne.s32.totalorder %v11326_v61, 0  ;;  %7820 = vmatmul.mubr.bf16.gmra.mrb[92].mxu0 %v5193_v30  ;;  %vm877_vm10 = vcmp.ne.s32.totalorder %v11396_v14, 0  ;;  %vm913_vm3 = vcmp.lt.s32.totalorder %v11396_v14, 0  ;;  %v3750_v1 = vshrl.u32 %v11403_v23, 16  ;;  %v13235_v30 = vld [vmem:[#allocation76_spill] sm:$0xff] }
 0x41e   : > { %vm11420_vm9 = vmand %vm912_vm1, %vm13230_vm15  ;;  %v3753_v15 = vshll.u32 %v11403_v23, 16  ;;  %v3475_v16 = vsel %vm11362_vm6, %v3367_v50, 0.0  ;;  %v3476_v57 = vsel %vm11371_vm0, %v3368_v63, 0.0  ;;  %v7985_v59 = vadd.f32 %v11146_v46, %v3145_v37  ;;  %v3150_v50 = vpop.f32.mrb[67].mxu0 }
 0x41f   : > { %vm13233_vm4 = vcmask 1044480   ;;  %v3500_v6 = vpack.c.bf16 %v3476_v57, %v3475_v16  ;;  %v3752_v21 = vrot.slane %v3750_v1, 2  ;;  %v5197_v48 = vrot.slane %v3750_v1, 5  ;;  %vm11446_vm15 = vmand %vm913_vm3, %vm877_vm10  ;;  %v3153_v35 = vpop.f32.mrb[68].mxu0  ;;  %v13252_v1 = vld [vmem:[#allocation73_spill] sm:$0xff] }
 0x420   : > { %v3890_v20 = vsel %vm13233_vm4, %v3887_v22, %v3889_v45  ;;  %v3755_v28 = vrot.slane %v3753_v15, 3  ;;  %v3323_v0 = vadd.f32 %v7985_v59, %v13234_v54  ;;  %v7986_v10 = vadd.f32 %v11146_v46, %v3148_v33 }
 0x421   : > { %v1020_v41 = vsel %vm11420_vm9, %v984_v5, %v11326_v61  ;;  %v5200_v42 = vrot.slane %v3753_v15, 6  ;;  %v3551_v58 = vrot.slane %v3500_v6, 4  ;;  %v985_v23 = vadd.s32 18, %v11396_v14  ;;  %6173 = vmatprep.mubr.bf16.mxu1 %v3890_v20  ;;  %v3155_v6 = vpop.f32.mrb[69].mxu0 }
 0x422   : > { %v3756_v22 = vor.u32 %v3755_v28, %v3752_v21  ;;  %v3369_v63 = vmax.f32 %v3323_v0, 0.0  ;;  %v3326_v37 = vadd.f32 %v7986_v10, %v13235_v30  ;;  %vm914_vm9 = vcmp.lt.s32.totalorder %v11415_v31, 0  ;;  %v3156_v21 = vpop.f32.mrb[70].mxu0  ;;  %v13251_v0 = vld [vmem:[#allocation71_spill] sm:$0xff] }
 0x423   : > { %v5201_v61 = vor.u32 %v5200_v42, %v5197_v48  ;;  %vm13238_vm4 = vcmask 1043456   ;;  %vm11457_vm1 = vcmp.lt.s32.totalorder %v1019_v38, 16  ;;  %v13239_v8 = vmov 0  ;;  %v3158_v42 = vpop.f32.mrb[71].mxu0 }
 0x424   : > { %v3552_v5 = vsel %vm13238_vm4, %v3549_v44, %v3551_v58  ;;  %v13240_v8 = vsel %vm11457_vm1, 4294967295, %v13239_v8  ;;  %vm11461_vm0 = vcmp.lt.s32.totalorder %v1020_v41, 16  ;;  %v13242_v47 = vmov 0 }
 0x425   : > { %13241 = vst [vmem:[#allocation67_spill] sm:$0xff] %v13240_v8  ;;  %v13243_v47 = vsel %vm11461_vm0, 4294967295, %v13242_v47  ;;  %vm13245_vm10 = vsmask.f32 5376  ;;  %3591 = vst [vmem:[#allocation2 + $0x80] sm:$0xff] %v3552_v5  ;;  %v3370_v16 = vmax.f32 %v3326_v37, 0.0  ;;  %v1021_v36 = vsel %vm11446_vm15, %v985_v23, %v11396_v14 }
 0x426   : > { %13244 = vst [vmem:[#allocation61_spill] sm:$0xff] %v13243_v47  ;;  %v3757_v15 = vsel %vm13245_vm10, %v3747_v12, %v3756_v22  ;;  %v986_v44 = vadd.s32 18, %v11415_v31  ;;  %vm13246_vm3 = vsmask.f32 2304  ;;  %v3891_v57 = vrot.slane %v3552_v5, 3 }
 0x427   : > { %v5202_v24 = vsel %vm13246_vm3, %v5192_v19, %v5201_v61  ;;  %vm13247_vm14 = vcmp.ne.s32.totalorder %v11415_v31, 0  ;;  %v3759_v12 = vshrl.u32 %v3552_v5, 16  ;;  %v3762_v59 = vshll.u32 %v3552_v5, 16  ;;  %6174 = vmatmul.mubr.bf16.gmra.mrb[92].mxu1 %v3757_v15 }
 0x428   : > { %vm11473_vm4 = vmand %vm914_vm9, %vm13247_vm14  ;;  %7823 = vmatprep.mubr.bf16.mxu0 %v5202_v24  ;;  %v3477_v49 = vsel %vm11457_vm1, %v3369_v63, 0.0  ;;  %v3478_v19 = vsel %vm11461_vm0, %v3370_v16, 0.0  ;;  %v7987_v20 = vadd.f32 %v11146_v46, %v3153_v35  ;;  %vm13250_vm15 = vcmask 1044480  }
 0x429   : > { %v3892_v14 = vsel %vm13250_vm15, %v3889_v45, %v3891_v57  ;;  %v3501_v33 = vpack.c.bf16 %v3478_v19, %v3477_v49  ;;  %v3761_v28 = vrot.slane %v3759_v12, 2  ;;  %v3764_v48 = vrot.slane %v3762_v59, 3 }
 0x42a   : > { %v5206_v54 = vrot.slane %v3759_v12, 5  ;;  %v3331_v10 = vadd.f32 %v7987_v20, %v13251_v0  ;;  %v1022_v41 = vsel %vm11473_vm4, %v986_v44, %v11415_v31  ;;  %v7988_v50 = vadd.f32 %v11146_v46, %v3156_v21  ;;  %6181 = vmatprep.mubr.bf16.mxu1 %v3892_v14  ;;  %v3933_v20 = vld [vmem:[#allocation2] sm:$0xf8]  ;;  %v4159_v14 = vld [vmem:[#allocation2 + $0x8] sm:$0xf8] }
 0x42b   : > { %v5209_v23 = vrot.slane %v3762_v59, 6  ;;  %v3553_v63 = vrot.slane %v3501_v33, 4  ;;  %v3765_v30 = vor.u32 %v3764_v48, %v3761_v28  ;;  %vm13253_vm9 = vcmask 1043456   ;;  %v3934_v48 = vld [vmem:[#allocation2 + $0x8] sm:$0xff] }
 0x42c   : > { %v3371_v37 = vmax.f32 %v3331_v10, 0.0  ;;  %v3334_v45 = vadd.f32 %v7988_v50, %v13252_v1  ;;  %vm11492_vm10 = vcmp.lt.s32.totalorder %v1021_v36, 16  ;;  %v13254_v24 = vmov 0  ;;  %v5076_v50 = vld [vmem:[#allocation2 + $0xa0] sm:$0x3f] }
 0x42d   : > { %v5210_v5 = vor.u32 %v5209_v23, %v5206_v54  ;;  %v11490_v16 = vsel %vm13253_vm9, %v3551_v58, %v3553_v63  ;;  %v13255_v24 = vsel %vm11492_vm10, 4294967295, %v13254_v24  ;;  %vm11496_vm3 = vcmp.lt.s32.totalorder %v1022_v41, 16 }
 0x42e   : > { %13256 = vst [vmem:[#allocation27_spill] sm:$0xff] %v13255_v24  ;;  %v13257_v31 = vmov 0  ;;  %vm13260_vm14 = vsmask.f32 5376  ;;  %3592 = vst [vmem:[#allocation2 + $0x88] sm:$0xff] %v11490_v16  ;;  %v3372_v44 = vmax.f32 %v3334_v45, 0.0 }
 0x42f   : > { %v13258_v31 = vsel %vm11496_vm3, 4294967295, %v13257_v31  ;;  %v3766_v46 = vsel %vm13260_vm14, %v3756_v22, %v3765_v30  ;;  %vm13261_vm4 = vsmask.f32 2304  ;;  %v3893_v35 = vrot.slane %v11490_v16, 3 }
 0x430   : > { %13259 = vst [vmem:[#allocation29_spill] sm:$0xff] %v13258_v31  ;;  %v5211_v15 = vsel %vm13261_vm4, %v5201_v61, %v5210_v5  ;;  %v3768_v58 = vshrl.u32 %v11490_v16, 16  ;;  %v3771_v36 = vshll.u32 %v11490_v16, 16  ;;  %v3479_v38 = vsel %vm11492_vm10, %v3371_v37, 0.0  ;;  %6182 = vmatmul.mubr.bf16.gmra.mrb[96].mxu1 %v3766_v46 }
 0x431   : > { %7824 = vmatmul.mubr.bf16.gmra.mrb[96].mxu0 %v5211_v15  ;;  %v3480_v12 = vsel %vm11496_vm3, %v3372_v44, 0.0  ;;  %v3894_v22 = vsel %vm13250_vm15, %v3891_v57, %v3893_v35  ;;  %v3954_v10 = vshrl.u32 %v3933_v20, 16  ;;  %v3957_v41 = vshll.u32 %v3933_v20, 16 }
 0x432   : > { %v3502_v59 = vpack.c.bf16 %v3480_v12, %v3479_v38  ;;  %v3770_v49 = vrot.slane %v3768_v58, 2  ;;  %v3773_v61 = vrot.slane %v3771_v36, 3  ;;  %v5215_v19 = vrot.slane %v3768_v58, 5  ;;  %6189 = vmatprep.mubr.bf16.mxu1 %v3894_v22 }
 0x433   : > { %v5218_v6 = vrot.slane %v3771_v36, 6  ;;  %v4324_v33 = vrot.slane %v3768_v58, 3  ;;  %v4327_v54 = vrot.slane %v3771_v36, 4  ;;  %v4179_v23 = vshrl.u32 %v4159_v14, 16 }
 0x434   : > { %v3555_v21 = vrot.slane %v3502_v59, 4  ;;  %v11513_v28 = vor.u32 %v3773_v61, %v3770_v49  ;;  %v3962_v46 = vshrl.u32 %v3934_v48, 16  ;;  %vm3952_vm15 = vsmask.f32 4352 }
 0x435   : > { %v5219_v0 = vor.u32 %v5218_v6, %v5215_v19  ;;  %v11518_v37 = vor.u32 %v4327_v54, %v4324_v33  ;;  %v3965_v15 = vshll.u32 %v3934_v48, 16  ;;  %v5240_v58 = vshrl.u32 %v5076_v50, 16 }
 0x436   : > { %v3556_v57 = vsel %vm13253_vm9, %v3553_v63, %v3555_v21  ;;  %3594 = vst [vmem:[#allocation2 + $0x98] sm:$0xf] %v3555_v21  ;;  %v3775_v42 = vsel %vm13260_vm14, %v3765_v30, %v11513_v28  ;;  %v5243_v36 = vshll.u32 %v5076_v50, 16  ;;  %v4181_v59 = vrot.slane %v4179_v23, 3  ;;  %vm13264_vm9 = vmmov %vm13261_vm4 }
 0x437   : > { %3593 = vst [vmem:[#allocation2 + $0x90] sm:$0xff] %v3556_v57  ;;  %v5220_v1 = vsel %vm13261_vm4, %v5210_v5, %v5219_v0  ;;  %v5222_v45 = vshrl.u32 %v3556_v57, 16  ;;  %v5225_v44 = vshll.u32 %v3556_v57, 16  ;;  %v4182_v30 = vshll.u32 %v4159_v14, 16 }
 0x438   : > { %7827 = vmatprep.mubr.bf16.mxu0 %v5220_v1  ;;  %v3956_v49 = vrot.slane %v3954_v10, 3  ;;  %v3959_v61 = vrot.slane %v3957_v41, 4  ;;  %v13262_v20 = vshrl.u32 %v11005_v26, 16  ;;  %v3964_v6 = vrot.slane %v3962_v46, 3  ;;  %6190 = vmatmul.mubr.bf16.gmra.mrb[100].mxu1 %v3775_v42 }
 0x439   : > { %v5224_v63 = vrot.slane %v5222_v45, 5  ;;  %v5227_v38 = vrot.slane %v5225_v44, 6  ;;  %v4333_v12 = vrot.slane %v5222_v45, 3  ;;  %v4336_v22 = vrot.slane %v5225_v44, 4 }
 0x43a   : > { %v4189_v5 = vrot.slane %v13262_v20, 3  ;;  %v13263_v21 = vshll.u32 %v11005_v26, 16  ;;  %v3967_v54 = vrot.slane %v3965_v15, 4  ;;  %v5242_v50 = vrot.slane %v5240_v58, 5 }
 0x43b   : > { %v5228_v19 = vor.u32 %v5227_v38, %v5224_v63  ;;  %v11523_v33 = vor.u32 %v4336_v22, %v4333_v12  ;;  %v5245_v57 = vrot.slane %v5243_v36, 6  ;;  %v13265_v14 = vshrl.u32 %v11202_v62, 16 }
 0x43c   : > { %v4192_v48 = vrot.slane %v13263_v21, 4  ;;  %v13266_v41 = vshll.u32 %v11202_v62, 16  ;;  %v3960_v42 = vor.u32 %v3959_v61, %v3956_v49  ;;  %v4184_v12 = vrot.slane %v4182_v30, 4  ;;  %v11548_v30 = vld [vmem:[#allocation2 + $0x60] sm:$0xff] }
 0x43d   : > { %v5229_v1 = vsel %vm13264_vm9, %v5219_v0, %v5228_v19  ;;  %v5075_v23 = vld [vmem:[#allocation2 + $0x98] sm:$0xff]  ;;  %v4198_v10 = vrot.slane %v13265_v14, 3  ;;  %v11535_v44 = vsel %vm3952_vm15, %v11518_v37, %v11523_v33  ;;  %v11537_v21 = vor.u32 %v3967_v54, %v3964_v6  ;;  %vm13268_vm9 = vmmov %vm13261_vm4 }
 0x43e   : > { %v4201_v45 = vrot.slane %v13266_v41, 4  ;;  %v3839_v46 = vld [vmem:[#allocation2 + $0x90] sm:$0x7]  ;;  %7828 = vmatmul.mubr.bf16.gmra.mrb[100].mxu0 %v5229_v1  ;;  %v5231_v15 = vshrl.u32 %v5075_v23, 16  ;;  %v5234_v58 = vshll.u32 %v5075_v23, 16  ;;  %v5246_v14 = vor.u32 %v5245_v57, %v5242_v50  ;;  %v11539_v41 = vld [vmem:[#allocation2 + $0x58] sm:$0xff] }
 0x43f   : > { %v3613_v63 = vld [vmem:[#allocation2 + $0x90] sm:$0x7]  ;;  %v3895_v36 = vrot.slane %v3839_v46, 3  ;;  %vm13267_vm14 = vcmask 1044480   ;;  %v11544_v31 = vor.u32 %v4192_v48, %v4189_v5  ;;  %v4185_v6 = vor.u32 %v4184_v12, %v4181_v59  ;;  %v11551_v50 = vld [vmem:[#allocation2 + $0x68] sm:$0xff] }
 0x440   : > { %v3777_v0 = vshrl.u32 %v3613_v63, 16  ;;  %v3780_v38 = vshll.u32 %v3613_v63, 16  ;;  %v5233_v22 = vrot.slane %v5231_v15, 5  ;;  %v5236_v20 = vrot.slane %v5234_v58, 6  ;;  %v11558_v48 = vld [vmem:[#allocation2 + $0x70] sm:$0xff]  ;;  %v11583_v12 = vld [vmem:[#allocation2 + $0x88] sm:$0xff] }
 0x441   : > { %v3896_v40 = vsel %vm13267_vm14, %v3893_v35, %v3895_v36  ;;  %v11546_v61 = vor.u32 %v4201_v45, %v4198_v10  ;;  %v12749_v54 = vshrl.u32 %v11539_v41, 16  ;;  %v3969_v35 = vsel %vm3952_vm15, %v3960_v42, %v11537_v21  ;;  %v11566_v10 = vld [vmem:[#allocation2 + $0x78] sm:$0xff]  ;;  %v11568_v45 = vld [vmem:[#allocation2 + $0x80] sm:$0xff]  ;;  %v3951_v13 = vld [vmem:[#allocation2 + $0x90] sm:$0xf] }
 0x442   : > { %v3779_v60 = vrot.slane %v3777_v0, 2  ;;  %v3782_v1 = vrot.slane %v3780_v38, 3  ;;  %6197 = vmatprep.mubr.bf16.mxu1 %v3896_v40  ;;  %v5237_v49 = vor.u32 %v5236_v20, %v5233_v22  ;;  %v12746_v40 = vshll.u32 %v11539_v41, 16 }
 0x443   : > { %vm13269_vm14 = vsmask.f32 5376  ;;  %v12747_v59 = vshrl.u32 %v11548_v30, 16  ;;  %v11573_v46 = vsel %vm3952_vm15, %v11544_v31, %v11546_v61  ;;  %v13271_v15 = vshll.u32 %v11334_v27, 16 }
 0x444   : > { %v3783_v23 = vor.u32 %v3782_v1, %v3779_v60  ;;  %v5238_v16 = vsel %vm13261_vm4, %v5228_v19, %v5237_v49  ;;  %v5247_v5 = vsel %vm13268_vm9, %v5237_v49, %v5246_v14  ;;  %v4194_v60 = vsel %vm3952_vm15, %v4185_v6, %v11544_v31 }
 0x445   : > { %7831 = vmatprep.mubr.bf16.mxu0 %v5238_v16  ;;  %v12748_v19 = vshll.u32 %v11548_v30, 16  ;;  %v4210_v58 = vrot.slane %v13271_v15, 4  ;;  %v12751_v42 = vshrl.u32 %v11551_v50, 16  ;;  %v12752_v36 = vshll.u32 %v11551_v50, 16  ;;  %v8743_v15 = vld [vmem:[#allocation9 + $0x100] sm:$0xff]  }
 0x446   : > { %v3784_v57 = vsel %vm13269_vm14, %v11513_v28, %v3783_v23  ;;  %7832 = vmatmul.mubr.bf16.gmra.mrb[104].mxu0 %v5247_v5  ;;  %v13270_v28 = vshrl.u32 %v11334_v27, 16  ;;  %v12753_v0 = vshrl.u32 %v11558_v48, 16  ;;  %v12754_v38 = vshll.u32 %v11558_v48, 16 }
 0x447   : > { %6198 = vmatmul.mubr.bf16.gmra.mrb[104].mxu1 %v3784_v57  ;;  %v4607_v22 = vrot.slane %v12749_v54, 4  ;;  %v12756_v20 = vshrl.u32 %v11566_v10, 16  ;;  %v12755_v14 = vshll.u32 %v11566_v10, 16  ;;  %v12759_v27 = vshrl.u32 %v11568_v45, 16 }
 0x448   : > { %v4207_v63 = vrot.slane %v13270_v28, 3  ;;  %6238 = vmatprep.mubr.bf16.mxu1 %v4194_v60  ;;  %v4610_v1 = vrot.slane %v12746_v40, 5  ;;  %v12750_v49 = vrot.slane %v11539_v41, 4  ;;  %v4616_v23 = vrot.slane %v12747_v59, 4 }
 0x449   : > { %v4619_v6 = vrot.slane %v12748_v19, 5  ;;  %v4443_v16 = vrot.slane %v11548_v30, 4  ;;  %v4625_v28 = vrot.slane %v12751_v42, 4  ;;  %vm13272_vm4 = vcmask 1043456  }
 0x44a   : > { %v11600_v60 = vor.u32 %v4610_v1, %v4607_v22  ;;  %v4628_v19 = vrot.slane %v12752_v36, 5  ;;  %v4445_v54 = vrot.slane %v11551_v50, 4  ;;  %v4634_v22 = vrot.slane %v12753_v0, 4  ;;  %vm13274_vm14 = vmmov %vm13272_vm4 }
 0x44b   : > { %v4620_v40 = vor.u32 %v4619_v6, %v4616_v23  ;;  %v11607_v59 = vsel %vm13272_vm4, %v12750_v49, %v4443_v16  ;;  %v4637_v1 = vrot.slane %v12754_v38, 5  ;;  %v4447_v23 = vrot.slane %v11558_v48, 4 }
 0x44c   : > { %vm13273_vm9 = vsmask.f32 3328  ;;  %v4629_v49 = vor.u32 %v4628_v19, %v4625_v28  ;;  %v11623_v42 = vsel %vm13274_vm14, %v4443_v16, %v4445_v54  ;;  %v4643_v36 = vrot.slane %v12756_v20, 4  ;;  %v8744_v19 = vld [vmem:[#allocation9 + $0x108] sm:$0xff]   ;;  %v11634_v28 = vld [vmem:[#allocation2 + $0x28] sm:$0xff] }
 0x44d   : > { %v11620_v6 = vsel %vm13273_vm9, %v11600_v60, %v4620_v40  ;;  %v4638_v5 = vor.u32 %v4637_v1, %v4634_v22  ;;  %v11628_v0 = vsel %vm13272_vm4, %v4445_v54, %v4447_v23  ;;  %v4646_v38 = vrot.slane %v12755_v14, 5  ;;  %v11644_v14 = vld [vmem:[#allocation2] sm:$0xff]  ;;  %vm13276_vm14 = vmmov %vm13273_vm9 }
 0x44e   : > { %v4449_v57 = vrot.slane %v11566_v10, 4  ;;  %v11637_v16 = vsel %vm13273_vm9, %v4620_v40, %v4629_v49  ;;  %v13275_v54 = vshll.u32 %v11568_v45, 16  ;;  %v4451_v1 = vrot.slane %v11568_v45, 4  ;;  %vm13278_vm9 = vmmov %vm13272_vm4 }
 0x44f   : > { %6239 = vmatmul.mubr.bf16.vlgmr.msra.gmra.mrb[36].mxu1 %v3969_v35  ;;  %v4652_v35 = vrot.slane %v12759_v27, 4  ;;  %v4647_v20 = vor.u32 %v4646_v38, %v4643_v36  ;;  %v13277_v40 = vshrl.u32 %v11583_v12, 16  ;;  %v12764_v9 = vrot.slane %v11583_v12, 4 }
 0x450   : > { %6246 = vmatprep.mubr.bf16.mxu1 %v11573_v46  ;;  %6384 = vmatpush1.bf16.msra.mxu1 %v8743_v15  ;;  %v4655_v22 = vrot.slane %v13275_v54, 5  ;;  %v11648_v15 = vsel %vm13276_vm14, %v4629_v49, %v4638_v5  ;;  %v11651_v24 = vsel %vm13272_vm4, %v4447_v23, %v4449_v57  ;;  %v11656_v8 = vsel %vm13278_vm9, %v4449_v57, %v4451_v1  ;;  %v8745_v23 = vld [vmem:[#allocation9 + $0x110] sm:$0xff]   ;;  %vm13280_vm4 = vmmov %vm13276_vm14 }
 0x451   : > { %6385 = vmatprep.subr.bf16.mxu1 %v11644_v14  ;;  %v4661_v47 = vrot.slane %v13277_v40, 4  ;;  %v13279_v54 = vshll.u32 %v11583_v12, 16  ;;  %v4211_v53 = vor.u32 %v4210_v58, %v4207_v63  ;;  %v12772_v49 = vshrl.u32 %v11634_v28, 16 }
 0x452   : > { %v4656_v27 = vor.u32 %v4655_v22, %v4652_v35  ;;  %v12769_v36 = vshll.u32 %v11634_v28, 16  ;;  %v11664_v38 = vsel %vm13276_vm14, %v4638_v5, %v4647_v20  ;;  %v11674_v22 = vsel %vm13278_vm9, %v4451_v1, %v12764_v9  ;;  %vm13281_vm14 = vmmov %vm13280_vm4  ;;  %v11690_v5 = vld [vmem:[#allocation2 + $0x30] sm:$0xff] }
 0x453   : > { %v4664_v52 = vrot.slane %v13279_v54, 5  ;;  %v3978_v63 = vsel %vm3952_vm15, %v11537_v21, %v11544_v31  ;;  %v12768_v21 = vshrl.u32 %v11690_v5, 16  ;;  %v4115_v17 = vshrl.u32 %v3951_v13, 16  ;;  %vm13302_vm9 = vmmov %vm13281_vm14 }
 0x454   : > { %6386 = vmatpush1.bf16.msra.mxu1 %v8744_v19  ;;  %v11667_v35 = vsel %vm13280_vm4, %v4647_v20, %v4656_v27  ;;  %v4219_v20 = vrot.slane %v12769_v36, 4  ;;  %v8746_v19 = vld [vmem:[#allocation9 + $0x118] sm:$0xff]   ;;  %vm4984_vm4 = vcmask 1042432   ;;  %v4118_v51 = vshll.u32 %v3951_v13, 16 }
 0x455   : > { %v11669_v57 = vor.u32 %v4664_v52, %v4661_v47  ;;  %6387 = vmatprep.subr.bf16.mxu1 %v11644_v14  ;;  %v4212_v52 = vsel %vm3952_vm15, %v11546_v61, %v4211_v53  ;;  %v4216_v47 = vrot.slane %v12772_v49, 3  ;;  %v8747_v61 = vld [vmem:[#allocation9 + $0x120] sm:$0xff]   ;;  %v4225_v40 = vrot.slane %v12768_v21, 3  ;;  %v11724_v21 = vld [vmem:[#allocation2 + $0x48] sm:$0xff]  ;;  %v11729_v36 = vld [vmem:[#allocation2 + $0x90] sm:$0xff] }
 0x456   : > { %v5016_v49 = vrot.slane %v11729_v36, 5  ;;  %v13282_v55 = vshll.u32 %v11724_v21, 16 }
 0x457   : > { %v11682_v58 = vsel %vm13281_vm14, %v4656_v27, %v11669_v57  ;;  %6247 = vmatmul.mubr.bf16.gmra.mrb[40].mxu1 %v3978_v63  ;;  %v4220_v31 = vor.u32 %v4219_v20, %v4216_v47  ;;  %v12765_v27 = vshll.u32 %v11690_v5, 16  ;;  %v8748_v63 = vld [vmem:[#allocation9 + $0x128] sm:$0xff]   ;;  %vm13304_vm14 = vcmask 1043456  }
 0x458   : > { %6254 = vmatprep.mubr.bf16.mxu1 %v4212_v52  ;;  %6388 = vmatpush1.bf16.msra.mxu1 %v8745_v23  ;;  %v11702_v23 = vld [vmem:[#allocation2 + $0x38] sm:$0xff]  ;;  %v4255_v25 = vrot.slane %v13282_v55, 4 }
 0x459   : > { %6389 = vmatprep.subr.bf16.mxu1 %v11644_v14  ;;  %v4221_v1 = vsel %vm3952_vm15, %v4211_v53, %v4220_v31  ;;  %v4228_v54 = vrot.slane %v12765_v27, 4  ;;  %v12766_v20 = vshrl.u32 %v11702_v23, 16  ;;  %v8749_v53 = vld [vmem:[#allocation9 + $0x130] sm:$0xff]   ;;  %v11713_v27 = vld [vmem:[#allocation2 + $0x40] sm:$0xff] }
 0x45b   : > { %v4229_v47 = vor.u32 %v4228_v54, %v4225_v40  ;;  %v4234_v9 = vrot.slane %v12766_v20, 3  ;;  %v8750_v40 = vld [vmem:[#allocation9 + $0x138] sm:$0xff]  }
 0x45c   : > { %6390 = vmatpush1.bf16.msra.mxu1 %v8746_v19 }
 0x45d   : > { %6391 = vmatprep.subr.bf16.mxu1 %v11644_v14  ;;  %v4230_v19 = vsel %vm3952_vm15, %v4220_v31, %v4229_v47  ;;  %v8751_v31 = vld [vmem:[#allocation9 + $0x140] sm:$0xff]  }
 0x45f   : > { %6255 = vmatmul.mubr.bf16.gmra.mrb[44].mxu1 %v11573_v46  ;;  %v12767_v46 = vshll.u32 %v11702_v23, 16 }
 0x460   : > { %6262 = vmatprep.mubr.bf16.mxu1 %v4221_v1  ;;  %6392 = vmatpush1.bf16.msra.mxu1 %v8747_v61 }
 0x461   : > { %6393 = vmatprep.subr.bf16.mxu1 %v11644_v14  ;;  %v4237_v61 = vrot.slane %v12767_v46, 4 }
 0x463   : > { %v4238_v54 = vor.u32 %v4237_v61, %v4234_v9  ;;  %v8752_v9 = vld [vmem:[#allocation9 + $0x148] sm:$0xff]  }
 0x464   : > { %6394 = vmatpush1.bf16.msra.mxu1 %v8748_v63  ;;  %v12770_v63 = vshrl.u32 %v11713_v27, 16 }
 0x465   : > { %6395 = vmatprep.subr.bf16.mxu1 %v11644_v14  ;;  %v4239_v20 = vsel %vm3952_vm15, %v4229_v47, %v4238_v54  ;;  %v11731_v47 = vld [vmem:[#allocation2 + $0x88] sm:$0xff] }
 0x466   : > { %v4243_v46 = vrot.slane %v12770_v63, 3  ;;  %v11733_v63 = vld [vmem:[#allocation2 + $0x98] sm:$0xff] }
 0x467   : > { %6263 = vmatmul.mubr.bf16.gmra.mrb[48].mxu1 %v4212_v52  ;;  %v12771_v52 = vshll.u32 %v11713_v27, 16 }
 0x468   : > { %6270 = vmatprep.mubr.bf16.mxu1 %v4230_v19  ;;  %6396 = vmatpush1.bf16.msra.mxu1 %v8749_v53 }
 0x469   : > { %6397 = vmatprep.subr.bf16.mxu1 %v11644_v14  ;;  %v4246_v53 = vrot.slane %v12771_v52, 4  ;;  %v8753_v52 = vld [vmem:[#allocation9 + $0x150] sm:$0xff]  }
 0x46b   : > { %v4247_v61 = vor.u32 %v4246_v53, %v4243_v46  ;;  %v12780_v46 = vrot.slane %v11733_v63, 5 }
 0x46c   : > { %6398 = vmatpush1.bf16.msra.mxu1 %v8750_v40  ;;  %v12777_v40 = vshrl.u32 %v11724_v21, 16 }
 0x46d   : > { %6399 = vmatprep.subr.bf16.mxu1 %v11644_v14  ;;  %v4248_v53 = vsel %vm3952_vm15, %v4238_v54, %v4247_v61 }
 0x46f   : > { %6271 = vmatmul.mubr.bf16.gmra.mrb[52].mxu1 %v4221_v1  ;;  %v4252_v1 = vrot.slane %v12777_v40, 3 }
 0x470   : > { %6278 = vmatprep.mubr.bf16.mxu1 %v4239_v20  ;;  %6400 = vmatpush1.bf16.msra.mxu1 %v8751_v31  ;;  %v12778_v31 = vrot.slane %v11731_v47, 5 }
 0x471   : > { %6401 = vmatprep.subr.bf16.mxu1 %v11644_v14  ;;  %v4256_v54 = vor.u32 %v4255_v25, %v4252_v1  ;;  %v8756_v25 = vld [vmem:[#allocation9 + $0x168] sm:$0xff]  }
 0x472   : > { %v11749_v7 = vsel %vm4984_vm4, %v12778_v31, %v5016_v49 }
 0x473   : > { %v4257_v31 = vsel %vm3952_vm15, %v4247_v61, %v4256_v54  ;;  %v13283_v61 = vshrl.u32 %v11539_v41, 16 }
 0x474   : > { %6402 = vmatpush1.bf16.msra.mxu1 %v8752_v9  ;;  %v11744_v9 = vld [vmem:[#allocation2 + $0x50] sm:$0xff] }
 0x475   : > { %6403 = vmatprep.subr.bf16.mxu1 %v11644_v14  ;;  %v12781_v55 = vshrl.u32 %v11744_v9, 16  ;;  %v12783_v40 = vshll.u32 %v11744_v9, 16 }
 0x477   : > { %6279 = vmatmul.mubr.bf16.gmra.mrb[56].mxu1 %v4230_v19  ;;  %v11754_v19 = vsel %vm4984_vm4, %v5016_v49, %v12780_v46  ;;  %v4261_v4 = vrot.slane %v12781_v55, 3  ;;  %v4264_v49 = vrot.slane %v12783_v40, 4  ;;  %v4270_v46 = vrot.slane %v13283_v61, 3 }
 0x478   : > { %6286 = vmatprep.mubr.bf16.mxu1 %v4248_v53  ;;  %6404 = vmatpush1.bf16.msra.mxu1 %v8753_v52  ;;  %v8755_v52 = vld [vmem:[#allocation9 + $0x160] sm:$0xff]   ;;  %v13284_v55 = vshll.u32 %v11539_v41, 16  ;;  %v13287_v61 = vshrl.u32 %v11551_v50, 16 }
 0x479   : > { %6405 = vmatprep.subr.bf16.mxu1 %v11644_v14  ;;  %v4265_v1 = vor.u32 %v4264_v49, %v4261_v4  ;;  %v13286_v49 = vshll.u32 %v11548_v30, 16 }
 0x47a   : > { %v4273_v18 = vrot.slane %v13284_v55, 4 }
 0x47c   : > { %6406 = vmatpush1.bf16.msra.mxu1 %v8754_v29  ;;  %v8757_v29 = vld [vmem:[#allocation9 + $0x170] sm:$0xff]   ;;  %v4274_v40 = vor.u32 %v4273_v18, %v4270_v46  ;;  %v4288_v18 = vrot.slane %v13287_v61, 3  ;;  %v13288_v46 = vshll.u32 %v11551_v50, 16 }
 0x47d   : > { %6407 = vmatprep.subr.bf16.mxu1 %v11644_v14 }
 0x47e   : > { %v4275_v4 = vsel %vm3952_vm15, %v4265_v1, %v4274_v40 }
 0x47f   : > { %6287 = vmatmul.mubr.bf16.gmra.mrb[60].mxu1 %v4239_v20  ;;  %v4266_v20 = vsel %vm3952_vm15, %v4256_v54, %v4265_v1 }
 0x480   : > { %6294 = vmatprep.mubr.bf16.mxu1 %v4257_v31  ;;  %6408 = vmatpush1.bf16.msra.mxu1 %v8755_v52  ;;  %v8758_v52 = vld [vmem:[#allocation9 + $0x178] sm:$0xff]  }
 0x481   : > { %6409 = vmatprep.subr.bf16.mxu1 %v11644_v14 }
 0x484   : > { %6410 = vmatpush1.bf16.msra.mxu1 %v8756_v25  ;;  %v4282_v25 = vrot.slane %v13286_v49, 4  ;;  %v13290_v49 = vshll.u32 %v11558_v48, 16 }
 0x485   : > { %6411 = vmatprep.subr.bf16.mxu1 %v11644_v14 }
 0x487   : > { %6295 = vmatmul.mubr.bf16.gmra.mrb[64].mxu1 %v4248_v53  ;;  %v13285_v53 = vshrl.u32 %v11548_v30, 16 }
 0x488   : > { %6302 = vmatprep.mubr.bf16.mxu1 %v4266_v20  ;;  %6412 = vmatpush1.bf16.msra.mxu1 %v8757_v29 }
 0x489   : > { %6413 = vmatprep.subr.bf16.mxu1 %v11644_v14  ;;  %v4279_v54 = vrot.slane %v13285_v53, 3  ;;  %v13289_v53 = vshrl.u32 %v11558_v48, 16 }
 0x48b   : > { %v4283_v55 = vor.u32 %v4282_v25, %v4279_v54  ;;  %v4297_v30 = vrot.slane %v13289_v53, 3  ;;  %v4300_v54 = vrot.slane %v13290_v49, 4 }
 0x48c   : > { %6414 = vmatpush1.bf16.msra.mxu1 %v8758_v52  ;;  %v4291_v52 = vrot.slane %v13288_v46, 4  ;;  %v13292_v46 = vshll.u32 %v11566_v10, 16 }
 0x48d   : > { %6560 = vmatprep.subr.bf16.mxu1 %v11644_v14  ;;  %v4284_v29 = vsel %vm3952_vm15, %v4274_v40, %v4283_v55  ;;  %v11789_v40 = vpop.f32.mrb[72].mxu0 }
 0x48e   : > { %v11791_v25 = vpop.f32.mrb[73].mxu0  ;;  %v4309_v48 = vrot.slane %v13292_v46, 4 }
 0x48f   : > { %6303 = vmatmul.mubr.bf16.gmra.mrb[68].mxu1 %v4257_v31  ;;  %v4292_v31 = vor.u32 %v4291_v52, %v4288_v18  ;;  %v11793_v61 = vpop.f32.mrb[74].mxu0 }
 0x490   : > { %6310 = vmatprep.mubr.bf16.mxu1 %v4275_v4 }
 0x491   : > { %v4293_v1 = vsel %vm3952_vm15, %v4283_v55, %v4292_v31  ;;  %v13291_v55 = vshrl.u32 %v11566_v10, 16 }
 0x493   : > { %v4306_v18 = vrot.slane %v13291_v55, 3 }
 0x495   : > { %v4310_v52 = vor.u32 %v4309_v48, %v4306_v18 }
 0x497   : > { %6311 = vmatmul.mubr.bf16.gmra.mrb[72].mxu1 %v4266_v20  ;;  %v4301_v20 = vor.u32 %v4300_v54, %v4297_v30  ;;  %v13293_v30 = vshrl.u32 %v11568_v45, 16 }
 0x498   : > { %6318 = vmatprep.mubr.bf16.mxu1 %v4284_v29 }
 0x499   : > { %v4302_v50 = vsel %vm3952_vm15, %v4292_v31, %v4301_v20  ;;  %v4311_v53 = vsel %vm3952_vm15, %v4301_v20, %v4310_v52  ;;  %v4315_v49 = vrot.slane %v13293_v30, 3 }
 0x49f   : > { %6319 = vmatmul.mubr.bf16.gmra.mrb[76].mxu1 %v4275_v4  ;;  %v11796_v4 = vpop.f32.mrb[75].mxu0 }
 0x4a0   : > { %6326 = vmatprep.mubr.bf16.mxu1 %v4293_v1  ;;  %v11807_v32 = vpop.f32.mrb[76].mxu0 }
 0x4a1   : > { %13295 = vst [vmem:[#allocation33_spill] sm:$0xff] %v11807_v32  ;;  %v11809_v43 = vpop.f32.mrb[77].mxu0  ;;  %v4120_v32 = vrot.slane %v4118_v51, 4 }
 0x4a2   : > { %v11811_v55 = vpop.f32.mrb[78].mxu0 }
 0x4a3   : > { %13296 = vst [vmem:[#allocation35_spill] sm:$0xff] %v11811_v55  ;;  %v4117_v55 = vrot.slane %v4115_v17, 3 }
 0x4a7   : > { %6327 = vmatmul.mubr.bf16.gmra.mrb[80].mxu1 %v4284_v29  ;;  %v13294_v29 = vshll.u32 %v11568_v45, 16  ;;  %v4177_v45 = vld [vmem:[#allocation2 + $0x98] sm:$0xf] }
 0x4a8   : > { %6334 = vmatprep.mubr.bf16.mxu1 %v4302_v50  ;;  %v4340_v18 = vshrl.u32 %v4177_v45, 16  ;;  %v4343_v46 = vshll.u32 %v4177_v45, 16 }
 0x4a9   : > { %v4318_v54 = vrot.slane %v13294_v29, 4  ;;  %v13301_v29 = vshll.u32 %v11583_v12, 16 }
 0x4ab   : > { %v4319_v31 = vor.u32 %v4318_v54, %v4315_v49  ;;  %v4111_v54 = vrot.slane %v13301_v29, 4  ;;  %v4121_v29 = vor.u32 %v4120_v32, %v4117_v55  ;;  %v13303_v32 = vrot.slane %v11005_v26, 4 }
 0x4ad   : > { %v4320_v10 = vsel %vm3952_vm15, %v4310_v52, %v4319_v31  ;;  %v4329_v20 = vsel %vm3952_vm15, %v4319_v31, %v11518_v37  ;;  %v4342_v37 = vrot.slane %v4340_v18, 3 }
 0x4af   : > { %6335 = vmatmul.mubr.bf16.gmra.mrb[84].mxu1 %v4293_v1  ;;  %v11814_v1 = vpop.f32.mrb[79].mxu0 }
 0x4b0   : > { %6342 = vmatprep.mubr.bf16.mxu1 %v4311_v53  ;;  %v11818_v48 = vpop.f32.mrb[80].mxu0 }
 0x4b1   : > { %13297 = vst [vmem:[#allocation32_spill] sm:$0xff] %v11818_v48  ;;  %v11820_v30 = vpop.f32.mrb[81].mxu0 }
 0x4b2   : > { %13298 = vst [vmem:[#allocation34_spill] sm:$0xff] %v11820_v30  ;;  %v11822_v49 = vpop.f32.mrb[82].mxu0  ;;  %v4519_v30 = vshll.u32 %v4495_v34, 16 }
 0x4b3   : > { %13299 = vst [vmem:[#allocation37_spill] sm:$0xff] %v11822_v49  ;;  %v4516_v49 = vshrl.u32 %v4495_v34, 16 }
 0x4b5   : > { %v4518_v18 = vrot.slane %v4516_v49, 4 }
 0x4b7   : > { %6343 = vmatmul.mubr.bf16.gmra.mrb[88].mxu1 %v4302_v50  ;;  %v13300_v50 = vshrl.u32 %v11583_v12, 16 }
 0x4b8   : > { %6350 = vmatprep.mubr.bf16.mxu1 %v4320_v10 }
 0x4b9   : > { %v4108_v52 = vrot.slane %v13300_v50, 3 }
 0x4bb   : > { %v4112_v45 = vor.u32 %v4111_v54, %v4108_v52 }
 0x4bd   : > { %v4113_v50 = vsel %vm3952_vm15, %v4319_v31, %v4112_v45  ;;  %v4122_v54 = vsel %vm3952_vm15, %v4112_v45, %v4121_v29 }
 0x4bf   : > { %6351 = vmatmul.mubr.bf16.gmra.mrb[92].mxu1 %v4311_v53  ;;  %v11828_v53 = vpop.f32.mrb[83].mxu0 }
 0x4c0   : > { %6358 = vmatprep.mubr.bf16.mxu1 %v4329_v20  ;;  %v4345_v20 = vrot.slane %v4343_v46, 4  ;;  %v4521_v46 = vrot.slane %v4519_v30, 5  ;;  %v8760_v30 = vld [vmem:[#allocation9 + $0x188] sm:$0xff]  }
 0x4c2   : > { %v4346_v48 = vor.u32 %v4345_v20, %v4342_v37  ;;  %v4522_v52 = vor.u32 %v4521_v46, %v4518_v18  ;;  %v8762_v18 = vld [vmem:[#allocation9 + $0x198] sm:$0xff]   ;;  %v8784_v46 = vld [vmem:[#allocation2 + $0x20] sm:$0xff] }
 0x4c3   : > { %v4427_v29 = vrot.slane %v8784_v46, 4 }
 0x4c4   : > { %v4531_v51 = vsel %vm13302_vm9, %v4522_v52, %v11085_v39  ;;  %v8761_v39 = vld [vmem:[#allocation9 + $0x190] sm:$0xff]  }
 0x4c7   : > { %6359 = vmatmul.mubr.bf16.gmra.mrb[96].mxu1 %v4320_v10  ;;  %v4347_v10 = vsel %vm3952_vm15, %v11523_v33, %v4346_v48  ;;  %v4384_v33 = vld [vmem:[#allocation2 + $0x8] sm:$0xf0]  ;;  %v8759_v48 = vld [vmem:[#allocation9 + $0x180] sm:$0xff]   ;;  %vm13308_vm15 = vmmov %vm13304_vm14 }
 0x4c8   : > { %6366 = vmatprep.mubr.bf16.mxu1 %v11535_v44  ;;  %v11834_v44 = vpop.f32.mrb[84].mxu0  ;;  %v4422_v31 = vrot.slane %v4384_v33, 4 }
 0x4c9   : > { %v11836_v13 = vpop.f32.mrb[85].mxu0 }
 0x4ca   : > { %v11839_v34 = vpop.f32.mrb[86].mxu0  ;;  %v4424_v55 = vsel %vm13304_vm14, %v4422_v31, %v13303_v32 }
 0x4cb   : > { %v11843_v17 = vpop.f32.mrb[87].mxu0 }
 0x4cf   : > { %6367 = vmatmul.mubr.bf16.gmra.mrb[100].mxu1 %v4113_v50  ;;  %v13306_v50 = vshll.u32 %v11634_v28, 16 }
 0x4d0   : > { %6374 = vmatprep.mubr.bf16.mxu1 %v4347_v10 }
 0x4d1   : > { %v4556_v10 = vrot.slane %v13306_v50, 5 }
 0x4d7   : > { %6375 = vmatmul.mubr.bf16.gmra.mrb[104].mxu1 %v4122_v54  ;;  %v8763_v54 = vld [vmem:[#allocation9 + $0x1a0] sm:$0xff]  }
 0x4d8   : > { %6415 = vmatprep.mubr.bf16.mxu1 %v4531_v51 }
 0x4dd   : > { %v11850_v49 = vpop.f32.mrb[88].mxu0 }
 0x4de   : > { %v11852_v37 = vpop.f32.mrb[89].mxu0 }
 0x4df   : > { %6416 = vmatmul.mubr.bf16.vlgmr.msra.gmra.mrb[36].mxu1 %v4424_v55  ;;  %v11855_v20 = vpop.f32.mrb[90].mxu0  ;;  %v8764_v55 = vld [vmem:[#allocation9 + $0x1a8] sm:$0xff]  }
 0x4e0   : > { %6423 = vmatprep.mubr.bf16.mxu1 %v11314_v2  ;;  %6561 = vmatpush1.bf16.msra.mxu1 %v8759_v48  ;;  %v11858_v26 = vpop.f32.mrb[91].mxu0  ;;  %v13305_v2 = vshrl.u32 %v11634_v28, 16  ;;  %v13310_v48 = vshll.u32 %v11690_v5, 16 }
 0x4e1   : > { %6562 = vmatprep.subr.bf16.mxu1 %v11644_v14 }
 0x4e2   : > { %v4553_v45 = vrot.slane %v13305_v2, 4  ;;  %v4565_v32 = vrot.slane %v13310_v48, 5  ;;  %v8765_v2 = vld [vmem:[#allocation9 + $0x1b0] sm:$0xff]   ;;  %v13316_v48 = vshrl.u32 %v11713_v27, 16 }
 0x4e4   : > { %6563 = vmatpush1.bf16.msra.mxu1 %v8760_v30  ;;  %v4557_v52 = vor.u32 %v4556_v10, %v4553_v45  ;;  %v4429_v30 = vrot.slane %v11634_v28, 4  ;;  %v13312_v28 = vshrl.u32 %v11702_v23, 16 }
 0x4e5   : > { %6564 = vmatprep.subr.bf16.mxu1 %v11644_v14 }
 0x4e6   : > { %v4558_v33 = vsel %vm13302_vm9, %v11398_v11, %v4557_v52  ;;  %v4430_v11 = vsel %vm13304_vm14, %v4427_v29, %v4429_v30  ;;  %v4571_v46 = vrot.slane %v13312_v28, 4 }
 0x4e7   : > { %6424 = vmatmul.mubr.bf16.gmra.mrb[40].mxu1 %v11286_v3  ;;  %v13307_v3 = vrot.slane %v11202_v62, 4 }
 0x4e8   : > { %6431 = vmatprep.mubr.bf16.mxu1 %v11410_v56  ;;  %6565 = vmatpush1.bf16.msra.mxu1 %v8761_v39  ;;  %v13309_v56 = vshrl.u32 %v11690_v5, 16 }
 0x4e9   : > { %6566 = vmatprep.subr.bf16.mxu1 %v11644_v14  ;;  %v4428_v51 = vsel %vm13308_vm15, %v13307_v3, %v4427_v29  ;;  %vm13311_vm15 = vmmov %vm13302_vm9  ;;  %v4431_v29 = vrot.slane %v11690_v5, 4  ;;  %v4433_v5 = vrot.slane %v11702_v23, 4 }
 0x4ea   : > { %v4562_v31 = vrot.slane %v13309_v56, 4  ;;  %v8767_v56 = vld [vmem:[#allocation9 + $0x1c0] sm:$0xff]   ;;  %vm13314_vm9 = vmmov %vm13304_vm14 }
 0x4eb   : > { %vm13315_vm14 = vmmov %vm13311_vm15 }
 0x4ec   : > { %6567 = vmatpush1.bf16.msra.mxu1 %v8762_v18  ;;  %v4566_v62 = vor.u32 %v4565_v32, %v4562_v31  ;;  %v4580_v32 = vrot.slane %v13316_v48, 4  ;;  %v8770_v48 = vld [vmem:[#allocation9 + $0x1d8] sm:$0xff]  }
 0x4ed   : > { %6568 = vmatprep.subr.bf16.mxu1 %v11644_v14 }
 0x4ee   : > { %v4567_v10 = vsel %vm13311_vm15, %v4557_v52, %v4566_v62  ;;  %v4432_v52 = vsel %vm13314_vm9, %v4429_v30, %v4431_v29  ;;  %v8769_v30 = vld [vmem:[#allocation9 + $0x1d0] sm:$0xff]   ;;  %vm13318_vm15 = vmmov %vm13314_vm9 }
 0x4ef   : > { %6432 = vmatmul.mubr.bf16.gmra.mrb[44].mxu1 %v4428_v51  ;;  %v8766_v51 = vld [vmem:[#allocation9 + $0x1b8] sm:$0xff]   ;;  %vm13319_vm9 = vmmov %vm13315_vm14 }
 0x4f0   : > { %6439 = vmatprep.mubr.bf16.mxu1 %v4558_v33  ;;  %6569 = vmatpush1.bf16.msra.mxu1 %v8763_v54  ;;  %v11878_v39 = vpop.f32.mrb[92].mxu0  ;;  %v13313_v54 = vshll.u32 %v11702_v23, 16  ;;  %v13320_v23 = vshrl.u32 %v11724_v21, 16 }
 0x4f1   : > { %6570 = vmatprep.subr.bf16.mxu1 %v11644_v14  ;;  %v11880_v45 = vpop.f32.mrb[93].mxu0 }
 0x4f2   : > { %v11884_v50 = vpop.f32.mrb[94].mxu0  ;;  %v4574_v3 = vrot.slane %v13313_v54, 5 }
 0x4f3   : > { %v11887_v18 = vpop.f32.mrb[95].mxu0 }
 0x4f4   : > { %6571 = vmatpush1.bf16.msra.mxu1 %v8764_v55  ;;  %v4575_v33 = vor.u32 %v4574_v3, %v4571_v46  ;;  %v13317_v55 = vshll.u32 %v11713_v27, 16 }
 0x4f5   : > { %6572 = vmatprep.subr.bf16.mxu1 %v11644_v14 }
 0x4f6   : > { %v4576_v31 = vsel %vm13315_vm14, %v4566_v62, %v4575_v33  ;;  %v4434_v62 = vsel %vm13318_vm15, %v4431_v29, %v4433_v5  ;;  %v4435_v29 = vrot.slane %v11713_v27, 4  ;;  %vm13322_vm14 = vmmov %vm13318_vm15  ;;  %v4437_v27 = vrot.slane %v11724_v21, 4 }
 0x4f7   : > { %6440 = vmatmul.mubr.bf16.gmra.mrb[48].mxu1 %v4430_v11  ;;  %v8768_v11 = vld [vmem:[#allocation9 + $0x1c8] sm:$0xff]   ;;  %vm13323_vm15 = vmmov %vm13319_vm9 }
 0x4f8   : > { %6447 = vmatprep.mubr.bf16.mxu1 %v4567_v10  ;;  %6573 = vmatpush1.bf16.msra.mxu1 %v8765_v2  ;;  %v4583_v2 = vrot.slane %v13317_v55, 5  ;;  %v8771_v55 = vld [vmem:[#allocation9 + $0x1e0] sm:$0xff]  }
 0x4f9   : > { %6574 = vmatprep.subr.bf16.mxu1 %v11644_v14 }
 0x4fa   : > { %v4584_v10 = vor.u32 %v4583_v2, %v4580_v32 }
 0x4fc   : > { %6575 = vmatpush1.bf16.msra.mxu1 %v8766_v51  ;;  %v4585_v3 = vsel %vm13319_vm9, %v4575_v33, %v4584_v10  ;;  %v4436_v33 = vsel %vm13322_vm14, %v4433_v5, %v4435_v29  ;;  %vm13326_vm9 = vmmov %vm13322_vm14 }
 0x4fd   : > { %6576 = vmatprep.subr.bf16.mxu1 %v11644_v14  ;;  %vm13327_vm14 = vmmov %vm13323_vm15 }
 0x4ff   : > { %6448 = vmatmul.mubr.bf16.gmra.mrb[52].mxu1 %v4432_v52  ;;  %v13321_v52 = vshll.u32 %v11724_v21, 16  ;;  %v8774_v21 = vld [vmem:[#allocation9 + $0x1f8] sm:$0xff]  }
 0x500   : > { %6455 = vmatprep.mubr.bf16.mxu1 %v4576_v31  ;;  %6577 = vmatpush1.bf16.msra.mxu1 %v8767_v56  ;;  %v4589_v56 = vrot.slane %v13320_v23, 4  ;;  %v8772_v23 = vld [vmem:[#allocation9 + $0x1e8] sm:$0xff]  }
 0x501   : > { %6578 = vmatprep.subr.bf16.mxu1 %v11644_v14  ;;  %v4592_v31 = vrot.slane %v13321_v52, 5 }
 0x503   : > { %v4593_v32 = vor.u32 %v4592_v31, %v4589_v56 }
 0x504   : > { %v11904_v28 = vpop.f32.mrb[96].mxu0  ;;  %6579 = vmatpush1.bf16.msra.mxu1 %v8768_v11  ;;  %v13324_v11 = vshrl.u32 %v11744_v9, 16 }
 0x505   : > { %v11906_v46 = vpop.f32.mrb[97].mxu0  ;;  %6580 = vmatprep.subr.bf16.mxu1 %v11644_v14  ;;  %v4594_v2 = vsel %vm13323_vm15, %v4584_v10, %v4593_v32  ;;  %v8773_v10 = vld [vmem:[#allocation9 + $0x1f0] sm:$0xff]   ;;  %vm13328_vm15 = vmmov %vm13326_vm9 }
 0x506   : > { %v11910_v54 = vpop.f32.mrb[98].mxu0 }
 0x507   : > { %6456 = vmatmul.mubr.bf16.gmra.mrb[56].mxu1 %v4434_v62  ;;  %v11913_v51 = vpop.f32.mrb[99].mxu0  ;;  %v4598_v62 = vrot.slane %v13324_v11, 4 }
 0x508   : > { %6463 = vmatprep.mubr.bf16.mxu1 %v4585_v3  ;;  %6581 = vmatpush1.bf16.msra.mxu1 %v8769_v30  ;;  %v13325_v30 = vshll.u32 %v11744_v9, 16 }
 0x509   : > { %6582 = vmatprep.subr.bf16.mxu1 %v11644_v14 }
 0x50a   : > { %v4601_v3 = vrot.slane %v13325_v30, 5 }
 0x50c   : > { %6583 = vmatpush1.bf16.msra.mxu1 %v8770_v48  ;;  %v4602_v52 = vor.u32 %v4601_v3, %v4598_v62 }
 0x50d   : > { %6584 = vmatprep.subr.bf16.mxu1 %v11644_v14 }
 0x50f   : > { %6464 = vmatmul.mubr.bf16.gmra.mrb[60].mxu1 %v4436_v33  ;;  %v4603_v33 = vsel %vm13327_vm14, %v4593_v32, %v4602_v52 }
 0x510   : > { %6471 = vmatprep.mubr.bf16.mxu1 %v4594_v2  ;;  %6585 = vmatpush1.bf16.msra.mxu1 %v8771_v55  ;;  %v4438_v55 = vsel %vm13326_vm9, %v4435_v29, %v4437_v27  ;;  %v4439_v2 = vrot.slane %v11744_v9, 4  ;;  %vm13329_vm9 = vmmov %vm13327_vm14 }
 0x511   : > { %6586 = vmatprep.subr.bf16.mxu1 %v11644_v14  ;;  %v11930_v56 = vpop.f32.mrb[100].mxu0  ;;  %v4612_v32 = vsel %vm13329_vm9, %v4602_v52, %v11600_v60  ;;  %vm13331_vm14 = vmmov %vm13328_vm15  ;;  %v4671_v60 = vshll.u32 %v11729_v36, 16 }
 0x512   : > { %v11932_v5 = vpop.f32.mrb[101].mxu0  ;;  %v4440_v29 = vsel %vm13328_vm15, %v4437_v27, %v4439_v2  ;;  %vm13332_vm15 = vmmov %vm13329_vm9  ;;  %v13333_v27 = vrot.slane %v11583_v12, 4 }
 0x513   : > { %v11934_v31 = vpop.f32.mrb[102].mxu0  ;;  %vm13334_vm9 = vmmov %vm13331_vm14 }
 0x514   : > { %6587 = vmatpush1.bf16.msra.mxu1 %v8772_v23  ;;  %v11936_v48 = vpop.f32.mrb[103].mxu0 }
 0x515   : > { %6588 = vmatprep.subr.bf16.mxu1 %v11644_v14 }
 0x517   : > { %6472 = vmatmul.mubr.bf16.gmra.mrb[64].mxu1 %v4438_v55  ;;  %v4721_v55 = vld [vmem:[#allocation2 + $0x10] sm:$0xf0] }
 0x518   : > { %6479 = vmatprep.mubr.bf16.mxu1 %v4603_v33  ;;  %6589 = vmatpush1.bf16.msra.mxu1 %v8773_v10  ;;  %v4402_v10 = vld [vmem:[#allocation2 + $0x98] sm:$0xf] }
 0x519   : > { %6590 = vmatprep.subr.bf16.mxu1 %v11644_v14  ;;  %v11943_v11 = vpop.f32.mrb[104].mxu0  ;;  %v13330_v14 = vrot.slane %v11539_v41, 4  ;;  %v4668_v41 = vshrl.u32 %v11729_v36, 16  ;;  %v4457_v33 = vrot.slane %v4402_v10, 4 }
 0x51a   : > { %v11945_v62 = vpop.f32.mrb[105].mxu0 }
 0x51b   : > { %v11947_v30 = vpop.f32.mrb[106].mxu0  ;;  %v4442_v9 = vsel %vm13331_vm14, %v4439_v2, %v13330_v14  ;;  %vm13335_vm14 = vmmov %vm13332_vm15 }
 0x51c   : > { %6591 = vmatpush1.bf16.msra.mxu1 %v8774_v21  ;;  %v11949_v3 = vpop.f32.mrb[107].mxu0 }
 0x51f   : > { %6480 = vmatmul.mubr.bf16.gmra.mrb[68].mxu1 %v4440_v29 }
 0x520   : > { %6487 = vmatprep.mubr.bf16.mxu1 %v4612_v32  ;;  %v4741_v32 = vshrl.u32 %v4721_v55, 16 }
 0x527   : > { %6488 = vmatmul.mubr.bf16.gmra.mrb[72].mxu1 %v4442_v9 }
 0x528   : > { %6495 = vmatprep.mubr.bf16.mxu1 %v11620_v6  ;;  %v4673_v6 = vrot.slane %v4671_v60, 5 }
 0x52f   : > { %6496 = vmatmul.mubr.bf16.gmra.mrb[76].mxu1 %v11607_v59  ;;  %v4670_v59 = vrot.slane %v4668_v41, 4 }
 0x530   : > { %6503 = vmatprep.mubr.bf16.mxu1 %v11637_v16 }
 0x531   : > { %v11970_v16 = vor.u32 %v4673_v6, %v4670_v59  ;;  %v4948_v59 = vld [vmem:[#allocation2 + $0x20] sm:$0xff]  ;;  %v4743_v6 = vrot.slane %v4741_v32, 4 }
 0x537   : > { %6504 = vmatmul.mubr.bf16.gmra.mrb[80].mxu1 %v11623_v42  ;;  %v4513_v42 = vld [vmem:[#allocation2 + $0x98] sm:$0x1f] }
 0x538   : > { %6511 = vmatprep.mubr.bf16.mxu1 %v11648_v15  ;;  %v4680_v15 = vshll.u32 %v4513_v42, 16 }
 0x53f   : > { %6512 = vmatmul.mubr.bf16.gmra.mrb[84].mxu1 %v11628_v0  ;;  %v4677_v0 = vshrl.u32 %v4513_v42, 16 }
 0x540   : > { %6519 = vmatprep.mubr.bf16.mxu1 %v11664_v38 }
 0x541   : > { %v4679_v38 = vrot.slane %v4677_v0, 4 }
 0x547   : > { %6520 = vmatmul.mubr.bf16.gmra.mrb[88].mxu1 %v11651_v24  ;;  %v4675_v24 = vsel %vm13332_vm15, %v11669_v57, %v11970_v16  ;;  %v4946_v57 = vld [vmem:[#allocation2 + $0x10] sm:$0xe0]  ;;  %vm13336_vm15 = vmmov %vm13334_vm9 }
 0x548   : > { %6527 = vmatprep.mubr.bf16.mxu1 %v11667_v35  ;;  %v4682_v35 = vrot.slane %v4680_v15, 5  ;;  %v4985_v14 = vrot.slane %v4946_v57, 5  ;;  %v4758_v15 = vshrl.u32 %v4948_v59, 16 }
 0x54a   : > { %v4683_v23 = vor.u32 %v4682_v35, %v4679_v38  ;;  %v4988_v38 = vrot.slane %v4948_v59, 5 }
 0x54c   : > { %v4684_v52 = vsel %vm13335_vm14, %v11970_v16, %v4683_v23 }
 0x54f   : > { %6528 = vmatmul.mubr.bf16.gmra.mrb[92].mxu1 %v11656_v8  ;;  %v4455_v8 = vrot.slane %v11729_v36, 4  ;;  %v4744_v36 = vshll.u32 %v4721_v55, 16 }
 0x550   : > { %6535 = vmatprep.mubr.bf16.mxu1 %v11682_v58 }
 0x551   : > { %v4456_v58 = vsel %vm13334_vm9, %v13333_v27, %v4455_v8  ;;  %v4458_v12 = vsel %vm13336_vm15, %v4455_v8, %v4457_v33  ;;  %v4746_v42 = vrot.slane %v4744_v36, 5  ;;  %vm13337_vm9 = vmmov %vm13335_vm14  ;;  %v4760_v27 = vrot.slane %v4758_v15, 4  ;;  %v4950_v36 = vld [vmem:[#allocation2 + $0x30] sm:$0xff] }
 0x552   : > { %vm13338_vm14 = vmmov %vm13337_vm9 }
 0x553   : > { %v4747_v35 = vor.u32 %v4746_v42, %v4743_v6  ;;  %vm13339_vm15 = vmmov %vm13337_vm9  ;;  %v4951_v42 = vld [vmem:[#allocation2 + $0x38] sm:$0xff] }
 0x554   : > { %v4785_v15 = vshrl.u32 %v4951_v42, 16 }
 0x557   : > { %6536 = vmatmul.mubr.bf16.gmra.mrb[96].mxu1 %v11674_v22  ;;  %v4947_v22 = vld [vmem:[#allocation2 + $0x18] sm:$0xff] }
 0x558   : > { %6543 = vmatprep.mubr.bf16.mxu1 %v4675_v24  ;;  %v4749_v21 = vshrl.u32 %v4947_v22, 16  ;;  %v4752_v2 = vshll.u32 %v4947_v22, 16  ;;  %v4986_v29 = vrot.slane %v4947_v22, 5  ;;  %v4761_v24 = vshll.u32 %v4948_v59, 16 }
 0x55a   : > { %v4751_v9 = vrot.slane %v4749_v21, 4  ;;  %v4754_v41 = vrot.slane %v4752_v2, 5  ;;  %v4987_v60 = vsel %vm4984_vm4, %v4985_v14, %v4986_v29  ;;  %v4989_v8 = vsel %vm4984_vm4, %v4986_v29, %v4988_v38 }
 0x55c   : > { %v4755_v0 = vor.u32 %v4754_v41, %v4751_v9  ;;  %v4779_v9 = vshll.u32 %v4950_v36, 16  ;;  %v4992_v41 = vrot.slane %v4950_v36, 5 }
 0x55e   : > { %v4756_v23 = vsel %vm13337_vm9, %v4747_v35, %v4755_v0  ;;  %v4781_v59 = vrot.slane %v4779_v9, 5  ;;  %v4994_v35 = vrot.slane %v4951_v42, 5 }
 0x55f   : > { %6544 = vmatmul.mubr.bf16.gmra.mrb[100].mxu1 %v4456_v58  ;;  %v4763_v58 = vrot.slane %v4761_v24, 5  ;;  %v4788_v24 = vshll.u32 %v4951_v42, 16 }
 0x560   : > { %6551 = vmatprep.mubr.bf16.mxu1 %v4684_v52  ;;  %v4949_v52 = vld [vmem:[#allocation2 + $0x28] sm:$0xff] }
 0x561   : > { %v4764_v10 = vor.u32 %v4763_v58, %v4760_v27  ;;  %v4767_v22 = vshrl.u32 %v4949_v52, 16  ;;  %v4770_v55 = vshll.u32 %v4949_v52, 16  ;;  %v4990_v33 = vrot.slane %v4949_v52, 5 }
 0x562   : > { %v4790_v27 = vrot.slane %v4788_v24, 5  ;;  %v4995_v58 = vsel %vm4984_vm4, %v4992_v41, %v4994_v35 }
 0x563   : > { %v4765_v57 = vsel %vm13338_vm14, %v4755_v0, %v4764_v10  ;;  %v4769_v21 = vrot.slane %v4767_v22, 4  ;;  %v4772_v2 = vrot.slane %v4770_v55, 5  ;;  %v4991_v32 = vsel %vm4984_vm4, %v4988_v38, %v4990_v33  ;;  %vm13340_vm14 = vmmov %vm13337_vm9 }
 0x564   : > { %v4993_v6 = vsel %vm4984_vm4, %v4990_v33, %v4992_v41 }
 0x565   : > { %v4773_v14 = vor.u32 %v4772_v2, %v4769_v21 }
 0x567   : > { %6552 = vmatmul.mubr.bf16.gmra.mrb[104].mxu1 %v4458_v12  ;;  %v4776_v12 = vshrl.u32 %v4950_v36, 16  ;;  %v4774_v29 = vsel %vm13339_vm15, %v4764_v10, %v4773_v14  ;;  %vm13341_vm15 = vmmov %vm13337_vm9 }
 0x568   : > { %6592 = vmatprep.mubr.bf16.mxu1 %v4987_v60 }
 0x569   : > { %v4778_v60 = vrot.slane %v4776_v12, 4 }
 0x56b   : > { %v4782_v0 = vor.u32 %v4781_v59, %v4778_v60 }
 0x56d   : > { %v4783_v38 = vsel %vm13337_vm9, %v4773_v14, %v4782_v0 }
 0x56f   : > { %6593 = vmatmul.mubr.bf16.vlgmr.msra.gmra.mrb[36].mxu1 %v4756_v23  ;;  %v4787_v23 = vrot.slane %v4785_v15, 4 }
 0x570   : > { %6600 = vmatprep.mubr.bf16.mxu1 %v4989_v8  ;;  %v4952_v8 = vld [vmem:[#allocation2 + $0x40] sm:$0xff] }
 0x571   : > { %v4791_v52 = vor.u32 %v4790_v27, %v4787_v23  ;;  %v4794_v10 = vshrl.u32 %v4952_v8, 16  ;;  %v4797_v22 = vshll.u32 %v4952_v8, 16  ;;  %v4996_v55 = vrot.slane %v4952_v8, 5 }
 0x573   : > { %v4792_v33 = vsel %vm13340_vm14, %v4782_v0, %v4791_v52  ;;  %v4799_v21 = vrot.slane %v4797_v22, 5  ;;  %v4997_v2 = vsel %vm4984_vm4, %v4994_v35, %v4996_v55  ;;  %vm13342_vm14 = vmmov %vm13337_vm9 }
 0x577   : > { %6601 = vmatmul.mubr.bf16.gmra.mrb[40].mxu1 %v4765_v57  ;;  %v4796_v57 = vrot.slane %v4794_v10, 4 }
 0x578   : > { %6608 = vmatprep.mubr.bf16.mxu1 %v4991_v32  ;;  %v4953_v32 = vld [vmem:[#allocation2 + $0x48] sm:$0xff] }
 0x579   : > { %v4800_v36 = vor.u32 %v4799_v21, %v4796_v57  ;;  %v4803_v14 = vshrl.u32 %v4953_v32, 16  ;;  %v4806_v12 = vshll.u32 %v4953_v32, 16  ;;  %v4998_v9 = vrot.slane %v4953_v32, 5 }
 0x57b   : > { %v4801_v41 = vsel %vm13341_vm15, %v4791_v52, %v4800_v36  ;;  %v4808_v60 = vrot.slane %v4806_v12, 5  ;;  %v4999_v59 = vsel %vm4984_vm4, %v4996_v55, %v4998_v9  ;;  %vm13343_vm15 = vmmov %vm13337_vm9 }
 0x57f   : > { %6609 = vmatmul.mubr.bf16.gmra.mrb[44].mxu1 %v4774_v29  ;;  %v4805_v29 = vrot.slane %v4803_v14, 4 }
 0x580   : > { %6616 = vmatprep.mubr.bf16.mxu1 %v4993_v6  ;;  %v4954_v6 = vld [vmem:[#allocation2 + $0x50] sm:$0xff] }
 0x581   : > { %v4809_v42 = vor.u32 %v4808_v60, %v4805_v29  ;;  %v4812_v0 = vshrl.u32 %v4954_v6, 16  ;;  %v4815_v15 = vshll.u32 %v4954_v6, 16  ;;  %v5000_v24 = vrot.slane %v4954_v6, 5 }
 0x583   : > { %v4810_v35 = vsel %vm13337_vm9, %v4800_v36, %v4809_v42  ;;  %v4817_v23 = vrot.slane %v4815_v15, 5  ;;  %v5001_v27 = vsel %vm4984_vm4, %v4998_v9, %v5000_v24 }
 0x587   : > { %6617 = vmatmul.mubr.bf16.gmra.mrb[48].mxu1 %v4783_v38  ;;  %v4814_v38 = vrot.slane %v4812_v0, 4 }
 0x588   : > { %6624 = vmatprep.mubr.bf16.mxu1 %v4995_v58  ;;  %v4955_v58 = vld [vmem:[#allocation2 + $0x58] sm:$0xff] }
 0x589   : > { %v4818_v8 = vor.u32 %v4817_v23, %v4814_v38  ;;  %v4821_v52 = vshrl.u32 %v4955_v58, 16  ;;  %v4824_v10 = vshll.u32 %v4955_v58, 16  ;;  %v5002_v22 = vrot.slane %v4955_v58, 5 }
 0x58b   : > { %v4819_v55 = vsel %vm13342_vm14, %v4809_v42, %v4818_v8  ;;  %v4826_v57 = vrot.slane %v4824_v10, 5  ;;  %v5003_v21 = vsel %vm4984_vm4, %v5000_v24, %v5002_v22  ;;  %vm13344_vm14 = vmmov %vm13337_vm9 }
 0x58f   : > { %6625 = vmatmul.mubr.bf16.gmra.mrb[52].mxu1 %v4792_v33  ;;  %v4823_v33 = vrot.slane %v4821_v52, 4 }
 0x590   : > { %6632 = vmatprep.mubr.bf16.mxu1 %v4997_v2  ;;  %v4956_v2 = vld [vmem:[#allocation2 + $0x60] sm:$0xff] }
 0x591   : > { %v4827_v32 = vor.u32 %v4826_v57, %v4823_v33  ;;  %v4830_v36 = vshrl.u32 %v4956_v2, 16  ;;  %v4833_v14 = vshll.u32 %v4956_v2, 16  ;;  %v5004_v12 = vrot.slane %v4956_v2, 5 }
 0x593   : > { %v4828_v9 = vsel %vm13343_vm15, %v4818_v8, %v4827_v32  ;;  %v4835_v29 = vrot.slane %v4833_v14, 5  ;;  %v5005_v60 = vsel %vm4984_vm4, %v5002_v22, %v5004_v12  ;;  %vm13345_vm15 = vmmov %vm13337_vm9 }
 0x597   : > { %6633 = vmatmul.mubr.bf16.gmra.mrb[56].mxu1 %v4801_v41  ;;  %v4832_v41 = vrot.slane %v4830_v36, 4 }
 0x598   : > { %6640 = vmatprep.mubr.bf16.mxu1 %v4999_v59  ;;  %v4957_v59 = vld [vmem:[#allocation2 + $0x68] sm:$0xff] }
 0x599   : > { %v4836_v6 = vor.u32 %v4835_v29, %v4832_v41  ;;  %v4839_v42 = vshrl.u32 %v4957_v59, 16  ;;  %v4842_v0 = vshll.u32 %v4957_v59, 16  ;;  %v5006_v15 = vrot.slane %v4957_v59, 5 }
 0x59b   : > { %v4837_v24 = vsel %vm13337_vm9, %v4827_v32, %v4836_v6  ;;  %v4844_v38 = vrot.slane %v4842_v0, 5  ;;  %v5007_v23 = vsel %vm4984_vm4, %v5004_v12, %v5006_v15 }
 0x59f   : > { %6641 = vmatmul.mubr.bf16.gmra.mrb[60].mxu1 %v4810_v35  ;;  %v4841_v35 = vrot.slane %v4839_v42, 4 }
 0x5a0   : > { %6648 = vmatprep.mubr.bf16.mxu1 %v5001_v27  ;;  %v4958_v27 = vld [vmem:[#allocation2 + $0x70] sm:$0xff] }
 0x5a1   : > { %v4845_v58 = vor.u32 %v4844_v38, %v4841_v35  ;;  %v4848_v8 = vshrl.u32 %v4958_v27, 16  ;;  %v4851_v52 = vshll.u32 %v4958_v27, 16  ;;  %v5008_v10 = vrot.slane %v4958_v27, 5 }
 0x5a2   : > { %v4875_v27 = vshrl.u32 %v11731_v47, 16 }
 0x5a3   : > { %v4846_v22 = vsel %vm13344_vm14, %v4836_v6, %v4845_v58  ;;  %v4853_v33 = vrot.slane %v4851_v52, 5  ;;  %v5009_v57 = vsel %vm4984_vm4, %v5006_v15, %v5008_v10  ;;  %vm13346_vm14 = vmmov %vm13337_vm9 }
 0x5a4   : > { %v4877_v52 = vrot.slane %v4875_v27, 4  ;;  %v13350_v27 = vrot.slane %v11733_v63, 5 }
 0x5a7   : > { %6649 = vmatmul.mubr.bf16.gmra.mrb[64].mxu1 %v4819_v55  ;;  %v4850_v55 = vrot.slane %v4848_v8, 4 }
 0x5a8   : > { %6656 = vmatprep.mubr.bf16.mxu1 %v5003_v21  ;;  %v4959_v21 = vld [vmem:[#allocation2 + $0x78] sm:$0xff] }
 0x5a9   : > { %v4854_v2 = vor.u32 %v4853_v33, %v4850_v55  ;;  %v4857_v32 = vshrl.u32 %v4959_v21, 16  ;;  %v4860_v36 = vshll.u32 %v4959_v21, 16  ;;  %v5010_v14 = vrot.slane %v4959_v21, 5  ;;  %v6992_v33 = vld [vmem:[#allocation10] sm:$0xff] }
 0x5aa   : > { %v9013_v21 = vmov 0.0|0.0  }
 0x5ab   : > { %v4855_v12 = vsel %vm13345_vm15, %v4845_v58, %v4854_v2  ;;  %v4862_v41 = vrot.slane %v4860_v36, 5  ;;  %v5011_v29 = vsel %vm4984_vm4, %v5008_v10, %v5010_v14  ;;  %v4878_v58 = vshll.u32 %v11731_v47, 16  ;;  %7905 = vmatprep.subr.bf16.mxu1 %v9013_v21  ;;  %7929 = vmatprep.subr.bf16.mxu0 %v9013_v21  ;;  %vm13348_vm15 = vmmov %vm13337_vm9 }
 0x5ad   : > { %v4880_v10 = vrot.slane %v4878_v58, 5 }
 0x5af   : > { %6657 = vmatmul.mubr.bf16.gmra.mrb[68].mxu1 %v4828_v9  ;;  %v4859_v9 = vrot.slane %v4857_v32, 4  ;;  %v4881_v32 = vor.u32 %v4880_v10, %v4877_v52  ;;  %v6996_v52 = vld [vmem:[#allocation10 + $0x20] sm:$0xff]  ;;  %v6997_v10 = vld [vmem:[#allocation10 + $0x28] sm:$0xff] }
 0x5b0   : > { %6664 = vmatprep.mubr.bf16.mxu1 %v5005_v60  ;;  %v4960_v60 = vld [vmem:[#allocation2 + $0x80] sm:$0xff] }
 0x5b1   : > { %v4863_v59 = vor.u32 %v4862_v41, %v4859_v9  ;;  %v4866_v6 = vshrl.u32 %v4960_v60, 16  ;;  %v4869_v42 = vshll.u32 %v4960_v60, 16  ;;  %v5012_v0 = vrot.slane %v4960_v60, 5  ;;  %v4964_v60 = vld [vmem:[#allocation2 + $0xa0] sm:$0x1f] }
 0x5b3   : > { %v4864_v15 = vsel %vm13337_vm9, %v4854_v2, %v4863_v59  ;;  %v4871_v35 = vrot.slane %v4869_v42, 5  ;;  %v5013_v38 = vsel %vm4984_vm4, %v5010_v14, %v5012_v0  ;;  %v4896_v14 = vshll.u32 %v11733_v63, 16 }
 0x5b5   : > { %v4898_v41 = vrot.slane %v4896_v14, 5  ;;  %v12040_v14 = vld [vmem:[%s12635_s4] ss:$0 sm:$0xff] }
 0x5b7   : > { %6665 = vmatmul.mubr.bf16.gmra.mrb[72].mxu1 %v4837_v24  ;;  %v4868_v24 = vrot.slane %v4866_v6, 4 }
 0x5b8   : > { %6672 = vmatprep.mubr.bf16.mxu1 %v5007_v23 }
 0x5b9   : > { %v4872_v23 = vor.u32 %v4871_v35, %v4868_v24 }
 0x5bb   : > { %v4873_v8 = vsel %vm13346_vm14, %v4863_v59, %v4872_v23  ;;  %v4882_v36 = vsel %vm13348_vm15, %v4872_v23, %v4881_v32  ;;  %vm13349_vm14 = vmmov %vm13337_vm9 }
 0x5bc   : > { %vm13351_vm15 = vmmov %vm13337_vm9 }
 0x5bf   : > { %6673 = vmatmul.mubr.bf16.gmra.mrb[76].mxu1 %v4846_v22  ;;  %v13347_v22 = vrot.slane %v11731_v47, 5  ;;  %v4893_v47 = vshrl.u32 %v11733_v63, 16  ;;  %v7000_v63 = vld [vmem:[#allocation10 + $0x40] sm:$0xff] }
 0x5c0   : > { %6680 = vmatprep.mubr.bf16.mxu1 %v5009_v57  ;;  %v6993_v57 = vld [vmem:[#allocation10 + $0x8] sm:$0xff] }
 0x5c1   : > { %v5015_v55 = vsel %vm4984_vm4, %v5012_v0, %v13347_v22  ;;  %v7906_v2 = vpack.c.bf16 %v6993_v57, %v6992_v33  ;;  %v4895_v9 = vrot.slane %v4893_v47, 4  ;;  %v6994_v0 = vld [vmem:[#allocation10 + $0x10] sm:$0xff]  ;;  %v7912_v22 = vpack.c.bf16 %v6997_v10, %v6996_v52  ;;  %v7001_v57 = vld [vmem:[#allocation10 + $0x48] sm:$0xff] }
 0x5c3   : > { %7907 = vmatpush3.bf16.msra.mxu1 %v7906_v2  ;;  %v4899_v59 = vor.u32 %v4898_v41, %v4895_v9  ;;  %v7918_v2 = vpack.c.bf16 %v7001_v57, %v7000_v63  ;;  %v7004_v9 = vld [vmem:[#allocation10 + $0x60] sm:$0xff]  ;;  %v7005_v41 = vld [vmem:[#allocation10 + $0x68] sm:$0xff] }
 0x5c4   : > { %7908 = vmatprep.subr.bf16.mxu1 %v9013_v21 }
 0x5c5   : > { %v4900_v35 = vsel %vm13349_vm14, %v11970_v16, %v4899_v59 }
 0x5c7   : > { %6681 = vmatmul.mubr.bf16.gmra.mrb[80].mxu1 %v4855_v12  ;;  %v4891_v12 = vsel %vm13337_vm9, %v4881_v32, %v11970_v16  ;;  %v6998_v16 = vld [vmem:[#allocation10 + $0x30] sm:$0xff] }
 0x5c8   : > { %6688 = vmatprep.mubr.bf16.mxu1 %v5011_v29  ;;  %v4739_v29 = vld [vmem:[#allocation2 + $0xa0] sm:$0x1f]  ;;  %v7002_v32 = vld [vmem:[#allocation10 + $0x50] sm:$0xff] }
 0x5c9   : > { %v4902_v6 = vshrl.u32 %v4739_v29, 16  ;;  %v4905_v42 = vshll.u32 %v4739_v29, 16 }
 0x5cb   : > { %v4907_v23 = vrot.slane %v4905_v42, 5 }
 0x5cf   : > { %6689 = vmatmul.mubr.bf16.gmra.mrb[84].mxu1 %v4864_v15  ;;  %v6995_v15 = vld [vmem:[#allocation10 + $0x18] sm:$0xff] }
 0x5d0   : > { %6696 = vmatprep.mubr.bf16.mxu1 %v5013_v38  ;;  %v7909_v24 = vpack.c.bf16 %v6995_v15, %v6994_v0  ;;  %v4904_v38 = vrot.slane %v4902_v6, 4 }
 0x5d2   : > { %7910 = vmatpush3.bf16.msra.mxu1 %v7909_v24  ;;  %v4908_v58 = vor.u32 %v4907_v23, %v4904_v38 }
 0x5d3   : > { %7911 = vmatprep.subr.bf16.mxu1 %v9013_v21 }
 0x5d6   : > { %7913 = vmatpush3.bf16.msra.mxu1 %v7912_v22 }
 0x5d7   : > { %6697 = vmatmul.mubr.bf16.gmra.mrb[88].mxu1 %v4873_v8  ;;  %v4909_v8 = vsel %vm13351_vm15, %v4899_v59, %v4908_v58  ;;  %7914 = vmatprep.subr.bf16.mxu1 %v9013_v21  ;;  %v7924_v59 = vpack.c.bf16 %v7005_v41, %v7004_v9  ;;  %v13353_v9 = vld [vmem:[#allocation35_spill] sm:$0xff] }
 0x5d8   : > { %6704 = vmatprep.mubr.bf16.mxu1 %v5015_v55  ;;  %v6999_v55 = vld [vmem:[#allocation10 + $0x38] sm:$0xff] }
 0x5d9   : > { %v7915_v33 = vpack.c.bf16 %v6999_v55, %v6998_v16 }
 0x5db   : > { %7916 = vmatpush3.bf16.msra.mxu1 %v7915_v33 }
 0x5dc   : > { %7917 = vmatprep.subr.bf16.mxu1 %v9013_v21 }
 0x5df   : > { %6705 = vmatmul.mubr.bf16.gmra.mrb[92].mxu1 %v4882_v36  ;;  %v7003_v36 = vld [vmem:[#allocation10 + $0x58] sm:$0xff] }
 0x5e0   : > { %6712 = vmatprep.mubr.bf16.mxu1 %v11749_v7  ;;  %v5020_v7 = vrot.slane %v4964_v60, 5  ;;  %7919 = vmatpush3.bf16.msra.mxu1 %v7918_v2  ;;  %v7921_v47 = vpack.c.bf16 %v7003_v36, %v7002_v32  ;;  %v13352_v2 = vld [vmem:[#allocation33_spill] sm:$0xff] }
 0x5e1   : > { %7920 = vmatprep.subr.bf16.mxu1 %v9013_v21 }
 0x5e4   : > { %7922 = vmatpush3.bf16.msra.mxu1 %v7921_v47 }
 0x5e5   : > { %7923 = vmatprep.subr.bf16.mxu1 %v9013_v21 }
 0x5e7   : > { %6713 = vmatmul.mubr.bf16.gmra.mrb[96].mxu1 %v4891_v12 }
 0x5e8   : > { %6720 = vmatprep.mubr.bf16.mxu1 %v11754_v19  ;;  %v5021_v19 = vsel %vm4984_vm4, %v13350_v27, %v5020_v7  ;;  %7925 = vmatpush3.bf16.msra.mxu1 %v7924_v59  ;;  %vm9014_vm4 = vmmov 0   ;;  %v7080_v59 = vld [vmem:[#allocation12] sm:$0xff] }
 0x5e9   : > { %7926 = vmatprep.subr.bf16.mxu1 %v9013_v21 }
 0x5ef   : > { %6721 = vmatmul.mubr.bf16.gmra.mrb[100].mxu1 %v4900_v35 }
 0x5f0   : > { %6728 = vmatprep.mubr.bf16.mxu1 %v5021_v19 }
 0x5f7   : > { %6729 = vmatmul.mubr.bf16.gmra.mrb[104].mxu1 %v4909_v8 }
 0x642   : > { %v6594_v12 = vpop.f32.mrb[36].mxu1 }
 0x643   : > { %v7989_v29 = vadd.f32 %v12040_v14, %v6594_v12  ;;  %v6596_v60 = vpop.f32.mrb[37].mxu1  ;;  %v7006_v12 = vld [vmem:[#allocation10 + $0x70] sm:$0xff] }
 0x644   : > { %v6597_v6 = vpop.f32.mrb[38].mxu1 }
 0x645   : > { %v12044_v42 = vadd.f32 %v7989_v29, %v11791_v25  ;;  %v7990_v0 = vadd.f32 %v12040_v14, %v6597_v6  ;;  %v6599_v15 = vpop.f32.mrb[39].mxu1  ;;  %v7081_v6 = vld [vmem:[#allocation12 + $0x8] sm:$0xff] }
 0x647   : > { %v12049_v7 = vadd.f32 %v7990_v0, %v11796_v4  ;;  %v7082_v0 = vld [vmem:[#allocation12 + $0x10] sm:$0xff] }
 0x64a   : > { %v6602_v24 = vpop.f32.mrb[40].mxu1 }
 0x64b   : > { %v7991_v35 = vadd.f32 %v12040_v14, %v6602_v24  ;;  %v6604_v38 = vpop.f32.mrb[41].mxu1 }
 0x64c   : > { %v6605_v23 = vpop.f32.mrb[42].mxu1  ;;  %v7083_v38 = vld [vmem:[#allocation12 + $0x18] sm:$0xff] }
 0x64d   : > { %v12053_v27 = vadd.f32 %v7991_v35, %v11789_v40  ;;  %v7992_v25 = vadd.f32 %v12040_v14, %v6605_v23  ;;  %v6607_v19 = vpop.f32.mrb[43].mxu1  ;;  %v7930_v35 = vpack.c.bf16 %v7081_v6, %v7080_v59 }
 0x64f   : > { %v12057_v58 = vadd.f32 %v7992_v25, %v11793_v61  ;;  %v13354_v25 = vld [vmem:[#allocation34_spill] sm:$0xff]  ;;  %7931 = vmatpush3.bf16.msra.mxu0 %v7930_v35  ;;  %v7088_v35 = vld [vmem:[#allocation12 + $0x40] sm:$0xff] }
 0x650   : > { %7932 = vmatprep.subr.bf16.mxu0 %v9013_v21 }
 0x652   : > { %v6610_v8 = vpop.f32.mrb[44].mxu1 }
 0x653   : > { %v7993_v52 = vadd.f32 %v12040_v14, %v6610_v8  ;;  %v6612_v10 = vpop.f32.mrb[45].mxu1 }
 0x654   : > { %v6613_v4 = vpop.f32.mrb[46].mxu1  ;;  %v7933_v10 = vpack.c.bf16 %v7083_v38, %v7082_v0  ;;  %v7089_v38 = vld [vmem:[#allocation12 + $0x48] sm:$0xff] }
 0x655   : > { %v12061_v22 = vadd.f32 %v7993_v52, %v11809_v43  ;;  %v7994_v16 = vadd.f32 %v12040_v14, %v6613_v4  ;;  %v6615_v55 = vpop.f32.mrb[47].mxu1  ;;  %v7007_v43 = vld [vmem:[#allocation10 + $0x78] sm:$0xff]  ;;  %v7084_v4 = vld [vmem:[#allocation12 + $0x20] sm:$0xff] }
 0x656   : > { %v7927_v29 = vpack.c.bf16 %v7007_v43, %v7006_v12  ;;  %7934 = vmatpush3.bf16.msra.mxu0 %v7933_v10  ;;  %v13357_v43 = vld [vmem:[#allocation68_spill] sm:$0xff] }
 0x657   : > { %v12065_v40 = vadd.f32 %v7994_v16, %v11814_v1  ;;  %v9015_v1 = vmov 0.0   ;;  %v7085_v16 = vld [vmem:[#allocation12 + $0x28] sm:$0xff]  ;;  %7935 = vmatprep.subr.bf16.mxu0 %v9013_v21  ;;  %vm13358_vm14 = vnez %v13357_v43 }
 0x658   : > { %7867 = vmatprep.mubr.msk.f32.mxu1 %vm9014_vm4, %v9015_v1  ;;  %7902 = vmatprep.mubr.msk.f32.mxu0 %vm9014_vm4, %v9015_v1 }
 0x659   : > { %7928 = vmatpush3.bf16.msra.mxu1 %v7927_v29  ;;  %v13359_v29 = vld [vmem:[#allocation74_spill] sm:$0xff] }
 0x65a   : > { %v6618_v33 = vpop.f32.mrb[48].mxu1  ;;  %vm13360_vm15 = vnez %v13359_v29 }
 0x65b   : > { %v7995_v63 = vadd.f32 %v12040_v14, %v6618_v33  ;;  %v6620_v57 = vpop.f32.mrb[49].mxu1  ;;  %v7936_v33 = vpack.c.bf16 %v7085_v16, %v7084_v4  ;;  %v6916_v1 = vsel %vm13360_vm15, %v12053_v27, 0.0  ;;  %v7942_v4 = vpack.c.bf16 %v7089_v38, %v7088_v35 }
 0x65c   : > { %v6621_v61 = vpop.f32.mrb[50].mxu1  ;;  %v7086_v57 = vld [vmem:[#allocation12 + $0x30] sm:$0xff] }
 0x65d   : > { %v12069_v32 = vadd.f32 %v7995_v63, %v13352_v2  ;;  %v7996_v36 = vadd.f32 %v12040_v14, %v6621_v61  ;;  %v6623_v47 = vpop.f32.mrb[51].mxu1  ;;  %v7087_v61 = vld [vmem:[#allocation12 + $0x38] sm:$0xff]  ;;  %v13355_v2 = vld [vmem:[#allocation69_spill] sm:$0xff]  ;;  %7937 = vmatpush3.bf16.msra.mxu0 %v7936_v33  ;;  %v7090_v33 = vld [vmem:[#allocation12 + $0x50] sm:$0xff] }
 0x65e   : > { %vm13356_vm9 = vnez %v13355_v2  ;;  %7938 = vmatprep.subr.bf16.mxu0 %v9013_v21 }
 0x65f   : > { %v12073_v41 = vadd.f32 %v7996_v36, %v13353_v9  ;;  %v6915_v36 = vsel %vm13356_vm9, %v12049_v7, 0.0  ;;  %v6914_v9 = vsel %vm13358_vm14, %v12044_v42, 0.0 }
 0x662   : > { %v6626_v60 = vpop.f32.mrb[52].mxu1 }
 0x663   : > { %v7997_v15 = vadd.f32 %v12040_v14, %v6626_v60  ;;  %v6628_v24 = vpop.f32.mrb[53].mxu1  ;;  %v13361_v60 = vld [vmem:[#allocation32_spill] sm:$0xff] }
 0x664   : > { %v6629_v23 = vpop.f32.mrb[54].mxu1  ;;  %v6950_v24 = vadd.f32 %v6915_v36, %v6914_v9 }
 0x665   : > { %v12077_v19 = vadd.f32 %v7997_v15, %v13354_v25  ;;  %v7998_v8 = vadd.f32 %v12040_v14, %v6629_v23  ;;  %v6631_v52 = vpop.f32.mrb[55].mxu1  ;;  %v7939_v15 = vpack.c.bf16 %v7087_v61, %v7086_v57  ;;  %v13362_v23 = vld [vmem:[#allocation37_spill] sm:$0xff]  ;;  %v13365_v57 = vld [vmem:[#allocation79_spill] sm:$0xff] }
 0x666   : > { %v13363_v52 = vld [vmem:[#allocation75_spill] sm:$0xff]  ;;  %vm13366_vm9 = vnez %v13365_v57 }
 0x667   : > { %v12082_v55 = vadd.f32 %v7998_v8, %v11828_v53  ;;  %v6951_v8 = vadd.f32 %v6950_v24, %v6916_v1  ;;  %vm13364_vm4 = vnez %v13363_v52  ;;  %7940 = vmatpush3.bf16.msra.mxu0 %v7939_v15  ;;  %v6918_v61 = vsel %vm13366_vm9, %v12061_v22, 0.0  ;;  %v7094_v52 = vld [vmem:[#allocation12 + $0x70] sm:$0xff] }
 0x668   : > { %v6917_v10 = vsel %vm13364_vm4, %v12057_v58, 0.0  ;;  %7941 = vmatprep.subr.bf16.mxu0 %v9013_v21 }
 0x66a   : > { %v6634_v63 = vpop.f32.mrb[56].mxu1 }
 0x66b   : > { %v7999_v47 = vadd.f32 %v12040_v14, %v6634_v63  ;;  %v6636_v12 = vpop.f32.mrb[57].mxu1  ;;  %v7091_v63 = vld [vmem:[#allocation12 + $0x58] sm:$0xff]  ;;  %7943 = vmatpush3.bf16.msra.mxu0 %v7942_v4 }
 0x66c   : > { %v6637_v53 = vpop.f32.mrb[58].mxu1  ;;  %v7945_v29 = vpack.c.bf16 %v7091_v63, %v7090_v33  ;;  %7944 = vmatprep.subr.bf16.mxu0 %v9013_v21 }
 0x66d   : > { %v12096_v59 = vadd.f32 %v7999_v47, %v13361_v60  ;;  %v8000_v6 = vadd.f32 %v12040_v14, %v6637_v53  ;;  %v6639_v0 = vpop.f32.mrb[59].mxu1  ;;  %v6952_v47 = vadd.f32 %v6951_v8, %v6917_v10  ;;  %v7092_v60 = vld [vmem:[#allocation12 + $0x60] sm:$0xff]  ;;  %v7095_v10 = vld [vmem:[#allocation12 + $0x78] sm:$0xff] }
 0x66e   : > { %v13367_v0 = vld [vmem:[#allocation80_spill] sm:$0xff] }
 0x66f   : > { %v12101_v25 = vadd.f32 %v8000_v6, %v13362_v23  ;;  %v6953_v1 = vadd.f32 %v6952_v47, %v6918_v61  ;;  %v7093_v6 = vld [vmem:[#allocation12 + $0x68] sm:$0xff]  ;;  %vm13368_vm14 = vnez %v13367_v0  ;;  %7946 = vmatpush3.bf16.msra.mxu0 %v7945_v29  ;;  %v7951_v47 = vpack.c.bf16 %v7095_v10, %v7094_v52 }
 0x670   : > { %v6919_v15 = vsel %vm13368_vm14, %v12065_v40, 0.0  ;;  %v7948_v38 = vpack.c.bf16 %v7093_v6, %v7092_v60  ;;  %7947 = vmatprep.subr.bf16.mxu0 %v9013_v21 }
 0x671   : > { %v6954_v23 = vadd.f32 %v6953_v1, %v6919_v15 }
 0x672   : > { %v6642_v16 = vpop.f32.mrb[60].mxu1 }
 0x673   : > { %v8001_v2 = vadd.f32 %v12040_v14, %v6642_v16  ;;  %v6644_v36 = vpop.f32.mrb[61].mxu1  ;;  %7949 = vmatpush3.bf16.msra.mxu0 %v7948_v38 }
 0x674   : > { %v6645_v12 = vpop.f32.mrb[62].mxu1  ;;  %7950 = vmatprep.subr.bf16.mxu0 %v9013_v21  ;;  %v13377_v21 = vld [vmem:[#allocation47_spill] sm:$0xff] }
 0x675   : > { %v12112_v43 = vadd.f32 %v8001_v2, %v11836_v13  ;;  %v8002_v9 = vadd.f32 %v12040_v14, %v6645_v12  ;;  %v6647_v53 = vpop.f32.mrb[63].mxu1  ;;  %v13369_v13 = vld [vmem:[#allocation40_spill] sm:$0xff] }
 0x676   : > { %vm13370_vm15 = vnez %v13369_v13  ;;  %v13373_v12 = vld [vmem:[#allocation48_spill] sm:$0xff] }
 0x677   : > { %v12120_v24 = vadd.f32 %v8002_v9, %v11843_v17  ;;  %v6920_v35 = vsel %vm13370_vm15, %v12069_v32, 0.0  ;;  %v13371_v17 = vld [vmem:[#allocation50_spill] sm:$0xff]  ;;  %vm13374_vm9 = vnez %v13373_v12  ;;  %7952 = vmatpush3.bf16.msra.mxu0 %v7951_v47  ;;  %vm13378_vm15 = vnez %v13377_v21 }
 0x678   : > { %v6955_v33 = vadd.f32 %v6954_v23, %v6920_v35  ;;  %vm13372_vm4 = vnez %v13371_v17  ;;  %v6922_v9 = vsel %vm13374_vm9, %v12077_v19, 0.0  ;;  %v6924_v35 = vsel %vm13378_vm15, %v12096_v59, 0.0 }
 0x679   : > { %v6921_v57 = vsel %vm13372_vm4, %v12073_v41, 0.0 }
 0x67a   : > { %v6650_v8 = vpop.f32.mrb[64].mxu1  ;;  %v6956_v29 = vadd.f32 %v6955_v33, %v6921_v57 }
 0x67b   : > { %v8003_v4 = vadd.f32 %v12040_v14, %v6650_v8  ;;  %v6652_v16 = vpop.f32.mrb[65].mxu1 }
 0x67c   : > { %v6653_v63 = vpop.f32.mrb[66].mxu1  ;;  %v6957_v1 = vadd.f32 %v6956_v29, %v6922_v9  ;;  %v13383_v29 = vld [vmem:[#allocation51_spill] sm:$0xff] }
 0x67d   : > { %v12131_v61 = vadd.f32 %v8003_v4, %v11834_v44  ;;  %v8004_v2 = vadd.f32 %v12040_v14, %v6653_v63  ;;  %v6655_v36 = vpop.f32.mrb[67].mxu1  ;;  %v13375_v44 = vld [vmem:[#allocation21_spill] sm:$0xff]  ;;  %v13379_v4 = vld [vmem:[#allocation46_spill] sm:$0xff] }
 0x67e   : > { %vm13376_vm14 = vnez %v13375_v44  ;;  %vm13380_vm4 = vnez %v13379_v4  ;;  %v13381_v63 = vld [vmem:[#allocation22_spill] sm:$0xff] }
 0x67f   : > { %v12139_v53 = vadd.f32 %v8004_v2, %v11839_v34  ;;  %v6923_v6 = vsel %vm13376_vm14, %v12082_v55, 0.0  ;;  %v6925_v16 = vsel %vm13380_vm4, %v12101_v25, 0.0  ;;  %vm13382_vm9 = vnez %v13381_v63 }
 0x680   : > { %v6958_v8 = vadd.f32 %v6957_v1, %v6923_v6  ;;  %v6926_v17 = vsel %vm13382_vm9, %v12112_v43, 0.0  ;;  %vm13384_vm14 = vnez %v13383_v29  ;;  %v6928_v6 = vsel %vm10813_vm2, %v12131_v61, 0.0 }
 0x681   : > { %v6927_v1 = vsel %vm13384_vm14, %v12120_v24, 0.0 }
 0x682   : > { %v6658_v60 = vpop.f32.mrb[68].mxu1  ;;  %v6959_v10 = vadd.f32 %v6958_v8, %v6924_v35 }
 0x683   : > { %v8005_v0 = vadd.f32 %v12040_v14, %v6658_v60  ;;  %v6660_v15 = vpop.f32.mrb[69].mxu1 }
 0x684   : > { %v6661_v13 = vpop.f32.mrb[70].mxu1  ;;  %v6960_v2 = vadd.f32 %v6959_v10, %v6925_v16 }
 0x685   : > { %v12149_v38 = vadd.f32 %v8005_v0, %v11852_v37  ;;  %v8006_v34 = vadd.f32 %v12040_v14, %v6661_v13  ;;  %v6663_v23 = vpop.f32.mrb[71].mxu1 }
 0x686   : > { %v6961_v9 = vadd.f32 %v6960_v2, %v6926_v17  ;;  %v6929_v23 = vsel %vm10822_vm5, %v12139_v53, 0.0 }
 0x687   : > { %v12153_v52 = vadd.f32 %v8006_v34, %v11858_v26  ;;  %v6930_v16 = vsel %vm10885_vm7, %v12149_v38, 0.0 }
 0x688   : > { %v6962_v0 = vadd.f32 %v6961_v9, %v6927_v1 }
 0x68a   : > { %v6666_v33 = vpop.f32.mrb[72].mxu1  ;;  %v6963_v21 = vadd.f32 %v6962_v0, %v6928_v6 }
 0x68b   : > { %v8007_v37 = vadd.f32 %v12040_v14, %v6666_v33  ;;  %v6668_v57 = vpop.f32.mrb[73].mxu1 }
 0x68c   : > { %v6669_v36 = vpop.f32.mrb[74].mxu1  ;;  %v6964_v63 = vadd.f32 %v6963_v21, %v6929_v23  ;;  %v13388_v57 = vld [vmem:[#allocation52_spill] sm:$0xff]  ;;  %v13394_v21 = vld [vmem:[#allocation53_spill] sm:$0xff] }
 0x68d   : > { %v12163_v47 = vadd.f32 %v8007_v37, %v11850_v49  ;;  %v8008_v26 = vadd.f32 %v12040_v14, %v6669_v36  ;;  %v6671_v12 = vpop.f32.mrb[75].mxu1  ;;  %vm13389_vm2 = vnez %v13388_v57  ;;  %vm13395_vm15 = vnez %v13394_v21 }
 0x68e   : > { %v6965_v17 = vadd.f32 %v6964_v63, %v6930_v16  ;;  %v6931_v2 = vsel %vm13389_vm2, %v12153_v52, 0.0  ;;  %v13390_v12 = vld [vmem:[#allocation62_spill] sm:$0xff]  ;;  %v13396_v63 = vld [vmem:[#allocation23_spill] sm:$0xff] }
 0x68f   : > { %v12170_v60 = vadd.f32 %v8008_v26, %v11855_v20  ;;  %vm13391_vm5 = vnez %v13390_v12  ;;  %vm13397_vm4 = vnez %v13396_v63 }
 0x690   : > { %v6932_v9 = vsel %vm13391_vm5, %v12163_v47, 0.0  ;;  %v6966_v44 = vadd.f32 %v6965_v17, %v6931_v2 }
 0x692   : > { %v6674_v15 = vpop.f32.mrb[76].mxu1  ;;  %v6967_v0 = vadd.f32 %v6966_v44, %v6932_v9 }
 0x693   : > { %v8009_v49 = vadd.f32 %v12040_v14, %v6674_v15  ;;  %v6676_v13 = vpop.f32.mrb[77].mxu1  ;;  %v13392_v15 = vld [vmem:[#allocation60_spill] sm:$0xff] }
 0x694   : > { %v6677_v35 = vpop.f32.mrb[78].mxu1  ;;  %vm13393_vm7 = vnez %v13392_v15 }
 0x695   : > { %v12180_v8 = vadd.f32 %v8009_v49, %v11880_v45  ;;  %v8010_v20 = vadd.f32 %v12040_v14, %v6677_v35  ;;  %v6679_v10 = vpop.f32.mrb[79].mxu1  ;;  %v6933_v49 = vsel %vm13393_vm7, %v12170_v60, 0.0 }
 0x696   : > { %v6968_v23 = vadd.f32 %v6967_v0, %v6933_v49 }
 0x697   : > { %v12187_v33 = vadd.f32 %v8010_v20, %v11887_v18  ;;  %v6934_v35 = vsel %vm13395_vm15, %v12180_v8, 0.0 }
 0x698   : > { %v6969_v16 = vadd.f32 %v6968_v23, %v6934_v35 }
 0x699   : > { %v6935_v17 = vsel %vm13397_vm4, %v12187_v33, 0.0 }
 0x69a   : > { %v6682_v37 = vpop.f32.mrb[80].mxu1 }
 0x69b   : > { %v8011_v45 = vadd.f32 %v12040_v14, %v6682_v37  ;;  %v6684_v36 = vpop.f32.mrb[81].mxu1 }
 0x69c   : > { %v6685_v26 = vpop.f32.mrb[82].mxu1 }
 0x69d   : > { %v12197_v29 = vadd.f32 %v8011_v45, %v11878_v39  ;;  %v8012_v18 = vadd.f32 %v12040_v14, %v6685_v26  ;;  %v6687_v1 = vpop.f32.mrb[83].mxu1  ;;  %v6970_v45 = vadd.f32 %v6969_v16, %v6935_v17 }
 0x69f   : > { %v12201_v6 = vadd.f32 %v8012_v18, %v11884_v50  ;;  %v6936_v2 = vsel %vm11095_vm8, %v12197_v29, 0.0  ;;  %v13399_v18 = vld [vmem:[#allocation64_spill] sm:$0xff] }
 0x6a0   : > { %v6971_v12 = vadd.f32 %v6970_v45, %v6936_v2  ;;  %vm13400_vm9 = vnez %v13399_v18 }
 0x6a1   : > { %v6937_v1 = vsel %vm13400_vm9, %v12201_v6, 0.0 }
 0x6a2   : > { %v6690_v13 = vpop.f32.mrb[84].mxu1  ;;  %v6972_v21 = vadd.f32 %v6971_v12, %v6937_v1  ;;  %v13406_v12 = vld [vmem:[#allocation56_spill] sm:$0xff] }
 0x6a3   : > { %v8013_v39 = vadd.f32 %v12040_v14, %v6690_v13  ;;  %v6692_v34 = vpop.f32.mrb[85].mxu1 }
 0x6a4   : > { %v6693_v20 = vpop.f32.mrb[86].mxu1  ;;  %v13402_v34 = vld [vmem:[#allocation54_spill] sm:$0xff] }
 0x6a5   : > { %v12211_v10 = vadd.f32 %v8013_v39, %v11906_v46  ;;  %v8014_v50 = vadd.f32 %v12040_v14, %v6693_v20  ;;  %v6695_v4 = vpop.f32.mrb[87].mxu1  ;;  %vm13403_vm8 = vnez %v13402_v34 }
 0x6a7   : > { %v12218_v37 = vadd.f32 %v8014_v50, %v11913_v51  ;;  %v6938_v49 = vsel %vm11173_vm13, %v12211_v10, 0.0  ;;  %vm13407_vm13 = vnez %v13406_v12 }
 0x6a8   : > { %v6973_v35 = vadd.f32 %v6972_v21, %v6938_v49  ;;  %v13408_v21 = vld [vmem:[#allocation28_spill] sm:$0xff] }
 0x6a9   : > { %v6939_v23 = vsel %vm13403_vm8, %v12218_v37, 0.0 }
 0x6aa   : > { %v6698_v36 = vpop.f32.mrb[88].mxu1  ;;  %v6974_v57 = vadd.f32 %v6973_v35, %v6939_v23 }
 0x6ab   : > { %v8015_v46 = vadd.f32 %v12040_v14, %v6698_v36  ;;  %v6700_v26 = vpop.f32.mrb[89].mxu1 }
 0x6ac   : > { %v6701_v9 = vpop.f32.mrb[90].mxu1 }
 0x6ad   : > { %v12228_v44 = vadd.f32 %v8015_v46, %v11904_v28  ;;  %v8016_v51 = vadd.f32 %v12040_v14, %v6701_v9  ;;  %v6703_v0 = vpop.f32.mrb[91].mxu1 }
 0x6af   : > { %v12235_v13 = vadd.f32 %v8016_v51, %v11910_v54  ;;  %v6940_v16 = vsel %vm11238_vm12, %v12228_v44, 0.0 }
 0x6b0   : > { %v6975_v45 = vadd.f32 %v6974_v57, %v6940_v16 }
 0x6b1   : > { %v6941_v46 = vsel %vm11247_vm11, %v12235_v13, 0.0  ;;  %vm13409_vm11 = vnez %v13408_v21 }
 0x6b2   : > { %v6706_v39 = vpop.f32.mrb[92].mxu1  ;;  %v6976_v1 = vadd.f32 %v6975_v45, %v6941_v46 }
 0x6b3   : > { %v8017_v28 = vadd.f32 %v12040_v14, %v6706_v39  ;;  %v6708_v20 = vpop.f32.mrb[93].mxu1 }
 0x6b4   : > { %v6709_v50 = vpop.f32.mrb[94].mxu1 }
 0x6b5   : > { %v12245_v63 = vadd.f32 %v8017_v28, %v11932_v5  ;;  %v8018_v54 = vadd.f32 %v12040_v14, %v6709_v50  ;;  %v6711_v17 = vpop.f32.mrb[95].mxu1 }
 0x6b7   : > { %v12249_v2 = vadd.f32 %v8018_v54, %v11936_v48  ;;  %v6942_v9 = vsel %vm13407_vm13, %v12245_v63, 0.0  ;;  %v13411_v54 = vld [vmem:[#allocation70_spill] sm:$0xff] }
 0x6b8   : > { %v6977_v49 = vadd.f32 %v6976_v1, %v6942_v9  ;;  %vm13412_vm12 = vnez %v13411_v54 }
 0x6b9   : > { %v6943_v35 = vsel %vm13409_vm11, %v12249_v2, 0.0 }
 0x6ba   : > { %v6714_v26 = vpop.f32.mrb[96].mxu1  ;;  %v6978_v28 = vadd.f32 %v6977_v49, %v6943_v35 }
 0x6bb   : > { %v8019_v5 = vadd.f32 %v12040_v14, %v6714_v26  ;;  %v6716_v18 = vpop.f32.mrb[97].mxu1 }
 0x6bc   : > { %v6717_v51 = vpop.f32.mrb[98].mxu1 }
 0x6bd   : > { %v12259_v0 = vadd.f32 %v8019_v5, %v11930_v56  ;;  %v8020_v48 = vadd.f32 %v12040_v14, %v6717_v51  ;;  %v6719_v15 = vpop.f32.mrb[99].mxu1 }
 0x6bf   : > { %v12266_v39 = vadd.f32 %v8020_v48, %v11934_v31  ;;  %v6944_v23 = vsel %vm11362_vm6, %v12259_v0, 0.0 }
 0x6c0   : > { %v6979_v4 = vadd.f32 %v6978_v28, %v6944_v23 }
 0x6c1   : > { %v6945_v17 = vsel %vm13412_vm12, %v12266_v39, 0.0 }
 0x6c2   : > { %v6722_v20 = vpop.f32.mrb[100].mxu1  ;;  %v6980_v12 = vadd.f32 %v6979_v4, %v6945_v17 }
 0x6c3   : > { %v8021_v56 = vadd.f32 %v12040_v14, %v6722_v20  ;;  %v6724_v50 = vpop.f32.mrb[101].mxu1 }
 0x6c4   : > { %v6725_v16 = vpop.f32.mrb[102].mxu1 }
 0x6c5   : > { %v12276_v57 = vadd.f32 %v8021_v56, %v11945_v62  ;;  %v8022_v31 = vadd.f32 %v12040_v14, %v6725_v16  ;;  %v6727_v45 = vpop.f32.mrb[103].mxu1 }
 0x6c6   : > { %v7008_v45 = vld [vmem:[%s12637_s6] sm:$0x1] }
 0x6c7   : > { %v6946_v46 = vsel %vm11457_vm1, %v12276_v57, 0.0  ;;  %v12283_v26 = vadd.f32 %v8022_v31, %v11949_v3 }
 0x6c8   : > { %v6981_v9 = vadd.f32 %v6980_v12, %v6946_v46 }
 0x6c9   : > { %v6947_v1 = vsel %vm11461_vm0, %v12283_v26, 0.0 }
 0x6ca   : > { %v6730_v5 = vpop.f32.mrb[104].mxu1  ;;  %v6982_v35 = vadd.f32 %v6981_v9, %v6947_v1  ;;  %v7096_v9 = vld [vmem:[%s12639_s8] sm:$0x1] }
 0x6cb   : > { %v8023_v62 = vadd.f32 %v12040_v14, %v6730_v5  ;;  %v6732_v51 = vpop.f32.mrb[105].mxu1 }
 0x6cc   : > { %v6733_v48 = vpop.f32.mrb[106].mxu1 }
 0x6cd   : > { %v12290_v15 = vadd.f32 %v8023_v62, %v11943_v11  ;;  %v8024_v49 = vadd.f32 %v12040_v14, %v6733_v48  ;;  %v6735_v21 = vpop.f32.mrb[107].mxu1 }
 0x6cf   : > { %v6948_v34 = vsel %vm11492_vm10, %v12290_v15, 0.0  ;;  %v12297_v23 = vadd.f32 %v8024_v49, %v11947_v30  ;;  %v13417_v49 = vld [vmem:[#allocation31_spill] sm:$0xff] }
 0x6d0   : > { %v6983_v28 = vadd.f32 %v6982_v35, %v6948_v34  ;;  %v7211_v21 = vsub.s32 0, %v13417_v49 }
 0x6d1   : > { %v6949_v56 = vsel %vm11496_vm3, %v12297_v23, 0.0 }
 0x6d2   : > { %v6984_v50 = vadd.f32 %v6983_v28, %v6949_v56 }
 0x6d4   : > { %v6985_v4 = vrot.slane %v6984_v50, 4 }
 0x6d6   : > { %v6986_v11 = vadd.f32 %v6985_v4, %v6984_v50 }
 0x6d8   : > { %v6987_v16 = vrot.slane %v6986_v11, 2 }
 0x6da   : > { %v6988_v54 = vadd.f32 %v6987_v16, %v6986_v11 }
 0x6dc   : > { %v6989_v14 = vrot.slane %v6988_v54, 1 }
 0x6de   : > { %v6990_v17 = vadd.f32 %v6989_v14, %v6988_v54  ;;  %v7177_v54 = vld [vmem:[%s9303_s25 + $0x33] sm:$0xff]  ;;  %v7178_v14 = vld [vmem:[%s9303_s25 + $0x3b] sm:$0xff] }
 0x6e0   : > { %v6991_v31 = vmul.f32 0.00390625, %v6990_v17  ;;  %v7179_v17 = vld [vmem:[%s9303_s25 + $0x43] sm:$0xff] }
 0x6e2   : > { %7868 = vmatmul.mubr.f32.vlgmr.msra.gmra.mrb[108].mxu1 %v6991_v31  ;;  %v7180_v31 = vld [vmem:[%s9303_s25 + $0x4b] sm:$0xff] }
 0x7b5   : > { %v7075_v30 = vpop.f32.mrb[108].mxu1 }
 0x7b6   : > { %v7076_v36 = vadd.f32 %v7075_v30, %v7008_v45  ;;  %v7869_v46 = vpop.f32.mrb[109].mxu1  ;;  %v7182_v30 = vld [vmem:[%s9303_s25 + $0x5b] sm:$0xff] }
 0x7b7   : > { %v7184_v46 = vld [vmem:[%s9303_s25 + $0x6b] sm:$0xff] }
 0x7b8   : > { %v7079_v12 = vmax.f32 %v7076_v36, 0.0  ;;  %v7183_v36 = vld [vmem:[%s9303_s25 + $0x63] sm:$0xff] }
 0x7ba   : > { %7903 = vmatmul.mubr.f32.vlgmr.msra.gmra.mrb[108].mxu0 %v7079_v12 }
 0x88d   : > { %v7163_v5 = vpop.f32.mrb[108].mxu0 }
 0x88e   : > { %v7164_v18 = vadd.f32 %v7163_v5, %v7096_v9  ;;  %v7904_v1 = vpop.f32.mrb[109].mxu0  ;;  %v7185_v9 = vld [vmem:[%s9303_s25 + $0x73] sm:$0xff]  ;;  %v7187_v5 = vld [vmem:[%s9303_s25 + $0x83] sm:$0xff] }
 0x890   : > { %v7641_v62 = vmul.f32 -1.442695, %v7164_v18 }
 0x892   : > { %8775 = vpow2.f32 %v7641_v62 }
 0x89c   : > { %v8776_v51 = vpop.eup %8775 }
 0x89d   : > { %v7170_v48 = vadd.f32 1.0, %v8776_v51  ;;  %v7190_v51 = vld [vmem:[%s9303_s25 + $0x9b] sm:$0xff] }
 0x89f   : > { %8777 = vrcp.f32 %v7170_v48 }
 0x8a9   : > { %v8778_v35 = vpop.eup %8777 }
 0x8aa   : > { %v7212_v3 = vrot.slane %v8778_v35, %v7211_v21  ;;  %v7193_v21 = vld [vmem:[%s9303_s25 + $0xb3] sm:$0xff] }
 0x8ac   : > { %v7213_v34 = vmul.f32 %v7212_v3, %v12044_v42  ;;  %v7214_v28 = vmul.f32 %v7212_v3, %v12049_v7  ;;  %v7215_v20 = vmul.f32 %v7212_v3, %v12053_v27  ;;  %v7216_v56 = vmul.f32 %v7212_v3, %v12057_v58 }
 0x8ad   : > { %v7217_v50 = vmul.f32 %v7212_v3, %v12061_v22  ;;  %v7218_v4 = vmul.f32 %v7212_v3, %v12065_v40  ;;  %v7219_v11 = vmul.f32 %v7212_v3, %v12069_v32  ;;  %v7220_v16 = vmul.f32 %v7212_v3, %v12073_v41 }
 0x8ae   : > { %v12318_v42 = vmul.f32 %v7212_v3, %v12077_v19  ;;  %v12321_v7 = vmul.f32 %v7212_v3, %v12082_v55  ;;  %v12324_v27 = vmul.f32 %v7212_v3, %v12096_v59  ;;  %v12327_v58 = vmul.f32 %v7212_v3, %v12101_v25  ;;  %v7173_v19 = vld [vmem:[%s9303_s25 + $0x13] sm:$0xff]  ;;  %v7174_v55 = vld [vmem:[%s9303_s25 + $0x1b] sm:$0xff]  ;;  %v7175_v59 = vld [vmem:[%s9303_s25 + $0x23] sm:$0xff] }
 0x8af   : > { %v12330_v22 = vmul.f32 %v7212_v3, %v12112_v43  ;;  %v12333_v40 = vmul.f32 %v7212_v3, %v12120_v24  ;;  %v12336_v32 = vmul.f32 %v7212_v3, %v12131_v61  ;;  %v12339_v41 = vmul.f32 %v7212_v3, %v12139_v53  ;;  %v7176_v25 = vld [vmem:[%s9303_s25 + $0x2b] sm:$0xff] }
 0x8b0   : > { %v12346_v43 = vmul.f32 %v7212_v3, %v12149_v38  ;;  %v12349_v24 = vmul.f32 %v7212_v3, %v12153_v52  ;;  %v12352_v61 = vmul.f32 %v7212_v3, %v12163_v47  ;;  %v12355_v53 = vmul.f32 %v7212_v3, %v12170_v60  ;;  %v7181_v60 = vld [vmem:[%s9303_s25 + $0x53] sm:$0xff] }
 0x8b1   : > { %v12362_v45 = vmul.f32 %v7212_v3, %v12180_v8  ;;  %v12365_v38 = vmul.f32 %v7212_v3, %v12187_v33  ;;  %v12368_v52 = vmul.f32 %v7212_v3, %v12197_v29  ;;  %v12371_v47 = vmul.f32 %v7212_v3, %v12201_v6  ;;  %v7186_v6 = vld [vmem:[%s9303_s25 + $0x7b] sm:$0xff] }
 0x8b2   : > { %v7237_v12 = vmul.f32 %v7212_v3, %v12211_v10  ;;  %v7238_v8 = vmul.f32 %v7212_v3, %v12218_v37  ;;  %v7239_v33 = vmul.f32 %v7212_v3, %v12228_v44  ;;  %v7240_v29 = vmul.f32 %v7212_v3, %v12235_v13  ;;  %v7188_v37 = vld [vmem:[%s9303_s25 + $0x8b] sm:$0xff]  ;;  %v7189_v44 = vld [vmem:[%s9303_s25 + $0x93] sm:$0xff] }
 0x8b3   : > { %13418 = vst [vmem:[#allocation39_spill] sm:$0xff] %v12365_v38  ;;  %13419 = vst [vmem:[#allocation81_spill] sm:$0xff] %v12368_v52  ;;  %v7241_v18 = vmul.f32 %v7212_v3, %v12245_v63  ;;  %v7242_v1 = vmul.f32 %v7212_v3, %v12249_v2  ;;  %v7243_v62 = vmul.f32 %v7212_v3, %v12259_v0  ;;  %v7191_v2 = vld [vmem:[%s9303_s25 + $0xa3] sm:$0xff]  ;;  %v7192_v0 = vld [vmem:[%s9303_s25 + $0xab] sm:$0xff] }
 0x8b4   : > { %13420 = vst [vmem:[#allocation77_spill] sm:$0xff] %v12371_v47  ;;  %v7244_v10 = vmul.f32 %v7212_v3, %v12266_v39  ;;  %v7245_v13 = vmul.f32 %v7212_v3, %v12276_v57  ;;  %v7246_v48 = vmul.f32 %v7212_v3, %v12283_v26  ;;  %v7247_v49 = vmul.f32 %v7212_v3, %v12290_v15  ;;  %v7194_v26 = vld [vmem:[%s9303_s25 + $0xbb] sm:$0xff]  ;;  %v7195_v15 = vld [vmem:[%s9303_s25 + $0xc3] sm:$0xff]  ;;  %v7196_v52 = vld [vmem:[%s9303_s25 + $0xcb] sm:$0xff] }
 0x8b5   : > { %v7248_v63 = vmul.f32 %v7212_v3, %v12297_v23  ;;  %v12398_v39 = vadd.f32 %v7213_v34, %v7173_v19  ;;  %v12400_v35 = vadd.f32 %v7214_v28, %v7174_v55  ;;  %v12402_v47 = vadd.f32 %v7215_v20, %v7175_v59  ;;  %v7197_v28 = vld [vmem:[%s9303_s25 + $0xd3] sm:$0xff]  ;;  %v7198_v20 = vld [vmem:[%s9303_s25 + $0xdb] sm:$0xff] }
 0x8b6   : > { %v12404_v57 = vadd.f32 %v7216_v56, %v7176_v25  ;;  %v12409_v23 = vadd.f32 %v7217_v50, %v7177_v54  ;;  %v12411_v3 = vadd.f32 %v7218_v4, %v7178_v14  ;;  %v12413_v38 = vadd.f32 %v7219_v11, %v7179_v17  ;;  %v7199_v56 = vld [vmem:[%s9303_s25 + $0xe3] sm:$0xff]  ;;  %v7200_v11 = vld [vmem:[%s9303_s25 + $0xeb] sm:$0xff]  ;;  %v7202_v59 = vld [vmem:[%s9303_s25 + $0xfb] sm:$0xff] }
 0x8b7   : > { %v12415_v34 = vadd.f32 %v7220_v16, %v7180_v31  ;;  %v12421_v19 = vadd.f32 %v12318_v42, %v7181_v60  ;;  %v12424_v55 = vadd.f32 %v12321_v7, %v7182_v30  ;;  %v12427_v50 = vadd.f32 %v12324_v27, %v7183_v36  ;;  %v7201_v16 = vld [vmem:[%s9303_s25 + $0xf3] sm:$0xff]  ;;  %v7204_v54 = vld [vmem:[%s9303_s25 + $0x10b] sm:$0xff]  ;;  %v7207_v60 = vld [vmem:[%s9303_s25 + $0x123] sm:$0xff] }
 0x8b8   : > { %v12430_v4 = vadd.f32 %v12327_v58, %v7184_v46  ;;  %v12436_v25 = vadd.f32 %v12330_v22, %v7185_v9  ;;  %v12439_v42 = vadd.f32 %v12333_v40, %v7186_v6  ;;  %v12442_v7 = vadd.f32 %v12336_v32, %v7187_v5  ;;  %v7203_v58 = vld [vmem:[%s9303_s25 + $0x103] sm:$0xff]  ;;  %v7205_v14 = vld [vmem:[%s9303_s25 + $0x113] sm:$0xff]  ;;  %v7206_v32 = vld [vmem:[%s9303_s25 + $0x11b] sm:$0xff] }
 0x8b9   : > { %v12445_v27 = vadd.f32 %v12339_v41, %v7188_v37  ;;  %v12452_v17 = vadd.f32 %v12346_v43, %v7189_v44  ;;  %v12455_v31 = vadd.f32 %v12349_v24, %v7190_v51  ;;  %v12458_v22 = vadd.f32 %v12352_v61, %v7191_v2  ;;  %v7208_v41 = vld [vmem:[%s9303_s25 + $0x12b] sm:$0xff] }
 0x8ba   : > { %v12461_v40 = vadd.f32 %v12355_v53, %v7192_v0  ;;  %v12467_v30 = vadd.f32 %v12362_v45, %v7193_v21  ;;  %v13421_v36 = vld [vmem:[#allocation39_spill] sm:$0xff]  ;;  %v13422_v43 = vld [vmem:[#allocation81_spill] sm:$0xff]  ;;  %v12478_v61 = vadd.f32 %v7237_v12, %v7197_v28  ;;  %v12480_v5 = vadd.f32 %v7238_v8, %v7198_v20 }
 0x8bb   : > { %v12470_v46 = vadd.f32 %v13421_v36, %v7194_v26  ;;  %v12473_v9 = vadd.f32 %v13422_v43, %v7195_v15  ;;  %v13423_v24 = vld [vmem:[#allocation77_spill] sm:$0xff]  ;;  %v12482_v53 = vadd.f32 %v7239_v33, %v7199_v56  ;;  %v12484_v37 = vadd.f32 %v7240_v29, %v7200_v11 }
 0x8bc   : > { %v12476_v6 = vadd.f32 %v13423_v24, %v7196_v52  ;;  %v12486_v44 = vadd.f32 %v7241_v18, %v7201_v16  ;;  %v12488_v45 = vadd.f32 %v7242_v1, %v7202_v59  ;;  %v12490_v51 = vadd.f32 %v7243_v62, %v7203_v58 }
 0x8bd   : > { %v12492_v2 = vadd.f32 %v7244_v10, %v7204_v54  ;;  %v12494_v0 = vadd.f32 %v7245_v13, %v7205_v14  ;;  %v12496_v52 = vadd.f32 %v7246_v48, %v7206_v32  ;;  %v12498_v12 = vadd.f32 %v7247_v49, %v7207_v60 }
 0x8be   : > { %v12500_v8 = vadd.f32 %v7248_v63, %v7208_v41  ;;  %v7285_v33 = vmax.f32 %v12398_v39, 0.0  ;;  %v7286_v29 = vmax.f32 %v12400_v35, 0.0  ;;  %v7287_v18 = vmax.f32 %v12402_v47, 0.0 }
 0x8bf   : > { %v7288_v1 = vmax.f32 %v12404_v57, 0.0  ;;  %v7289_v62 = vmax.f32 %v12409_v23, 0.0  ;;  %v7290_v10 = vmax.f32 %v12411_v3, 0.0  ;;  %v7291_v13 = vmax.f32 %v12413_v38, 0.0 }
 0x8c0   : > { %v7292_v48 = vmax.f32 %v12415_v34, 0.0  ;;  %v7293_v49 = vmax.f32 %v12421_v19, 0.0  ;;  %v7294_v63 = vmax.f32 %v12424_v55, 0.0  ;;  %v7295_v21 = vmax.f32 %v12427_v50, 0.0  ;;  %7321 = vst [vmem:[%s12516_s30] sm:$0xff] %v7285_v33  ;;  %7322 = vst [vmem:[%s12516_s30 + $0x8] sm:$0xff] %v7286_v29 }
 0x8c1   : > { %v7296_v39 = vmax.f32 %v12430_v4, 0.0  ;;  %7323 = vst [vmem:[%s12516_s30 + $0x10] sm:$0xff] %v7287_v18  ;;  %7324 = vst [vmem:[%s12516_s30 + $0x18] sm:$0xff] %v7288_v1  ;;  %v7297_v38 = vmax.f32 %v12436_v25, 0.0  ;;  %v7298_v47 = vmax.f32 %v12439_v42, 0.0  ;;  %v7299_v35 = vmax.f32 %v12442_v7, 0.0 }
 0x8c2   : > { %v7300_v57 = vmax.f32 %v12445_v27, 0.0  ;;  %7325 = vst [vmem:[%s12516_s30 + $0x20] sm:$0xff] %v7289_v62  ;;  %7326 = vst [vmem:[%s12516_s30 + $0x28] sm:$0xff] %v7290_v10  ;;  %v7301_v26 = vmax.f32 %v12452_v17, 0.0  ;;  %v7302_v15 = vmax.f32 %v12455_v31, 0.0  ;;  %v7303_v23 = vmax.f32 %v12458_v22, 0.0 }
 0x8c3   : > { %7327 = vst [vmem:[%s12516_s30 + $0x30] sm:$0xff] %v7291_v13  ;;  %7328 = vst [vmem:[%s12516_s30 + $0x38] sm:$0xff] %v7292_v48  ;;  %v7304_v3 = vmax.f32 %v12461_v40, 0.0  ;;  %v7305_v34 = vmax.f32 %v12467_v30, 0.0  ;;  %v7306_v28 = vmax.f32 %v12470_v46, 0.0  ;;  %v7307_v20 = vmax.f32 %v12473_v9, 0.0 }
 0x8c4   : > { %7329 = vst [vmem:[%s12516_s30 + $0x40] sm:$0xff] %v7293_v49  ;;  %7330 = vst [vmem:[%s12516_s30 + $0x48] sm:$0xff] %v7294_v63  ;;  %v7308_v56 = vmax.f32 %v12476_v6, 0.0  ;;  %v7309_v19 = vmax.f32 %v12478_v61, 0.0  ;;  %v7310_v55 = vmax.f32 %v12480_v5, 0.0  ;;  %v7311_v50 = vmax.f32 %v12482_v53, 0.0 }
 0x8c5   : > { %7331 = vst [vmem:[%s12516_s30 + $0x50] sm:$0xff] %v7295_v21  ;;  %7332 = vst [vmem:[%s12516_s30 + $0x58] sm:$0xff] %v7296_v39  ;;  %v7312_v4 = vmax.f32 %v12484_v37, 0.0  ;;  %v7313_v11 = vmax.f32 %v12486_v44, 0.0  ;;  %v7314_v16 = vmax.f32 %v12488_v45, 0.0  ;;  %v7315_v59 = vmax.f32 %v12490_v51, 0.0 }
 0x8c6   : > { %7333 = vst [vmem:[%s12516_s30 + $0x60] sm:$0xff] %v7297_v38  ;;  %7334 = vst [vmem:[%s12516_s30 + $0x68] sm:$0xff] %v7298_v47  ;;  %v7316_v25 = vmax.f32 %v12492_v2, 0.0  ;;  %v7317_v42 = vmax.f32 %v12494_v0, 0.0  ;;  %v7318_v7 = vmax.f32 %v12496_v52, 0.0  ;;  %v7319_v27 = vmax.f32 %v12498_v12, 0.0 }
 0x8c7   : > { %7335 = vst [vmem:[%s12516_s30 + $0x70] sm:$0xff] %v7299_v35  ;;  %7336 = vst [vmem:[%s12516_s30 + $0x78] sm:$0xff] %v7300_v57  ;;  %v7320_v58 = vmax.f32 %v12500_v8, 0.0 }
 0x8c8   : > { %7337 = vst [vmem:[%s12516_s30 + $0x80] sm:$0xff] %v7301_v26  ;;  %7338 = vst [vmem:[%s12516_s30 + $0x88] sm:$0xff] %v7302_v15 }
 0x8c9   : > { %7339 = vst [vmem:[%s12516_s30 + $0x90] sm:$0xff] %v7303_v23  ;;  %7340 = vst [vmem:[%s12516_s30 + $0x98] sm:$0xff] %v7304_v3 }
 0x8ca   : > { %7341 = vst [vmem:[%s12516_s30 + $0xa0] sm:$0xff] %v7305_v34  ;;  %7342 = vst [vmem:[%s12516_s30 + $0xa8] sm:$0xff] %v7306_v28 }
 0x8cb   : > { %7343 = vst [vmem:[%s12516_s30 + $0xb0] sm:$0xff] %v7307_v20  ;;  %7344 = vst [vmem:[%s12516_s30 + $0xb8] sm:$0xff] %v7308_v56 }
 0x8cc   : > { %7345 = vst [vmem:[%s12516_s30 + $0xc0] sm:$0xff] %v7309_v19  ;;  %7346 = vst [vmem:[%s12516_s30 + $0xc8] sm:$0xff] %v7310_v55 }
 0x8cd   : > { %7347 = vst [vmem:[%s12516_s30 + $0xd0] sm:$0xff] %v7311_v50  ;;  %7348 = vst [vmem:[%s12516_s30 + $0xd8] sm:$0xff] %v7312_v4 }
 0x8ce   : > { %7349 = vst [vmem:[%s12516_s30 + $0xe0] sm:$0xff] %v7313_v11  ;;  %7350 = vst [vmem:[%s12516_s30 + $0xe8] sm:$0xff] %v7314_v16 }
 0x8cf   : > { %7351 = vst [vmem:[%s12516_s30 + $0xf0] sm:$0xff] %v7315_v59  ;;  %7352 = vst [vmem:[%s12516_s30 + $0xf8] sm:$0xff] %v7316_v25 }
 0x8d0   : > { %7353 = vst [vmem:[%s12516_s30 + $0x100] sm:$0xff] %v7317_v42  ;;  %7354 = vst [vmem:[%s12516_s30 + $0x108] sm:$0xff] %v7318_v7 }
 0x8d1   : > { %7355 = vst [vmem:[%s12516_s30 + $0x110] sm:$0xff] %v7319_v27  ;;  %7356 = vst [vmem:[%s12516_s30 + $0x118] sm:$0xff] %v7320_v58 }
 0x8d2   : > { %8940 = shalt.err (!%p8937_p13)
}
 0x8d3   : > { %s8941_s28 = scalar_lea.hbm %s12569_s17, 4608  ;;  %s8945_s1 = scalar_lea.hbm %s12640_s9, 9216 }
 0x8d4   : > { %p8942_p9 = scmp.ne.s32.totalorder %s12569_s17, %s8941_s28  ;;  %p8946_p6 = scmp.lt.u32.totalorder %s12569_s17, %s12640_s9 }
 0x8d5   : > { %p8947_p4 = scmp.lt.u32.totalorder %s8945_s1, %s8941_s28  ;;  %p8949_p10 = scmp.lt.u32.totalorder %s8941_s28, %s12569_s17 }
 0x8d6   : > { %p8943_p0 = pnand %p8942_p9, %p9247_p3 }
 0x8d7   : > { %p8948_p8 = por %p8947_p4, %p8946_p6 }
 0x8d8   : > { %p8944_p11 = pneg %p8943_p0 }
 0x8d9   : > { %p8950_p5 = por %p8949_p10, %p8948_p8 }
 0x8db   : > { %p8951_p7 = pnand %p8950_p5, %p8944_p11 }
 0x8dd   : > { %8954 = shalt.err (!%p8951_p7)
}
 0x8de   : > { %s9017_s14 = smov 128   ;;  %s9018_s25 = smov 8  }
 0x8df   : > { %8552 = dma.vmem_to_hbm [thread:$0]  (%p9247_p3), %s12579_s22, 4608, %s12569_s17, %s7358_s13, %s9017_s14, %s9017_s14, %s9018_s25  }
 0x8e0 PF: > { %s13424_s15 = sld [smem:[#allocation18_spill]]  ;;  %s13425_s24 = sld [smem:[#allocation19_spill]] }
 0x8e1   : > { %p13427_p1 = scmp.ge.s32.totalorder %s9001_s12, 2 }
 0x8e6   : > { %s7386_s16 = sand.u32 1, %s13424_s15   ;;  %p13426_p12 = scmp.ne.s32.totalorder %s13425_s24, 0 }
 0x8e7   : > { %s7387_s27 = scalar_lea.sflag [#allocation6], %s7386_s16 }
 0x8e8   : > { %p8572_p2 = pnand %p13427_p1, %p13426_p12 }
 0x8ea   : > { %8984 = dma.done.wait (!%p8572_p2), %s7387_s27, 4608  }
 0x8eb   : > { %8986 = vsyncadd (!%p8572_p2), %s7387_s27, 4294962688  ;;  %p24_p13 = scmp.ge.s32.totalorder %s9234_s20, 4   ;;  %s13428_s30 = smov %s8993_s10 }
 0x8ec   : > { %s13429_s10 = smov %s8997_s11  ;;  %s13430_s11 = smov %s9243_s21 }
 0x8ed   : > { %s13431_s12 = smov %s9234_s20  ;;  %26 = sbr.rel (!%p24_p13) target bundleno = 10 (0xa), region = 117 }
 0x8f4   :  { %7392 = vsyncpa [#allocation5], 1 }
 0x8f5   :  { %7394 = vsyncpa [#allocation5 + $0x1], 1 }
 0x8f6   :  { %7395 = vsyncpa [#allocation8], 1 }
 0x8f7   :  { %7396 = vsyncpa [#allocation11], 1 }
 0x8f8   :  { %7397 = vsyncpa [#allocation6], 1 }
 0x8f9   :  { %7399 = vsyncpa [#allocation6 + $0x1], 1 }

</bundles_post_ra>
